<compile_context>
chip_gen: v6e
topology: v6e:2x2x1
jax: 0.10.0
libtpu: 0.0.40
codegen_flags: <defaults>
</compile_context>

<pallas_src>
import jax
import jax.numpy as jnp
from jax.experimental import pallas as pl
from jax.experimental.pallas import tpu as pltpu


def _round_up(x, m):
    return ((x + m - 1) // m) * m


# ---------------------------------------------------------------------------
# Static geometry of the (small, synthetic) CyVGG feature stack:
#   4 -> 32 conv, pool ; 32 -> 128 conv, pool ; 128 -> 512 conv, pool
#   8x8 -> 4x4 -> 2x2 -> 1x1  (so the flatten gives exactly 512 features).
# Each stage works on a "padded flat" layout: the cylindrically padded
# (Hp, Wp, C) map flattened to (Hp*Wp, C) rows plus a zero tail so the nine
# shifted-window reads never run out of rows.
# ---------------------------------------------------------------------------
H0 = W0 = 8
CIN = 4
NUM_CLASSES = 10
NPAD = 128                        # lane-padded classifier output width

HP1, WP1 = H0 + 2, W0 + 2                       # 10, 10
M1 = _round_up(HP1 * WP1, 8)                    # 104 conv-1 output rows
R1 = _round_up(M1 + 2 * WP1 + 2, 8)             # 128 padded-flat input rows

HP2, WP2 = 4 + 2, 4 + 2                         # 6, 6
M2 = _round_up(HP2 * WP2, 8)                    # 40
R2 = _round_up(M2 + 2 * WP2 + 2, 8)             # 56

HP3, WP3 = 2 + 2, 2 + 2                         # 4, 4
M3 = _round_up(HP3 * WP3, 8)                    # 16
R3 = _round_up(M3 + 2 * WP3 + 2, 8)             # 32


# ---------------------------------------------------------------------------
# Fused whole-network kernel (one grid step == one image)
# ---------------------------------------------------------------------------
def _cyvgg_kernel(x_ref,
                  w1_ref, b1_ref, w2_ref, b2_ref, w3_ref, b3_ref,
                  fw1_ref, fb1_ref, fw2_ref, fb2_ref, fw3_ref, fb3_ref,
                  out_ref,
                  x2_sc, x3_sc):
    # Zero the padded-flat scratch inputs of stages 2/3: the zero rows provide
    # the zero H-padding of the cylindrical conv and a finite tail.
    x2_sc[...] = jnp.zeros(x2_sc.shape, x2_sc.dtype)
    x3_sc[...] = jnp.zeros(x3_sc.shape, x3_sc.dtype)

    def conv3x3(load, w_ref, b_ref, m_rows, wp):
        # Cylindrical 3x3 conv as 9 shifted-window matmuls on the padded-flat
        # layout; bf16 MXU inputs, f32 accumulation, f32 bias+ReLU epilogue.
        cout = w_ref.shape[-1]
        acc = jnp.zeros((m_rows, cout), jnp.float32)
        for dh in range(3):
            for dw in range(3):
                k = dh * 3 + dw
                patch = load(dh * wp + dw, m_rows).astype(jnp.bfloat16)
                acc = acc + jnp.dot(patch, w_ref[k],
                                    preferred_element_type=jnp.float32)
        return jnp.maximum(acc + b_ref[...], 0.0)

    def pool_into(y, h, w, wp, dst_ref, dst_wp):
        # 2x2 stride-2 max pool of y (valid rows live at padded coords
        # h*wp + w); scatter pooled rows straight into the next stage's
        # padded-flat input buffer, including the circular W-pad columns.
        ho, wo = h // 2, w // 2
        for i in range(ho):
            row = []
            for j in range(wo):
                r0 = (2 * i) * wp + 2 * j
                r1 = r0 + wp
                m = jnp.maximum(y[r0:r0 + 2, :], y[r1:r1 + 2, :])
                p = jnp.max(m, axis=0, keepdims=True)          # (1, cout) f32
                row.append(p)
                dst_ref[pl.ds((i + 1) * dst_wp + (j + 1), 1), :] = p
            dst_ref[pl.ds((i + 1) * dst_wp, 1), :] = row[wo - 1]       # wrap L
            dst_ref[pl.ds((i + 1) * dst_wp + wo + 1, 1), :] = row[0]   # wrap R

    # ---- stage 1: CyConv(4 -> 32) + ReLU + pool ---------------------------
    y1 = conv3x3(lambda s, m: x_ref[0, pl.ds(s, m), :], w1_ref, b1_ref, M1, WP1)
    pool_into(y1, H0, W0, WP1, x2_sc, WP2)

    # ---- stage 2: CyConv(32 -> 128) + ReLU + pool -------------------------
    y2 = conv3x3(lambda s, m: x2_sc[pl.ds(s, m), :], w2_ref, b2_ref, M2, WP2)
    pool_into(y2, 4, 4, WP2, x3_sc, WP3)

    # ---- stage 3: CyConv(128 -> 512) + ReLU + pool -> (1, 512) ------------
    y3 = conv3x3(lambda s, m: x3_sc[pl.ds(s, m), :], w3_ref, b3_ref, M3, WP3)
    m3 = jnp.maximum(y3[0:2, :], y3[WP3:WP3 + 2, :])
    feat = jnp.max(m3, axis=0, keepdims=True)                  # (1, 512) f32

    # ---- classifier: Dropout(eval)=identity, Linear+ReLU x2, Linear -------
    # TODO(synk): Dropout is identity here (eval-mode semantics); train-mode
    # stochastic dropout is not implemented.
    a = jnp.maximum(
        jnp.dot(feat.astype(jnp.bfloat16), fw1_ref[...],
                preferred_element_type=jnp.float32) + fb1_ref[...], 0.0)
    a = jnp.maximum(
        jnp.dot(a.astype(jnp.bfloat16), fw2_ref[...],
                preferred_element_type=jnp.float32) + fb2_ref[...], 0.0)
    logits = jnp.dot(a.astype(jnp.bfloat16), fw3_ref[...],
                     preferred_element_type=jnp.float32) + fb3_ref[...]
    out_ref[0] = logits                                        # (1, 128) f32


# ---------------------------------------------------------------------------
# Parameter init (deterministic, synthetic).  NOTE: to load real PyTorch
# weights, permute Conv2d (Cout,Cin,kh,kw) -> (kh,kw,Cin,Cout) and Linear
# (out,in) -> (in,out) before applying these layouts.
# ---------------------------------------------------------------------------
def init_params(key, num_classes=NUM_CLASSES):
    ks = jax.random.split(key, 6)

    def conv_w(k, cin, cout):
        w = jax.random.normal(k, (3, 3, cin, cout), jnp.float32)
        w = w * (2.0 / (9 * cin)) ** 0.5
        return w.reshape(9, cin, cout).astype(jnp.bfloat16)

    def lin_w(k, cin, cout, pad_to=None):
        w = jax.random.normal(k, (cin, cout), jnp.float32) * (2.0 / cin) ** 0.5
        if pad_to is not None and pad_to > cout:
            w = jnp.pad(w, ((0, 0), (0, pad_to - cout)))
        return w.astype(jnp.bfloat16)

    return {
        "conv1_w": conv_w(ks[0], 4, 32),
        "conv1_b": jnp.zeros((1, 32), jnp.float32),
        "conv2_w": conv_w(ks[1], 32, 128),
        "conv2_b": jnp.zeros((1, 128), jnp.float32),
        "conv3_w": conv_w(ks[2], 128, 512),
        "conv3_b": jnp.zeros((1, 512), jnp.float32),
        "fc1_w": lin_w(ks[3], 512, 512),
        "fc1_b": jnp.zeros((1, 512), jnp.float32),
        "fc2_w": lin_w(ks[4], 512, 512),
        "fc2_b": jnp.zeros((1, 512), jnp.float32),
        "fc3_w": lin_w(ks[5], 512, num_classes, pad_to=NPAD),
        "fc3_b": jnp.zeros((1, NPAD), jnp.float32),
    }


# ---------------------------------------------------------------------------
# Forward pass (mirrors CyVGG.forward with classify=True, eval mode)
# ---------------------------------------------------------------------------
def cyvgg_forward(x_nchw, params, num_classes=NUM_CLASSES):
    n, c, h, w = x_nchw.shape
    assert (c, h, w) == (CIN, H0, W0), (
        "feature stack expects 4x8x8 inputs so the pools collapse to 1x1x512")

    # NCHW -> NHWC, cylindrical pad (circular W, zero H), flatten to
    # padded-flat rows (hp*Wp + wp) with a zero tail: the only wrapper glue.
    x = jnp.transpose(x_nchw, (0, 2, 3, 1)).astype(jnp.float32)
    xp = jnp.concatenate([x[:, :, -1:, :], x, x[:, :, :1, :]], axis=2)
    xp = jnp.pad(xp, ((0, 0), (1, 1), (0, 0), (0, 0)))          # (N, 10, 10, 4)
    xf = xp.reshape(n, HP1 * WP1, CIN)
    xf = jnp.pad(xf, ((0, 0), (0, R1 - HP1 * WP1), (0, 0)))     # (N, R1, 4)

    out = pl.pallas_call(
        _cyvgg_kernel,
        out_shape=jax.ShapeDtypeStruct((n, 1, NPAD), jnp.float32),
        grid=(n,),
        in_specs=[
            pl.BlockSpec((1, R1, CIN), lambda i: (i, 0, 0)),
            pl.BlockSpec((9, 4, 32), lambda i: (0, 0, 0)),
            pl.BlockSpec((1, 32), lambda i: (0, 0)),
            pl.BlockSpec((9, 32, 128), lambda i: (0, 0, 0)),
            pl.BlockSpec((1, 128), lambda i: (0, 0)),
            pl.BlockSpec((9, 128, 512), lambda i: (0, 0, 0)),
            pl.BlockSpec((1, 512), lambda i: (0, 0)),
            pl.BlockSpec((512, 512), lambda i: (0, 0)),
            pl.BlockSpec((1, 512), lambda i: (0, 0)),
            pl.BlockSpec((512, 512), lambda i: (0, 0)),
            pl.BlockSpec((1, 512), lambda i: (0, 0)),
            pl.BlockSpec((512, NPAD), lambda i: (0, 0)),
            pl.BlockSpec((1, NPAD), lambda i: (0, 0)),
        ],
        out_specs=pl.BlockSpec((1, 1, NPAD), lambda i: (i, 0, 0)),
        scratch_shapes=[
            pltpu.VMEM((R2, 32), jnp.float32),    # stage-2 padded-flat input
            pltpu.VMEM((R3, 128), jnp.float32),   # stage-3 padded-flat input
        ],
        compiler_params=pltpu.CompilerParams(
            dimension_semantics=("parallel",)),
    )(xf,
      params["conv1_w"], params["conv1_b"],
      params["conv2_w"], params["conv2_b"],
      params["conv3_w"], params["conv3_b"],
      params["fc1_w"], params["fc1_b"],
      params["fc2_w"], params["fc2_b"],
      params["fc3_w"], params["fc3_b"])

    return out.reshape(n, NPAD)[:, :num_classes]


if __name__ == "__main__":
    key = jax.random.PRNGKey(0)
    k_x, k_p = jax.random.split(key)
    # small input consistent with the feature stack: NCHW (2, 4, 8, 8)
    x = jax.random.normal(k_x, (2, 4, 8, 8), jnp.float32)
    params = init_params(k_p, num_classes=NUM_CLASSES)

    fwd = jax.jit(cyvgg_forward)
    out = fwd(x, params)
    out = jax.block_until_ready(out)
    assert out.shape == (2, 10), out.shape
    assert bool(jnp.all(jnp.isfinite(out)))
    print("KERNEL_OK")
</pallas_src>

<mosaic_0001>
module attributes {stable_mosaic.version = 11 : i64} {
  func.func @_cyvgg_kernel(%arg0: i32, %arg1: memref<1x128x4xf32, #tpu.memory_space<vmem>>, %arg2: memref<9x4x32xbf16, #tpu.memory_space<vmem>>, %arg3: memref<1x32xf32, #tpu.memory_space<vmem>>, %arg4: memref<9x32x128xbf16, #tpu.memory_space<vmem>>, %arg5: memref<1x128xf32, #tpu.memory_space<vmem>>, %arg6: memref<9x128x512xbf16, #tpu.memory_space<vmem>>, %arg7: memref<1x512xf32, #tpu.memory_space<vmem>>, %arg8: memref<512x512xbf16, #tpu.memory_space<vmem>>, %arg9: memref<1x512xf32, #tpu.memory_space<vmem>>, %arg10: memref<512x512xbf16, #tpu.memory_space<vmem>>, %arg11: memref<1x512xf32, #tpu.memory_space<vmem>>, %arg12: memref<512x128xbf16, #tpu.memory_space<vmem>>, %arg13: memref<1x128xf32, #tpu.memory_space<vmem>>, %arg14: memref<1x1x128xf32, #tpu.memory_space<vmem>>, %arg15: memref<56x32xf32, #tpu.memory_space<vmem>>, %arg16: memref<32x128xf32, #tpu.memory_space<vmem>>) attributes {dimension_semantics = [#tpu.dimension_semantics<parallel>], iteration_bounds = array<i64: 2>, scalar_prefetch = 0 : i64, scratch_operands = 2 : i64, tpu.core_type = #tpu.core_type<tc>, window_params = [{transform_indices = @transform_0, window_bounds = array<i64: 1, 128, 4>}, {pipeline_mode = #tpu.pipeline_mode<synchronous>, transform_indices = @transform_1, window_bounds = array<i64: 9, 4, 32>}, {pipeline_mode = #tpu.pipeline_mode<synchronous>, transform_indices = @transform_2, window_bounds = array<i64: 1, 32>}, {pipeline_mode = #tpu.pipeline_mode<synchronous>, transform_indices = @transform_3, window_bounds = array<i64: 9, 32, 128>}, {pipeline_mode = #tpu.pipeline_mode<synchronous>, transform_indices = @transform_4, window_bounds = array<i64: 1, 128>}, {pipeline_mode = #tpu.pipeline_mode<synchronous>, transform_indices = @transform_5, window_bounds = array<i64: 9, 128, 512>}, {pipeline_mode = #tpu.pipeline_mode<synchronous>, transform_indices = @transform_6, window_bounds = array<i64: 1, 512>}, {pipeline_mode = #tpu.pipeline_mode<synchronous>, transform_indices = @transform_7, window_bounds = array<i64: 512, 512>}, {pipeline_mode = #tpu.pipeline_mode<synchronous>, transform_indices = @transform_8, window_bounds = array<i64: 1, 512>}, {pipeline_mode = #tpu.pipeline_mode<synchronous>, transform_indices = @transform_9, window_bounds = array<i64: 512, 512>}, {pipeline_mode = #tpu.pipeline_mode<synchronous>, transform_indices = @transform_10, window_bounds = array<i64: 1, 512>}, {pipeline_mode = #tpu.pipeline_mode<synchronous>, transform_indices = @transform_11, window_bounds = array<i64: 512, 128>}, {pipeline_mode = #tpu.pipeline_mode<synchronous>, transform_indices = @transform_12, window_bounds = array<i64: 1, 128>}, {transform_indices = @transform_13, window_bounds = array<i64: 1, 1, 128>}]} {
    %cst = arith.constant 0.000000e+00 : f32
    %0 = vector.broadcast %cst : f32 to vector<56x32xf32>
    %c0 = arith.constant 0 : index
    %c0_0 = arith.constant 0 : index
    %1 = vector.load %arg15[%c0, %c0_0] : memref<56x32xf32, #tpu.memory_space<vmem>>, vector<56x32xf32>
    tpu.vector_store %arg15[%c0, %c0_0], %0 {strides = array<i32>} : memref<56x32xf32, #tpu.memory_space<vmem>>, vector<56x32xf32>,
    %cst_1 = arith.constant 0.000000e+00 : f32
    %2 = vector.broadcast %cst_1 : f32 to vector<32x128xf32>
    %c0_2 = arith.constant 0 : index
    %c0_3 = arith.constant 0 : index
    %3 = vector.load %arg16[%c0_2, %c0_3] : memref<32x128xf32, #tpu.memory_space<vmem>>, vector<32x128xf32>
    tpu.vector_store %arg16[%c0_2, %c0_3], %2 {strides = array<i32>} : memref<32x128xf32, #tpu.memory_space<vmem>>, vector<32x128xf32>,
    %cst_4 = arith.constant 0.000000e+00 : f32
    %4 = vector.broadcast %cst_4 : f32 to vector<104x32xf32>
    %c0_5 = arith.constant 0 : index
    %c0_6 = arith.constant 0 : index
    %c0_7 = arith.constant 0 : index
    %5 = vector.load %arg1[%c0_5, %c0_6, %c0_7] : memref<1x128x4xf32, #tpu.memory_space<vmem>>, vector<1x104x4xf32>
    %6 = vector.shape_cast %5 : vector<1x104x4xf32> to vector<104x4xf32>
    %7 = arith.truncf %6 : vector<104x4xf32> to vector<104x4xbf16>
    %c0_8 = arith.constant 0 : index
    %c0_9 = arith.constant 0 : index
    %c0_10 = arith.constant 0 : index
    %8 = vector.load %arg2[%c0_8, %c0_9, %c0_10] : memref<9x4x32xbf16, #tpu.memory_space<vmem>>, vector<1x4x32xbf16>
    %9 = vector.shape_cast %8 : vector<1x4x32xbf16> to vector<4x32xbf16>
    %cst_11 = arith.constant dense<0.000000e+00> : vector<104x32xf32>
    %10 = tpu.matmul %7, %9, %cst_11 {dimension_numbers = #tpu.dot_dimension_numbers<[1], [0], [0], [1], [0, 0, 1, 1], [], []>} : vector<104x4xbf16>, vector<4x32xbf16>, vector<104x32xf32> -> vector<104x32xf32>
    %11 = arith.addf %4, %10 : vector<104x32xf32>
    %c0_12 = arith.constant 0 : index
    %c1 = arith.constant 1 : index
    %c0_13 = arith.constant 0 : index
    %12 = vector.load %arg1[%c0_12, %c1, %c0_13] : memref<1x128x4xf32, #tpu.memory_space<vmem>>, vector<1x104x4xf32>
    %13 = vector.shape_cast %12 : vector<1x104x4xf32> to vector<104x4xf32>
    %14 = arith.truncf %13 : vector<104x4xf32> to vector<104x4xbf16>
    %c1_14 = arith.constant 1 : index
    %c0_15 = arith.constant 0 : index
    %c0_16 = arith.constant 0 : index
    %15 = vector.load %arg2[%c1_14, %c0_15, %c0_16] : memref<9x4x32xbf16, #tpu.memory_space<vmem>>, vector<1x4x32xbf16>
    %16 = vector.shape_cast %15 : vector<1x4x32xbf16> to vector<4x32xbf16>
    %cst_17 = arith.constant dense<0.000000e+00> : vector<104x32xf32>
    %17 = tpu.matmul %14, %16, %cst_17 {dimension_numbers = #tpu.dot_dimension_numbers<[1], [0], [0], [1], [0, 0, 1, 1], [], []>} : vector<104x4xbf16>, vector<4x32xbf16>, vector<104x32xf32> -> vector<104x32xf32>
    %18 = arith.addf %11, %17 : vector<104x32xf32>
    %c0_18 = arith.constant 0 : index
    %c2 = arith.constant 2 : index
    %c0_19 = arith.constant 0 : index
    %19 = vector.load %arg1[%c0_18, %c2, %c0_19] : memref<1x128x4xf32, #tpu.memory_space<vmem>>, vector<1x104x4xf32>
    %20 = vector.shape_cast %19 : vector<1x104x4xf32> to vector<104x4xf32>
    %21 = arith.truncf %20 : vector<104x4xf32> to vector<104x4xbf16>
    %c2_20 = arith.constant 2 : index
    %c0_21 = arith.constant 0 : index
    %c0_22 = arith.constant 0 : index
    %22 = vector.load %arg2[%c2_20, %c0_21, %c0_22] : memref<9x4x32xbf16, #tpu.memory_space<vmem>>, vector<1x4x32xbf16>
    %23 = vector.shape_cast %22 : vector<1x4x32xbf16> to vector<4x32xbf16>
    %cst_23 = arith.constant dense<0.000000e+00> : vector<104x32xf32>
    %24 = tpu.matmul %21, %23, %cst_23 {dimension_numbers = #tpu.dot_dimension_numbers<[1], [0], [0], [1], [0, 0, 1, 1], [], []>} : vector<104x4xbf16>, vector<4x32xbf16>, vector<104x32xf32> -> vector<104x32xf32>
    %25 = arith.addf %18, %24 : vector<104x32xf32>
    %c0_24 = arith.constant 0 : index
    %c10 = arith.constant 10 : index
    %c0_25 = arith.constant 0 : index
    %26 = vector.load %arg1[%c0_24, %c10, %c0_25] : memref<1x128x4xf32, #tpu.memory_space<vmem>>, vector<1x104x4xf32>
    %27 = vector.shape_cast %26 : vector<1x104x4xf32> to vector<104x4xf32>
    %28 = arith.truncf %27 : vector<104x4xf32> to vector<104x4xbf16>
    %c3 = arith.constant 3 : index
    %c0_26 = arith.constant 0 : index
    %c0_27 = arith.constant 0 : index
    %29 = vector.load %arg2[%c3, %c0_26, %c0_27] : memref<9x4x32xbf16, #tpu.memory_space<vmem>>, vector<1x4x32xbf16>
    %30 = vector.shape_cast %29 : vector<1x4x32xbf16> to vector<4x32xbf16>
    %cst_28 = arith.constant dense<0.000000e+00> : vector<104x32xf32>
    %31 = tpu.matmul %28, %30, %cst_28 {dimension_numbers = #tpu.dot_dimension_numbers<[1], [0], [0], [1], [0, 0, 1, 1], [], []>} : vector<104x4xbf16>, vector<4x32xbf16>, vector<104x32xf32> -> vector<104x32xf32>
    %32 = arith.addf %25, %31 : vector<104x32xf32>
    %c0_29 = arith.constant 0 : index
    %c11 = arith.constant 11 : index
    %c0_30 = arith.constant 0 : index
    %33 = vector.load %arg1[%c0_29, %c11, %c0_30] : memref<1x128x4xf32, #tpu.memory_space<vmem>>, vector<1x104x4xf32>
    %34 = vector.shape_cast %33 : vector<1x104x4xf32> to vector<104x4xf32>
    %35 = arith.truncf %34 : vector<104x4xf32> to vector<104x4xbf16>
    %c4 = arith.constant 4 : index
    %c0_31 = arith.constant 0 : index
    %c0_32 = arith.constant 0 : index
    %36 = vector.load %arg2[%c4, %c0_31, %c0_32] : memref<9x4x32xbf16, #tpu.memory_space<vmem>>, vector<1x4x32xbf16>
    %37 = vector.shape_cast %36 : vector<1x4x32xbf16> to vector<4x32xbf16>
    %cst_33 = arith.constant dense<0.000000e+00> : vector<104x32xf32>
    %38 = tpu.matmul %35, %37, %cst_33 {dimension_numbers = #tpu.dot_dimension_numbers<[1], [0], [0], [1], [0, 0, 1, 1], [], []>} : vector<104x4xbf16>, vector<4x32xbf16>, vector<104x32xf32> -> vector<104x32xf32>
    %39 = arith.addf %32, %38 : vector<104x32xf32>
    %c0_34 = arith.constant 0 : index
    %c12 = arith.constant 12 : index
    %c0_35 = arith.constant 0 : index
    %40 = vector.load %arg1[%c0_34, %c12, %c0_35] : memref<1x128x4xf32, #tpu.memory_space<vmem>>, vector<1x104x4xf32>
    %41 = vector.shape_cast %40 : vector<1x104x4xf32> to vector<104x4xf32>
    %42 = arith.truncf %41 : vector<104x4xf32> to vector<104x4xbf16>
    %c5 = arith.constant 5 : index
    %c0_36 = arith.constant 0 : index
    %c0_37 = arith.constant 0 : index
    %43 = vector.load %arg2[%c5, %c0_36, %c0_37] : memref<9x4x32xbf16, #tpu.memory_space<vmem>>, vector<1x4x32xbf16>
    %44 = vector.shape_cast %43 : vector<1x4x32xbf16> to vector<4x32xbf16>
    %cst_38 = arith.constant dense<0.000000e+00> : vector<104x32xf32>
    %45 = tpu.matmul %42, %44, %cst_38 {dimension_numbers = #tpu.dot_dimension_numbers<[1], [0], [0], [1], [0, 0, 1, 1], [], []>} : vector<104x4xbf16>, vector<4x32xbf16>, vector<104x32xf32> -> vector<104x32xf32>
    %46 = arith.addf %39, %45 : vector<104x32xf32>
    %c0_39 = arith.constant 0 : index
    %c20 = arith.constant 20 : index
    %c0_40 = arith.constant 0 : index
    %47 = vector.load %arg1[%c0_39, %c20, %c0_40] : memref<1x128x4xf32, #tpu.memory_space<vmem>>, vector<1x104x4xf32>
    %48 = vector.shape_cast %47 : vector<1x104x4xf32> to vector<104x4xf32>
    %49 = arith.truncf %48 : vector<104x4xf32> to vector<104x4xbf16>
    %c6 = arith.constant 6 : index
    %c0_41 = arith.constant 0 : index
    %c0_42 = arith.constant 0 : index
    %50 = vector.load %arg2[%c6, %c0_41, %c0_42] : memref<9x4x32xbf16, #tpu.memory_space<vmem>>, vector<1x4x32xbf16>
    %51 = vector.shape_cast %50 : vector<1x4x32xbf16> to vector<4x32xbf16>
    %cst_43 = arith.constant dense<0.000000e+00> : vector<104x32xf32>
    %52 = tpu.matmul %49, %51, %cst_43 {dimension_numbers = #tpu.dot_dimension_numbers<[1], [0], [0], [1], [0, 0, 1, 1], [], []>} : vector<104x4xbf16>, vector<4x32xbf16>, vector<104x32xf32> -> vector<104x32xf32>
    %53 = arith.addf %46, %52 : vector<104x32xf32>
    %c0_44 = arith.constant 0 : index
    %c21 = arith.constant 21 : index
    %c0_45 = arith.constant 0 : index
    %54 = vector.load %arg1[%c0_44, %c21, %c0_45] : memref<1x128x4xf32, #tpu.memory_space<vmem>>, vector<1x104x4xf32>
    %55 = vector.shape_cast %54 : vector<1x104x4xf32> to vector<104x4xf32>
    %56 = arith.truncf %55 : vector<104x4xf32> to vector<104x4xbf16>
    %c7 = arith.constant 7 : index
    %c0_46 = arith.constant 0 : index
    %c0_47 = arith.constant 0 : index
    %57 = vector.load %arg2[%c7, %c0_46, %c0_47] : memref<9x4x32xbf16, #tpu.memory_space<vmem>>, vector<1x4x32xbf16>
    %58 = vector.shape_cast %57 : vector<1x4x32xbf16> to vector<4x32xbf16>
    %cst_48 = arith.constant dense<0.000000e+00> : vector<104x32xf32>
    %59 = tpu.matmul %56, %58, %cst_48 {dimension_numbers = #tpu.dot_dimension_numbers<[1], [0], [0], [1], [0, 0, 1, 1], [], []>} : vector<104x4xbf16>, vector<4x32xbf16>, vector<104x32xf32> -> vector<104x32xf32>
    %60 = arith.addf %53, %59 : vector<104x32xf32>
    %c0_49 = arith.constant 0 : index
    %c22 = arith.constant 22 : index
    %c0_50 = arith.constant 0 : index
    %61 = vector.load %arg1[%c0_49, %c22, %c0_50] : memref<1x128x4xf32, #tpu.memory_space<vmem>>, vector<1x104x4xf32>
    %62 = vector.shape_cast %61 : vector<1x104x4xf32> to vector<104x4xf32>
    %63 = arith.truncf %62 : vector<104x4xf32> to vector<104x4xbf16>
    %c8 = arith.constant 8 : index
    %c0_51 = arith.constant 0 : index
    %c0_52 = arith.constant 0 : index
    %64 = vector.load %arg2[%c8, %c0_51, %c0_52] : memref<9x4x32xbf16, #tpu.memory_space<vmem>>, vector<1x4x32xbf16>
    %65 = vector.shape_cast %64 : vector<1x4x32xbf16> to vector<4x32xbf16>
    %cst_53 = arith.constant dense<0.000000e+00> : vector<104x32xf32>
    %66 = tpu.matmul %63, %65, %cst_53 {dimension_numbers = #tpu.dot_dimension_numbers<[1], [0], [0], [1], [0, 0, 1, 1], [], []>} : vector<104x4xbf16>, vector<4x32xbf16>, vector<104x32xf32> -> vector<104x32xf32>
    %67 = arith.addf %60, %66 : vector<104x32xf32>
    %c0_54 = arith.constant 0 : index
    %c0_55 = arith.constant 0 : index
    %68 = vector.load %arg3[%c0_54, %c0_55] : memref<1x32xf32, #tpu.memory_space<vmem>>, vector<1x32xf32>
    %69 = vector.broadcast %68 : vector<1x32xf32> to vector<104x32xf32>
    %70 = arith.addf %67, %69 : vector<104x32xf32>
    %cst_56 = arith.constant 0.000000e+00 : f32
    %71 = vector.broadcast %cst_56 : f32 to vector<104x32xf32>
    %72 = arith.maximumf %70, %71 : vector<104x32xf32>
    %73 = vector.extract_strided_slice %72 {offsets = [0, 0], sizes = [2, 32], strides = [1, 1]} : vector<104x32xf32> to vector<2x32xf32>
    %74 = vector.extract_strided_slice %72 {offsets = [10, 0], sizes = [2, 32], strides = [1, 1]} : vector<104x32xf32> to vector<2x32xf32>
    %75 = arith.maximumf %73, %74 : vector<2x32xf32>
    %cst_57 = arith.constant dense<0xFF800000> : vector<32xf32>
    %76 = vector.multi_reduction <maximumf>, %75, %cst_57 [0] : vector<2x32xf32> to vector<32xf32>
    %77 = vector.shape_cast %76 : vector<32xf32> to vector<1x32xf32>
    %c7_58 = arith.constant 7 : index
    %c0_59 = arith.constant 0 : index
    %78 = vector.load %arg15[%c7_58, %c0_59] : memref<56x32xf32, #tpu.memory_space<vmem>>, vector<1x32xf32>
    tpu.vector_store %arg15[%c7_58, %c0_59], %77 {strides = array<i32>} : memref<56x32xf32, #tpu.memory_space<vmem>>, vector<1x32xf32>,
    %79 = vector.extract_strided_slice %72 {offsets = [2, 0], sizes = [2, 32], strides = [1, 1]} : vector<104x32xf32> to vector<2x32xf32>
    %80 = vector.extract_strided_slice %72 {offsets = [12, 0], sizes = [2, 32], strides = [1, 1]} : vector<104x32xf32> to vector<2x32xf32>
    %81 = arith.maximumf %79, %80 : vector<2x32xf32>
    %cst_60 = arith.constant dense<0xFF800000> : vector<32xf32>
    %82 = vector.multi_reduction <maximumf>, %81, %cst_60 [0] : vector<2x32xf32> to vector<32xf32>
    %83 = vector.shape_cast %82 : vector<32xf32> to vector<1x32xf32>
    %c8_61 = arith.constant 8 : index
    %c0_62 = arith.constant 0 : index
    %84 = vector.load %arg15[%c8_61, %c0_62] : memref<56x32xf32, #tpu.memory_space<vmem>>, vector<1x32xf32>
    tpu.vector_store %arg15[%c8_61, %c0_62], %83 {strides = array<i32>} : memref<56x32xf32, #tpu.memory_space<vmem>>, vector<1x32xf32>,
    %85 = vector.extract_strided_slice %72 {offsets = [4, 0], sizes = [2, 32], strides = [1, 1]} : vector<104x32xf32> to vector<2x32xf32>
    %86 = vector.extract_strided_slice %72 {offsets = [14, 0], sizes = [2, 32], strides = [1, 1]} : vector<104x32xf32> to vector<2x32xf32>
    %87 = arith.maximumf %85, %86 : vector<2x32xf32>
    %cst_63 = arith.constant dense<0xFF800000> : vector<32xf32>
    %88 = vector.multi_reduction <maximumf>, %87, %cst_63 [0] : vector<2x32xf32> to vector<32xf32>
    %89 = vector.shape_cast %88 : vector<32xf32> to vector<1x32xf32>
    %c9 = arith.constant 9 : index
    %c0_64 = arith.constant 0 : index
    %90 = vector.load %arg15[%c9, %c0_64] : memref<56x32xf32, #tpu.memory_space<vmem>>, vector<1x32xf32>
    tpu.vector_store %arg15[%c9, %c0_64], %89 {strides = array<i32>} : memref<56x32xf32, #tpu.memory_space<vmem>>, vector<1x32xf32>,
    %91 = vector.extract_strided_slice %72 {offsets = [6, 0], sizes = [2, 32], strides = [1, 1]} : vector<104x32xf32> to vector<2x32xf32>
    %92 = vector.extract_strided_slice %72 {offsets = [16, 0], sizes = [2, 32], strides = [1, 1]} : vector<104x32xf32> to vector<2x32xf32>
    %93 = arith.maximumf %91, %92 : vector<2x32xf32>
    %cst_65 = arith.constant dense<0xFF800000> : vector<32xf32>
    %94 = vector.multi_reduction <maximumf>, %93, %cst_65 [0] : vector<2x32xf32> to vector<32xf32>
    %95 = vector.shape_cast %94 : vector<32xf32> to vector<1x32xf32>
    %c10_66 = arith.constant 10 : index
    %c0_67 = arith.constant 0 : index
    %96 = vector.load %arg15[%c10_66, %c0_67] : memref<56x32xf32, #tpu.memory_space<vmem>>, vector<1x32xf32>
    tpu.vector_store %arg15[%c10_66, %c0_67], %95 {strides = array<i32>} : memref<56x32xf32, #tpu.memory_space<vmem>>, vector<1x32xf32>,
    %c6_68 = arith.constant 6 : index
    %c0_69 = arith.constant 0 : index
    %97 = vector.load %arg15[%c6_68, %c0_69] : memref<56x32xf32, #tpu.memory_space<vmem>>, vector<1x32xf32>
    tpu.vector_store %arg15[%c6_68, %c0_69], %95 {strides = array<i32>} : memref<56x32xf32, #tpu.memory_space<vmem>>, vector<1x32xf32>,
    %c11_70 = arith.constant 11 : index
    %c0_71 = arith.constant 0 : index
    %98 = vector.load %arg15[%c11_70, %c0_71] : memref<56x32xf32, #tpu.memory_space<vmem>>, vector<1x32xf32>
    tpu.vector_store %arg15[%c11_70, %c0_71], %77 {strides = array<i32>} : memref<56x32xf32, #tpu.memory_space<vmem>>, vector<1x32xf32>,
    %99 = vector.extract_strided_slice %72 {offsets = [20, 0], sizes = [2, 32], strides = [1, 1]} : vector<104x32xf32> to vector<2x32xf32>
    %100 = vector.extract_strided_slice %72 {offsets = [30, 0], sizes = [2, 32], strides = [1, 1]} : vector<104x32xf32> to vector<2x32xf32>
    %101 = arith.maximumf %99, %100 : vector<2x32xf32>
    %cst_72 = arith.constant dense<0xFF800000> : vector<32xf32>
    %102 = vector.multi_reduction <maximumf>, %101, %cst_72 [0] : vector<2x32xf32> to vector<32xf32>
    %103 = vector.shape_cast %102 : vector<32xf32> to vector<1x32xf32>
    %c13 = arith.constant 13 : index
    %c0_73 = arith.constant 0 : index
    %104 = vector.load %arg15[%c13, %c0_73] : memref<56x32xf32, #tpu.memory_space<vmem>>, vector<1x32xf32>
    tpu.vector_store %arg15[%c13, %c0_73], %103 {strides = array<i32>} : memref<56x32xf32, #tpu.memory_space<vmem>>, vector<1x32xf32>,
    %105 = vector.extract_strided_slice %72 {offsets = [22, 0], sizes = [2, 32], strides = [1, 1]} : vector<104x32xf32> to vector<2x32xf32>
    %106 = vector.extract_strided_slice %72 {offsets = [32, 0], sizes = [2, 32], strides = [1, 1]} : vector<104x32xf32> to vector<2x32xf32>
    %107 = arith.maximumf %105, %106 : vector<2x32xf32>
    %cst_74 = arith.constant dense<0xFF800000> : vector<32xf32>
    %108 = vector.multi_reduction <maximumf>, %107, %cst_74 [0] : vector<2x32xf32> to vector<32xf32>
    %109 = vector.shape_cast %108 : vector<32xf32> to vector<1x32xf32>
    %c14 = arith.constant 14 : index
    %c0_75 = arith.constant 0 : index
    %110 = vector.load %arg15[%c14, %c0_75] : memref<56x32xf32, #tpu.memory_space<vmem>>, vector<1x32xf32>
    tpu.vector_store %arg15[%c14, %c0_75], %109 {strides = array<i32>} : memref<56x32xf32, #tpu.memory_space<vmem>>, vector<1x32xf32>,
    %111 = vector.extract_strided_slice %72 {offsets = [24, 0], sizes = [2, 32], strides = [1, 1]} : vector<104x32xf32> to vector<2x32xf32>
    %112 = vector.extract_strided_slice %72 {offsets = [34, 0], sizes = [2, 32], strides = [1, 1]} : vector<104x32xf32> to vector<2x32xf32>
    %113 = arith.maximumf %111, %112 : vector<2x32xf32>
    %cst_76 = arith.constant dense<0xFF800000> : vector<32xf32>
    %114 = vector.multi_reduction <maximumf>, %113, %cst_76 [0] : vector<2x32xf32> to vector<32xf32>
    %115 = vector.shape_cast %114 : vector<32xf32> to vector<1x32xf32>
    %c15 = arith.constant 15 : index
    %c0_77 = arith.constant 0 : index
    %116 = vector.load %arg15[%c15, %c0_77] : memref<56x32xf32, #tpu.memory_space<vmem>>, vector<1x32xf32>
    tpu.vector_store %arg15[%c15, %c0_77], %115 {strides = array<i32>} : memref<56x32xf32, #tpu.memory_space<vmem>>, vector<1x32xf32>,
    %117 = vector.extract_strided_slice %72 {offsets = [26, 0], sizes = [2, 32], strides = [1, 1]} : vector<104x32xf32> to vector<2x32xf32>
    %118 = vector.extract_strided_slice %72 {offsets = [36, 0], sizes = [2, 32], strides = [1, 1]} : vector<104x32xf32> to vector<2x32xf32>
    %119 = arith.maximumf %117, %118 : vector<2x32xf32>
    %cst_78 = arith.constant dense<0xFF800000> : vector<32xf32>
    %120 = vector.multi_reduction <maximumf>, %119, %cst_78 [0] : vector<2x32xf32> to vector<32xf32>
    %121 = vector.shape_cast %120 : vector<32xf32> to vector<1x32xf32>
    %c16 = arith.constant 16 : index
    %c0_79 = arith.constant 0 : index
    %122 = vector.load %arg15[%c16, %c0_79] : memref<56x32xf32, #tpu.memory_space<vmem>>, vector<1x32xf32>
    tpu.vector_store %arg15[%c16, %c0_79], %121 {strides = array<i32>} : memref<56x32xf32, #tpu.memory_space<vmem>>, vector<1x32xf32>,
    %c12_80 = arith.constant 12 : index
    %c0_81 = arith.constant 0 : index
    %123 = vector.load %arg15[%c12_80, %c0_81] : memref<56x32xf32, #tpu.memory_space<vmem>>, vector<1x32xf32>
    tpu.vector_store %arg15[%c12_80, %c0_81], %121 {strides = array<i32>} : memref<56x32xf32, #tpu.memory_space<vmem>>, vector<1x32xf32>,
    %c17 = arith.constant 17 : index
    %c0_82 = arith.constant 0 : index
    %124 = vector.load %arg15[%c17, %c0_82] : memref<56x32xf32, #tpu.memory_space<vmem>>, vector<1x32xf32>
    tpu.vector_store %arg15[%c17, %c0_82], %103 {strides = array<i32>} : memref<56x32xf32, #tpu.memory_space<vmem>>, vector<1x32xf32>,
    %125 = vector.extract_strided_slice %72 {offsets = [40, 0], sizes = [2, 32], strides = [1, 1]} : vector<104x32xf32> to vector<2x32xf32>
    %126 = vector.extract_strided_slice %72 {offsets = [50, 0], sizes = [2, 32], strides = [1, 1]} : vector<104x32xf32> to vector<2x32xf32>
    %127 = arith.maximumf %125, %126 : vector<2x32xf32>
    %cst_83 = arith.constant dense<0xFF800000> : vector<32xf32>
    %128 = vector.multi_reduction <maximumf>, %127, %cst_83 [0] : vector<2x32xf32> to vector<32xf32>
    %129 = vector.shape_cast %128 : vector<32xf32> to vector<1x32xf32>
    %c19 = arith.constant 19 : index
    %c0_84 = arith.constant 0 : index
    %130 = vector.load %arg15[%c19, %c0_84] : memref<56x32xf32, #tpu.memory_space<vmem>>, vector<1x32xf32>
    tpu.vector_store %arg15[%c19, %c0_84], %129 {strides = array<i32>} : memref<56x32xf32, #tpu.memory_space<vmem>>, vector<1x32xf32>,
    %131 = vector.extract_strided_slice %72 {offsets = [42, 0], sizes = [2, 32], strides = [1, 1]} : vector<104x32xf32> to vector<2x32xf32>
    %132 = vector.extract_strided_slice %72 {offsets = [52, 0], sizes = [2, 32], strides = [1, 1]} : vector<104x32xf32> to vector<2x32xf32>
    %133 = arith.maximumf %131, %132 : vector<2x32xf32>
    %cst_85 = arith.constant dense<0xFF800000> : vector<32xf32>
    %134 = vector.multi_reduction <maximumf>, %133, %cst_85 [0] : vector<2x32xf32> to vector<32xf32>
    %135 = vector.shape_cast %134 : vector<32xf32> to vector<1x32xf32>
    %c20_86 = arith.constant 20 : index
    %c0_87 = arith.constant 0 : index
    %136 = vector.load %arg15[%c20_86, %c0_87] : memref<56x32xf32, #tpu.memory_space<vmem>>, vector<1x32xf32>
    tpu.vector_store %arg15[%c20_86, %c0_87], %135 {strides = array<i32>} : memref<56x32xf32, #tpu.memory_space<vmem>>, vector<1x32xf32>,
    %137 = vector.extract_strided_slice %72 {offsets = [44, 0], sizes = [2, 32], strides = [1, 1]} : vector<104x32xf32> to vector<2x32xf32>
    %138 = vector.extract_strided_slice %72 {offsets = [54, 0], sizes = [2, 32], strides = [1, 1]} : vector<104x32xf32> to vector<2x32xf32>
    %139 = arith.maximumf %137, %138 : vector<2x32xf32>
    %cst_88 = arith.constant dense<0xFF800000> : vector<32xf32>
    %140 = vector.multi_reduction <maximumf>, %139, %cst_88 [0] : vector<2x32xf32> to vector<32xf32>
    %141 = vector.shape_cast %140 : vector<32xf32> to vector<1x32xf32>
    %c21_89 = arith.constant 21 : index
    %c0_90 = arith.constant 0 : index
    %142 = vector.load %arg15[%c21_89, %c0_90] : memref<56x32xf32, #tpu.memory_space<vmem>>, vector<1x32xf32>
    tpu.vector_store %arg15[%c21_89, %c0_90], %141 {strides = array<i32>} : memref<56x32xf32, #tpu.memory_space<vmem>>, vector<1x32xf32>,
    %143 = vector.extract_strided_slice %72 {offsets = [46, 0], sizes = [2, 32], strides = [1, 1]} : vector<104x32xf32> to vector<2x32xf32>
    %144 = vector.extract_strided_slice %72 {offsets = [56, 0], sizes = [2, 32], strides = [1, 1]} : vector<104x32xf32> to vector<2x32xf32>
    %145 = arith.maximumf %143, %144 : vector<2x32xf32>
    %cst_91 = arith.constant dense<0xFF800000> : vector<32xf32>
    %146 = vector.multi_reduction <maximumf>, %145, %cst_91 [0] : vector<2x32xf32> to vector<32xf32>
    %147 = vector.shape_cast %146 : vector<32xf32> to vector<1x32xf32>
    %c22_92 = arith.constant 22 : index
    %c0_93 = arith.constant 0 : index
    %148 = vector.load %arg15[%c22_92, %c0_93] : memref<56x32xf32, #tpu.memory_space<vmem>>, vector<1x32xf32>
    tpu.vector_store %arg15[%c22_92, %c0_93], %147 {strides = array<i32>} : memref<56x32xf32, #tpu.memory_space<vmem>>, vector<1x32xf32>,
    %c18 = arith.constant 18 : index
    %c0_94 = arith.constant 0 : index
    %149 = vector.load %arg15[%c18, %c0_94] : memref<56x32xf32, #tpu.memory_space<vmem>>, vector<1x32xf32>
    tpu.vector_store %arg15[%c18, %c0_94], %147 {strides = array<i32>} : memref<56x32xf32, #tpu.memory_space<vmem>>, vector<1x32xf32>,
    %c23 = arith.constant 23 : index
    %c0_95 = arith.constant 0 : index
    %150 = vector.load %arg15[%c23, %c0_95] : memref<56x32xf32, #tpu.memory_space<vmem>>, vector<1x32xf32>
    tpu.vector_store %arg15[%c23, %c0_95], %129 {strides = array<i32>} : memref<56x32xf32, #tpu.memory_space<vmem>>, vector<1x32xf32>,
    %151 = vector.extract_strided_slice %72 {offsets = [60, 0], sizes = [2, 32], strides = [1, 1]} : vector<104x32xf32> to vector<2x32xf32>
    %152 = vector.extract_strided_slice %72 {offsets = [70, 0], sizes = [2, 32], strides = [1, 1]} : vector<104x32xf32> to vector<2x32xf32>
    %153 = arith.maximumf %151, %152 : vector<2x32xf32>
    %cst_96 = arith.constant dense<0xFF800000> : vector<32xf32>
    %154 = vector.multi_reduction <maximumf>, %153, %cst_96 [0] : vector<2x32xf32> to vector<32xf32>
    %155 = vector.shape_cast %154 : vector<32xf32> to vector<1x32xf32>
    %c25 = arith.constant 25 : index
    %c0_97 = arith.constant 0 : index
    %156 = vector.load %arg15[%c25, %c0_97] : memref<56x32xf32, #tpu.memory_space<vmem>>, vector<1x32xf32>
    tpu.vector_store %arg15[%c25, %c0_97], %155 {strides = array<i32>} : memref<56x32xf32, #tpu.memory_space<vmem>>, vector<1x32xf32>,
    %157 = vector.extract_strided_slice %72 {offsets = [62, 0], sizes = [2, 32], strides = [1, 1]} : vector<104x32xf32> to vector<2x32xf32>
    %158 = vector.extract_strided_slice %72 {offsets = [72, 0], sizes = [2, 32], strides = [1, 1]} : vector<104x32xf32> to vector<2x32xf32>
    %159 = arith.maximumf %157, %158 : vector<2x32xf32>
    %cst_98 = arith.constant dense<0xFF800000> : vector<32xf32>
    %160 = vector.multi_reduction <maximumf>, %159, %cst_98 [0] : vector<2x32xf32> to vector<32xf32>
    %161 = vector.shape_cast %160 : vector<32xf32> to vector<1x32xf32>
    %c26 = arith.constant 26 : index
    %c0_99 = arith.constant 0 : index
    %162 = vector.load %arg15[%c26, %c0_99] : memref<56x32xf32, #tpu.memory_space<vmem>>, vector<1x32xf32>
    tpu.vector_store %arg15[%c26, %c0_99], %161 {strides = array<i32>} : memref<56x32xf32, #tpu.memory_space<vmem>>, vector<1x32xf32>,
    %163 = vector.extract_strided_slice %72 {offsets = [64, 0], sizes = [2, 32], strides = [1, 1]} : vector<104x32xf32> to vector<2x32xf32>
    %164 = vector.extract_strided_slice %72 {offsets = [74, 0], sizes = [2, 32], strides = [1, 1]} : vector<104x32xf32> to vector<2x32xf32>
    %165 = arith.maximumf %163, %164 : vector<2x32xf32>
    %cst_100 = arith.constant dense<0xFF800000> : vector<32xf32>
    %166 = vector.multi_reduction <maximumf>, %165, %cst_100 [0] : vector<2x32xf32> to vector<32xf32>
    %167 = vector.shape_cast %166 : vector<32xf32> to vector<1x32xf32>
    %c27 = arith.constant 27 : index
    %c0_101 = arith.constant 0 : index
    %168 = vector.load %arg15[%c27, %c0_101] : memref<56x32xf32, #tpu.memory_space<vmem>>, vector<1x32xf32>
    tpu.vector_store %arg15[%c27, %c0_101], %167 {strides = array<i32>} : memref<56x32xf32, #tpu.memory_space<vmem>>, vector<1x32xf32>,
    %169 = vector.extract_strided_slice %72 {offsets = [66, 0], sizes = [2, 32], strides = [1, 1]} : vector<104x32xf32> to vector<2x32xf32>
    %170 = vector.extract_strided_slice %72 {offsets = [76, 0], sizes = [2, 32], strides = [1, 1]} : vector<104x32xf32> to vector<2x32xf32>
    %171 = arith.maximumf %169, %170 : vector<2x32xf32>
    %cst_102 = arith.constant dense<0xFF800000> : vector<32xf32>
    %172 = vector.multi_reduction <maximumf>, %171, %cst_102 [0] : vector<2x32xf32> to vector<32xf32>
    %173 = vector.shape_cast %172 : vector<32xf32> to vector<1x32xf32>
    %c28 = arith.constant 28 : index
    %c0_103 = arith.constant 0 : index
    %174 = vector.load %arg15[%c28, %c0_103] : memref<56x32xf32, #tpu.memory_space<vmem>>, vector<1x32xf32>
    tpu.vector_store %arg15[%c28, %c0_103], %173 {strides = array<i32>} : memref<56x32xf32, #tpu.memory_space<vmem>>, vector<1x32xf32>,
    %c24 = arith.constant 24 : index
    %c0_104 = arith.constant 0 : index
    %175 = vector.load %arg15[%c24, %c0_104] : memref<56x32xf32, #tpu.memory_space<vmem>>, vector<1x32xf32>
    tpu.vector_store %arg15[%c24, %c0_104], %173 {strides = array<i32>} : memref<56x32xf32, #tpu.memory_space<vmem>>, vector<1x32xf32>,
    %c29 = arith.constant 29 : index
    %c0_105 = arith.constant 0 : index
    %176 = vector.load %arg15[%c29, %c0_105] : memref<56x32xf32, #tpu.memory_space<vmem>>, vector<1x32xf32>
    tpu.vector_store %arg15[%c29, %c0_105], %155 {strides = array<i32>} : memref<56x32xf32, #tpu.memory_space<vmem>>, vector<1x32xf32>,
    %cst_106 = arith.constant 0.000000e+00 : f32
    %177 = vector.broadcast %cst_106 : f32 to vector<40x128xf32>
    %c0_107 = arith.constant 0 : index
    %c0_108 = arith.constant 0 : index
    %178 = vector.load %arg15[%c0_107, %c0_108] : memref<56x32xf32, #tpu.memory_space<vmem>>, vector<40x32xf32>
    %179 = arith.truncf %178 : vector<40x32xf32> to vector<40x32xbf16>
    %c0_109 = arith.constant 0 : index
    %c0_110 = arith.constant 0 : index
    %c0_111 = arith.constant 0 : index
    %180 = vector.load %arg4[%c0_109, %c0_110, %c0_111] : memref<9x32x128xbf16, #tpu.memory_space<vmem>>, vector<1x32x128xbf16>
    %181 = vector.shape_cast %180 : vector<1x32x128xbf16> to vector<32x128xbf16>
    %cst_112 = arith.constant dense<0.000000e+00> : vector<40x128xf32>
    %182 = tpu.matmul %179, %181, %cst_112 {dimension_numbers = #tpu.dot_dimension_numbers<[1], [0], [0], [1], [0, 0, 1, 1], [], []>} : vector<40x32xbf16>, vector<32x128xbf16>, vector<40x128xf32> -> vector<40x128xf32>
    %183 = arith.addf %177, %182 : vector<40x128xf32>
    %c1_113 = arith.constant 1 : index
    %c0_114 = arith.constant 0 : index
    %184 = vector.load %arg15[%c1_113, %c0_114] : memref<56x32xf32, #tpu.memory_space<vmem>>, vector<40x32xf32>
    %185 = arith.truncf %184 : vector<40x32xf32> to vector<40x32xbf16>
    %c1_115 = arith.constant 1 : index
    %c0_116 = arith.constant 0 : index
    %c0_117 = arith.constant 0 : index
    %186 = vector.load %arg4[%c1_115, %c0_116, %c0_117] : memref<9x32x128xbf16, #tpu.memory_space<vmem>>, vector<1x32x128xbf16>
    %187 = vector.shape_cast %186 : vector<1x32x128xbf16> to vector<32x128xbf16>
    %cst_118 = arith.constant dense<0.000000e+00> : vector<40x128xf32>
    %188 = tpu.matmul %185, %187, %cst_118 {dimension_numbers = #tpu.dot_dimension_numbers<[1], [0], [0], [1], [0, 0, 1, 1], [], []>} : vector<40x32xbf16>, vector<32x128xbf16>, vector<40x128xf32> -> vector<40x128xf32>
    %189 = arith.addf %183, %188 : vector<40x128xf32>
    %c2_119 = arith.constant 2 : index
    %c0_120 = arith.constant 0 : index
    %190 = vector.load %arg15[%c2_119, %c0_120] : memref<56x32xf32, #tpu.memory_space<vmem>>, vector<40x32xf32>
    %191 = arith.truncf %190 : vector<40x32xf32> to vector<40x32xbf16>
    %c2_121 = arith.constant 2 : index
    %c0_122 = arith.constant 0 : index
    %c0_123 = arith.constant 0 : index
    %192 = vector.load %arg4[%c2_121, %c0_122, %c0_123] : memref<9x32x128xbf16, #tpu.memory_space<vmem>>, vector<1x32x128xbf16>
    %193 = vector.shape_cast %192 : vector<1x32x128xbf16> to vector<32x128xbf16>
    %cst_124 = arith.constant dense<0.000000e+00> : vector<40x128xf32>
    %194 = tpu.matmul %191, %193, %cst_124 {dimension_numbers = #tpu.dot_dimension_numbers<[1], [0], [0], [1], [0, 0, 1, 1], [], []>} : vector<40x32xbf16>, vector<32x128xbf16>, vector<40x128xf32> -> vector<40x128xf32>
    %195 = arith.addf %189, %194 : vector<40x128xf32>
    %c6_125 = arith.constant 6 : index
    %c0_126 = arith.constant 0 : index
    %196 = vector.load %arg15[%c6_125, %c0_126] : memref<56x32xf32, #tpu.memory_space<vmem>>, vector<40x32xf32>
    %197 = arith.truncf %196 : vector<40x32xf32> to vector<40x32xbf16>
    %c3_127 = arith.constant 3 : index
    %c0_128 = arith.constant 0 : index
    %c0_129 = arith.constant 0 : index
    %198 = vector.load %arg4[%c3_127, %c0_128, %c0_129] : memref<9x32x128xbf16, #tpu.memory_space<vmem>>, vector<1x32x128xbf16>
    %199 = vector.shape_cast %198 : vector<1x32x128xbf16> to vector<32x128xbf16>
    %cst_130 = arith.constant dense<0.000000e+00> : vector<40x128xf32>
    %200 = tpu.matmul %197, %199, %cst_130 {dimension_numbers = #tpu.dot_dimension_numbers<[1], [0], [0], [1], [0, 0, 1, 1], [], []>} : vector<40x32xbf16>, vector<32x128xbf16>, vector<40x128xf32> -> vector<40x128xf32>
    %201 = arith.addf %195, %200 : vector<40x128xf32>
    %c7_131 = arith.constant 7 : index
    %c0_132 = arith.constant 0 : index
    %202 = vector.load %arg15[%c7_131, %c0_132] : memref<56x32xf32, #tpu.memory_space<vmem>>, vector<40x32xf32>
    %203 = arith.truncf %202 : vector<40x32xf32> to vector<40x32xbf16>
    %c4_133 = arith.constant 4 : index
    %c0_134 = arith.constant 0 : index
    %c0_135 = arith.constant 0 : index
    %204 = vector.load %arg4[%c4_133, %c0_134, %c0_135] : memref<9x32x128xbf16, #tpu.memory_space<vmem>>, vector<1x32x128xbf16>
    %205 = vector.shape_cast %204 : vector<1x32x128xbf16> to vector<32x128xbf16>
    %cst_136 = arith.constant dense<0.000000e+00> : vector<40x128xf32>
    %206 = tpu.matmul %203, %205, %cst_136 {dimension_numbers = #tpu.dot_dimension_numbers<[1], [0], [0], [1], [0, 0, 1, 1], [], []>} : vector<40x32xbf16>, vector<32x128xbf16>, vector<40x128xf32> -> vector<40x128xf32>
    %207 = arith.addf %201, %206 : vector<40x128xf32>
    %c8_137 = arith.constant 8 : index
    %c0_138 = arith.constant 0 : index
    %208 = vector.load %arg15[%c8_137, %c0_138] : memref<56x32xf32, #tpu.memory_space<vmem>>, vector<40x32xf32>
    %209 = arith.truncf %208 : vector<40x32xf32> to vector<40x32xbf16>
    %c5_139 = arith.constant 5 : index
    %c0_140 = arith.constant 0 : index
    %c0_141 = arith.constant 0 : index
    %210 = vector.load %arg4[%c5_139, %c0_140, %c0_141] : memref<9x32x128xbf16, #tpu.memory_space<vmem>>, vector<1x32x128xbf16>
    %211 = vector.shape_cast %210 : vector<1x32x128xbf16> to vector<32x128xbf16>
    %cst_142 = arith.constant dense<0.000000e+00> : vector<40x128xf32>
    %212 = tpu.matmul %209, %211, %cst_142 {dimension_numbers = #tpu.dot_dimension_numbers<[1], [0], [0], [1], [0, 0, 1, 1], [], []>} : vector<40x32xbf16>, vector<32x128xbf16>, vector<40x128xf32> -> vector<40x128xf32>
    %213 = arith.addf %207, %212 : vector<40x128xf32>
    %c12_143 = arith.constant 12 : index
    %c0_144 = arith.constant 0 : index
    %214 = vector.load %arg15[%c12_143, %c0_144] : memref<56x32xf32, #tpu.memory_space<vmem>>, vector<40x32xf32>
    %215 = arith.truncf %214 : vector<40x32xf32> to vector<40x32xbf16>
    %c6_145 = arith.constant 6 : index
    %c0_146 = arith.constant 0 : index
    %c0_147 = arith.constant 0 : index
    %216 = vector.load %arg4[%c6_145, %c0_146, %c0_147] : memref<9x32x128xbf16, #tpu.memory_space<vmem>>, vector<1x32x128xbf16>
    %217 = vector.shape_cast %216 : vector<1x32x128xbf16> to vector<32x128xbf16>
    %cst_148 = arith.constant dense<0.000000e+00> : vector<40x128xf32>
    %218 = tpu.matmul %215, %217, %cst_148 {dimension_numbers = #tpu.dot_dimension_numbers<[1], [0], [0], [1], [0, 0, 1, 1], [], []>} : vector<40x32xbf16>, vector<32x128xbf16>, vector<40x128xf32> -> vector<40x128xf32>
    %219 = arith.addf %213, %218 : vector<40x128xf32>
    %c13_149 = arith.constant 13 : index
    %c0_150 = arith.constant 0 : index
    %220 = vector.load %arg15[%c13_149, %c0_150] : memref<56x32xf32, #tpu.memory_space<vmem>>, vector<40x32xf32>
    %221 = arith.truncf %220 : vector<40x32xf32> to vector<40x32xbf16>
    %c7_151 = arith.constant 7 : index
    %c0_152 = arith.constant 0 : index
    %c0_153 = arith.constant 0 : index
    %222 = vector.load %arg4[%c7_151, %c0_152, %c0_153] : memref<9x32x128xbf16, #tpu.memory_space<vmem>>, vector<1x32x128xbf16>
    %223 = vector.shape_cast %222 : vector<1x32x128xbf16> to vector<32x128xbf16>
    %cst_154 = arith.constant dense<0.000000e+00> : vector<40x128xf32>
    %224 = tpu.matmul %221, %223, %cst_154 {dimension_numbers = #tpu.dot_dimension_numbers<[1], [0], [0], [1], [0, 0, 1, 1], [], []>} : vector<40x32xbf16>, vector<32x128xbf16>, vector<40x128xf32> -> vector<40x128xf32>
    %225 = arith.addf %219, %224 : vector<40x128xf32>
    %c14_155 = arith.constant 14 : index
    %c0_156 = arith.constant 0 : index
    %226 = vector.load %arg15[%c14_155, %c0_156] : memref<56x32xf32, #tpu.memory_space<vmem>>, vector<40x32xf32>
    %227 = arith.truncf %226 : vector<40x32xf32> to vector<40x32xbf16>
    %c8_157 = arith.constant 8 : index
    %c0_158 = arith.constant 0 : index
    %c0_159 = arith.constant 0 : index
    %228 = vector.load %arg4[%c8_157, %c0_158, %c0_159] : memref<9x32x128xbf16, #tpu.memory_space<vmem>>, vector<1x32x128xbf16>
    %229 = vector.shape_cast %228 : vector<1x32x128xbf16> to vector<32x128xbf16>
    %cst_160 = arith.constant dense<0.000000e+00> : vector<40x128xf32>
    %230 = tpu.matmul %227, %229, %cst_160 {dimension_numbers = #tpu.dot_dimension_numbers<[1], [0], [0], [1], [0, 0, 1, 1], [], []>} : vector<40x32xbf16>, vector<32x128xbf16>, vector<40x128xf32> -> vector<40x128xf32>
    %231 = arith.addf %225, %230 : vector<40x128xf32>
    %c0_161 = arith.constant 0 : index
    %c0_162 = arith.constant 0 : index
    %232 = vector.load %arg5[%c0_161, %c0_162] : memref<1x128xf32, #tpu.memory_space<vmem>>, vector<1x128xf32>
    %233 = vector.broadcast %232 : vector<1x128xf32> to vector<40x128xf32>
    %234 = arith.addf %231, %233 : vector<40x128xf32>
    %cst_163 = arith.constant 0.000000e+00 : f32
    %235 = vector.broadcast %cst_163 : f32 to vector<40x128xf32>
    %236 = arith.maximumf %234, %235 : vector<40x128xf32>
    %237 = vector.extract_strided_slice %236 {offsets = [0, 0], sizes = [2, 128], strides = [1, 1]} : vector<40x128xf32> to vector<2x128xf32>
    %238 = vector.extract_strided_slice %236 {offsets = [6, 0], sizes = [2, 128], strides = [1, 1]} : vector<40x128xf32> to vector<2x128xf32>
    %239 = arith.maximumf %237, %238 : vector<2x128xf32>
    %cst_164 = arith.constant dense<0xFF800000> : vector<128xf32>
    %240 = vector.multi_reduction <maximumf>, %239, %cst_164 [0] : vector<2x128xf32> to vector<128xf32>
    %241 = vector.shape_cast %240 : vector<128xf32> to vector<1x128xf32>
    %c5_165 = arith.constant 5 : index
    %c0_166 = arith.constant 0 : index
    %242 = vector.load %arg16[%c5_165, %c0_166] : memref<32x128xf32, #tpu.memory_space<vmem>>, vector<1x128xf32>
    tpu.vector_store %arg16[%c5_165, %c0_166], %241 {strides = array<i32>} : memref<32x128xf32, #tpu.memory_space<vmem>>, vector<1x128xf32>,
    %243 = vector.extract_strided_slice %236 {offsets = [2, 0], sizes = [2, 128], strides = [1, 1]} : vector<40x128xf32> to vector<2x128xf32>
    %244 = vector.extract_strided_slice %236 {offsets = [8, 0], sizes = [2, 128], strides = [1, 1]} : vector<40x128xf32> to vector<2x128xf32>
    %245 = arith.maximumf %243, %244 : vector<2x128xf32>
    %cst_167 = arith.constant dense<0xFF800000> : vector<128xf32>
    %246 = vector.multi_reduction <maximumf>, %245, %cst_167 [0] : vector<2x128xf32> to vector<128xf32>
    %247 = vector.shape_cast %246 : vector<128xf32> to vector<1x128xf32>
    %c6_168 = arith.constant 6 : index
    %c0_169 = arith.constant 0 : index
    %248 = vector.load %arg16[%c6_168, %c0_169] : memref<32x128xf32, #tpu.memory_space<vmem>>, vector<1x128xf32>
    tpu.vector_store %arg16[%c6_168, %c0_169], %247 {strides = array<i32>} : memref<32x128xf32, #tpu.memory_space<vmem>>, vector<1x128xf32>,
    %c4_170 = arith.constant 4 : index
    %c0_171 = arith.constant 0 : index
    %249 = vector.load %arg16[%c4_170, %c0_171] : memref<32x128xf32, #tpu.memory_space<vmem>>, vector<1x128xf32>
    tpu.vector_store %arg16[%c4_170, %c0_171], %247 {strides = array<i32>} : memref<32x128xf32, #tpu.memory_space<vmem>>, vector<1x128xf32>,
    %c7_172 = arith.constant 7 : index
    %c0_173 = arith.constant 0 : index
    %250 = vector.load %arg16[%c7_172, %c0_173] : memref<32x128xf32, #tpu.memory_space<vmem>>, vector<1x128xf32>
    tpu.vector_store %arg16[%c7_172, %c0_173], %241 {strides = array<i32>} : memref<32x128xf32, #tpu.memory_space<vmem>>, vector<1x128xf32>,
    %251 = vector.extract_strided_slice %236 {offsets = [12, 0], sizes = [2, 128], strides = [1, 1]} : vector<40x128xf32> to vector<2x128xf32>
    %252 = vector.extract_strided_slice %236 {offsets = [18, 0], sizes = [2, 128], strides = [1, 1]} : vector<40x128xf32> to vector<2x128xf32>
    %253 = arith.maximumf %251, %252 : vector<2x128xf32>
    %cst_174 = arith.constant dense<0xFF800000> : vector<128xf32>
    %254 = vector.multi_reduction <maximumf>, %253, %cst_174 [0] : vector<2x128xf32> to vector<128xf32>
    %255 = vector.shape_cast %254 : vector<128xf32> to vector<1x128xf32>
    %c9_175 = arith.constant 9 : index
    %c0_176 = arith.constant 0 : index
    %256 = vector.load %arg16[%c9_175, %c0_176] : memref<32x128xf32, #tpu.memory_space<vmem>>, vector<1x128xf32>
    tpu.vector_store %arg16[%c9_175, %c0_176], %255 {strides = array<i32>} : memref<32x128xf32, #tpu.memory_space<vmem>>, vector<1x128xf32>,
    %257 = vector.extract_strided_slice %236 {offsets = [14, 0], sizes = [2, 128], strides = [1, 1]} : vector<40x128xf32> to vector<2x128xf32>
    %258 = vector.extract_strided_slice %236 {offsets = [20, 0], sizes = [2, 128], strides = [1, 1]} : vector<40x128xf32> to vector<2x128xf32>
    %259 = arith.maximumf %257, %258 : vector<2x128xf32>
    %cst_177 = arith.constant dense<0xFF800000> : vector<128xf32>
    %260 = vector.multi_reduction <maximumf>, %259, %cst_177 [0] : vector<2x128xf32> to vector<128xf32>
    %261 = vector.shape_cast %260 : vector<128xf32> to vector<1x128xf32>
    %c10_178 = arith.constant 10 : index
    %c0_179 = arith.constant 0 : index
    %262 = vector.load %arg16[%c10_178, %c0_179] : memref<32x128xf32, #tpu.memory_space<vmem>>, vector<1x128xf32>
    tpu.vector_store %arg16[%c10_178, %c0_179], %261 {strides = array<i32>} : memref<32x128xf32, #tpu.memory_space<vmem>>, vector<1x128xf32>,
    %c8_180 = arith.constant 8 : index
    %c0_181 = arith.constant 0 : index
    %263 = vector.load %arg16[%c8_180, %c0_181] : memref<32x128xf32, #tpu.memory_space<vmem>>, vector<1x128xf32>
    tpu.vector_store %arg16[%c8_180, %c0_181], %261 {strides = array<i32>} : memref<32x128xf32, #tpu.memory_space<vmem>>, vector<1x128xf32>,
    %c11_182 = arith.constant 11 : index
    %c0_183 = arith.constant 0 : index
    %264 = vector.load %arg16[%c11_182, %c0_183] : memref<32x128xf32, #tpu.memory_space<vmem>>, vector<1x128xf32>
    tpu.vector_store %arg16[%c11_182, %c0_183], %255 {strides = array<i32>} : memref<32x128xf32, #tpu.memory_space<vmem>>, vector<1x128xf32>,
    %cst_184 = arith.constant 0.000000e+00 : f32
    %265 = vector.broadcast %cst_184 : f32 to vector<16x512xf32>
    %c0_185 = arith.constant 0 : index
    %c0_186 = arith.constant 0 : index
    %266 = vector.load %arg16[%c0_185, %c0_186] : memref<32x128xf32, #tpu.memory_space<vmem>>, vector<16x128xf32>
    %267 = arith.truncf %266 : vector<16x128xf32> to vector<16x128xbf16>
    %c0_187 = arith.constant 0 : index
    %c0_188 = arith.constant 0 : index
    %c0_189 = arith.constant 0 : index
    %268 = vector.load %arg6[%c0_187, %c0_188, %c0_189] : memref<9x128x512xbf16, #tpu.memory_space<vmem>>, vector<1x128x512xbf16>
    %269 = vector.shape_cast %268 : vector<1x128x512xbf16> to vector<128x512xbf16>
    %cst_190 = arith.constant dense<0.000000e+00> : vector<16x512xf32>
    %270 = tpu.matmul %267, %269, %cst_190 {dimension_numbers = #tpu.dot_dimension_numbers<[1], [0], [0], [1], [0, 0, 1, 1], [], []>} : vector<16x128xbf16>, vector<128x512xbf16>, vector<16x512xf32> -> vector<16x512xf32>
    %271 = arith.addf %265, %270 : vector<16x512xf32>
    %c1_191 = arith.constant 1 : index
    %c0_192 = arith.constant 0 : index
    %272 = vector.load %arg16[%c1_191, %c0_192] : memref<32x128xf32, #tpu.memory_space<vmem>>, vector<16x128xf32>
    %273 = arith.truncf %272 : vector<16x128xf32> to vector<16x128xbf16>
    %c1_193 = arith.constant 1 : index
    %c0_194 = arith.constant 0 : index
    %c0_195 = arith.constant 0 : index
    %274 = vector.load %arg6[%c1_193, %c0_194, %c0_195] : memref<9x128x512xbf16, #tpu.memory_space<vmem>>, vector<1x128x512xbf16>
    %275 = vector.shape_cast %274 : vector<1x128x512xbf16> to vector<128x512xbf16>
    %cst_196 = arith.constant dense<0.000000e+00> : vector<16x512xf32>
    %276 = tpu.matmul %273, %275, %cst_196 {dimension_numbers = #tpu.dot_dimension_numbers<[1], [0], [0], [1], [0, 0, 1, 1], [], []>} : vector<16x128xbf16>, vector<128x512xbf16>, vector<16x512xf32> -> vector<16x512xf32>
    %277 = arith.addf %271, %276 : vector<16x512xf32>
    %c2_197 = arith.constant 2 : index
    %c0_198 = arith.constant 0 : index
    %278 = vector.load %arg16[%c2_197, %c0_198] : memref<32x128xf32, #tpu.memory_space<vmem>>, vector<16x128xf32>
    %279 = arith.truncf %278 : vector<16x128xf32> to vector<16x128xbf16>
    %c2_199 = arith.constant 2 : index
    %c0_200 = arith.constant 0 : index
    %c0_201 = arith.constant 0 : index
    %280 = vector.load %arg6[%c2_199, %c0_200, %c0_201] : memref<9x128x512xbf16, #tpu.memory_space<vmem>>, vector<1x128x512xbf16>
    %281 = vector.shape_cast %280 : vector<1x128x512xbf16> to vector<128x512xbf16>
    %cst_202 = arith.constant dense<0.000000e+00> : vector<16x512xf32>
    %282 = tpu.matmul %279, %281, %cst_202 {dimension_numbers = #tpu.dot_dimension_numbers<[1], [0], [0], [1], [0, 0, 1, 1], [], []>} : vector<16x128xbf16>, vector<128x512xbf16>, vector<16x512xf32> -> vector<16x512xf32>
    %283 = arith.addf %277, %282 : vector<16x512xf32>
    %c4_203 = arith.constant 4 : index
    %c0_204 = arith.constant 0 : index
    %284 = vector.load %arg16[%c4_203, %c0_204] : memref<32x128xf32, #tpu.memory_space<vmem>>, vector<16x128xf32>
    %285 = arith.truncf %284 : vector<16x128xf32> to vector<16x128xbf16>
    %c3_205 = arith.constant 3 : index
    %c0_206 = arith.constant 0 : index
    %c0_207 = arith.constant 0 : index
    %286 = vector.load %arg6[%c3_205, %c0_206, %c0_207] : memref<9x128x512xbf16, #tpu.memory_space<vmem>>, vector<1x128x512xbf16>
    %287 = vector.shape_cast %286 : vector<1x128x512xbf16> to vector<128x512xbf16>
    %cst_208 = arith.constant dense<0.000000e+00> : vector<16x512xf32>
    %288 = tpu.matmul %285, %287, %cst_208 {dimension_numbers = #tpu.dot_dimension_numbers<[1], [0], [0], [1], [0, 0, 1, 1], [], []>} : vector<16x128xbf16>, vector<128x512xbf16>, vector<16x512xf32> -> vector<16x512xf32>
    %289 = arith.addf %283, %288 : vector<16x512xf32>
    %c5_209 = arith.constant 5 : index
    %c0_210 = arith.constant 0 : index
    %290 = vector.load %arg16[%c5_209, %c0_210] : memref<32x128xf32, #tpu.memory_space<vmem>>, vector<16x128xf32>
    %291 = arith.truncf %290 : vector<16x128xf32> to vector<16x128xbf16>
    %c4_211 = arith.constant 4 : index
    %c0_212 = arith.constant 0 : index
    %c0_213 = arith.constant 0 : index
    %292 = vector.load %arg6[%c4_211, %c0_212, %c0_213] : memref<9x128x512xbf16, #tpu.memory_space<vmem>>, vector<1x128x512xbf16>
    %293 = vector.shape_cast %292 : vector<1x128x512xbf16> to vector<128x512xbf16>
    %cst_214 = arith.constant dense<0.000000e+00> : vector<16x512xf32>
    %294 = tpu.matmul %291, %293, %cst_214 {dimension_numbers = #tpu.dot_dimension_numbers<[1], [0], [0], [1], [0, 0, 1, 1], [], []>} : vector<16x128xbf16>, vector<128x512xbf16>, vector<16x512xf32> -> vector<16x512xf32>
    %295 = arith.addf %289, %294 : vector<16x512xf32>
    %c6_215 = arith.constant 6 : index
    %c0_216 = arith.constant 0 : index
    %296 = vector.load %arg16[%c6_215, %c0_216] : memref<32x128xf32, #tpu.memory_space<vmem>>, vector<16x128xf32>
    %297 = arith.truncf %296 : vector<16x128xf32> to vector<16x128xbf16>
    %c5_217 = arith.constant 5 : index
    %c0_218 = arith.constant 0 : index
    %c0_219 = arith.constant 0 : index
    %298 = vector.load %arg6[%c5_217, %c0_218, %c0_219] : memref<9x128x512xbf16, #tpu.memory_space<vmem>>, vector<1x128x512xbf16>
    %299 = vector.shape_cast %298 : vector<1x128x512xbf16> to vector<128x512xbf16>
    %cst_220 = arith.constant dense<0.000000e+00> : vector<16x512xf32>
    %300 = tpu.matmul %297, %299, %cst_220 {dimension_numbers = #tpu.dot_dimension_numbers<[1], [0], [0], [1], [0, 0, 1, 1], [], []>} : vector<16x128xbf16>, vector<128x512xbf16>, vector<16x512xf32> -> vector<16x512xf32>
    %301 = arith.addf %295, %300 : vector<16x512xf32>
    %c8_221 = arith.constant 8 : index
    %c0_222 = arith.constant 0 : index
    %302 = vector.load %arg16[%c8_221, %c0_222] : memref<32x128xf32, #tpu.memory_space<vmem>>, vector<16x128xf32>
    %303 = arith.truncf %302 : vector<16x128xf32> to vector<16x128xbf16>
    %c6_223 = arith.constant 6 : index
    %c0_224 = arith.constant 0 : index
    %c0_225 = arith.constant 0 : index
    %304 = vector.load %arg6[%c6_223, %c0_224, %c0_225] : memref<9x128x512xbf16, #tpu.memory_space<vmem>>, vector<1x128x512xbf16>
    %305 = vector.shape_cast %304 : vector<1x128x512xbf16> to vector<128x512xbf16>
    %cst_226 = arith.constant dense<0.000000e+00> : vector<16x512xf32>
    %306 = tpu.matmul %303, %305, %cst_226 {dimension_numbers = #tpu.dot_dimension_numbers<[1], [0], [0], [1], [0, 0, 1, 1], [], []>} : vector<16x128xbf16>, vector<128x512xbf16>, vector<16x512xf32> -> vector<16x512xf32>
    %307 = arith.addf %301, %306 : vector<16x512xf32>
    %c9_227 = arith.constant 9 : index
    %c0_228 = arith.constant 0 : index
    %308 = vector.load %arg16[%c9_227, %c0_228] : memref<32x128xf32, #tpu.memory_space<vmem>>, vector<16x128xf32>
    %309 = arith.truncf %308 : vector<16x128xf32> to vector<16x128xbf16>
    %c7_229 = arith.constant 7 : index
    %c0_230 = arith.constant 0 : index
    %c0_231 = arith.constant 0 : index
    %310 = vector.load %arg6[%c7_229, %c0_230, %c0_231] : memref<9x128x512xbf16, #tpu.memory_space<vmem>>, vector<1x128x512xbf16>
    %311 = vector.shape_cast %310 : vector<1x128x512xbf16> to vector<128x512xbf16>
    %cst_232 = arith.constant dense<0.000000e+00> : vector<16x512xf32>
    %312 = tpu.matmul %309, %311, %cst_232 {dimension_numbers = #tpu.dot_dimension_numbers<[1], [0], [0], [1], [0, 0, 1, 1], [], []>} : vector<16x128xbf16>, vector<128x512xbf16>, vector<16x512xf32> -> vector<16x512xf32>
    %313 = arith.addf %307, %312 : vector<16x512xf32>
    %c10_233 = arith.constant 10 : index
    %c0_234 = arith.constant 0 : index
    %314 = vector.load %arg16[%c10_233, %c0_234] : memref<32x128xf32, #tpu.memory_space<vmem>>, vector<16x128xf32>
    %315 = arith.truncf %314 : vector<16x128xf32> to vector<16x128xbf16>
    %c8_235 = arith.constant 8 : index
    %c0_236 = arith.constant 0 : index
    %c0_237 = arith.constant 0 : index
    %316 = vector.load %arg6[%c8_235, %c0_236, %c0_237] : memref<9x128x512xbf16, #tpu.memory_space<vmem>>, vector<1x128x512xbf16>
    %317 = vector.shape_cast %316 : vector<1x128x512xbf16> to vector<128x512xbf16>
    %cst_238 = arith.constant dense<0.000000e+00> : vector<16x512xf32>
    %318 = tpu.matmul %315, %317, %cst_238 {dimension_numbers = #tpu.dot_dimension_numbers<[1], [0], [0], [1], [0, 0, 1, 1], [], []>} : vector<16x128xbf16>, vector<128x512xbf16>, vector<16x512xf32> -> vector<16x512xf32>
    %319 = arith.addf %313, %318 : vector<16x512xf32>
    %c0_239 = arith.constant 0 : index
    %c0_240 = arith.constant 0 : index
    %320 = vector.load %arg7[%c0_239, %c0_240] : memref<1x512xf32, #tpu.memory_space<vmem>>, vector<1x512xf32>
    %321 = vector.broadcast %320 : vector<1x512xf32> to vector<16x512xf32>
    %322 = arith.addf %319, %321 : vector<16x512xf32>
    %cst_241 = arith.constant 0.000000e+00 : f32
    %323 = vector.broadcast %cst_241 : f32 to vector<16x512xf32>
    %324 = arith.maximumf %322, %323 : vector<16x512xf32>
    %325 = vector.extract_strided_slice %324 {offsets = [0, 0], sizes = [2, 512], strides = [1, 1]} : vector<16x512xf32> to vector<2x512xf32>
    %326 = vector.extract_strided_slice %324 {offsets = [4, 0], sizes = [2, 512], strides = [1, 1]} : vector<16x512xf32> to vector<2x512xf32>
    %327 = arith.maximumf %325, %326 : vector<2x512xf32>
    %cst_242 = arith.constant dense<0xFF800000> : vector<512xf32>
    %328 = vector.multi_reduction <maximumf>, %327, %cst_242 [0] : vector<2x512xf32> to vector<512xf32>
    %329 = vector.shape_cast %328 : vector<512xf32> to vector<1x512xf32>
    %330 = arith.truncf %329 : vector<1x512xf32> to vector<1x512xbf16>
    %c0_243 = arith.constant 0 : index
    %c0_244 = arith.constant 0 : index
    %331 = vector.load %arg8[%c0_243, %c0_244] : memref<512x512xbf16, #tpu.memory_space<vmem>>, vector<512x512xbf16>
    %cst_245 = arith.constant dense<0.000000e+00> : vector<1x512xf32>
    %332 = tpu.matmul %330, %331, %cst_245 {dimension_numbers = #tpu.dot_dimension_numbers<[1], [0], [0], [1], [0, 0, 1, 1], [], []>} : vector<1x512xbf16>, vector<512x512xbf16>, vector<1x512xf32> -> vector<1x512xf32>
    %c0_246 = arith.constant 0 : index
    %c0_247 = arith.constant 0 : index
    %333 = vector.load %arg9[%c0_246, %c0_247] : memref<1x512xf32, #tpu.memory_space<vmem>>, vector<1x512xf32>
    %334 = arith.addf %332, %333 : vector<1x512xf32>
    %cst_248 = arith.constant 0.000000e+00 : f32
    %335 = vector.broadcast %cst_248 : f32 to vector<1x512xf32>
    %336 = arith.maximumf %334, %335 : vector<1x512xf32>
    %337 = arith.truncf %336 : vector<1x512xf32> to vector<1x512xbf16>
    %c0_249 = arith.constant 0 : index
    %c0_250 = arith.constant 0 : index
    %338 = vector.load %arg10[%c0_249, %c0_250] : memref<512x512xbf16, #tpu.memory_space<vmem>>, vector<512x512xbf16>
    %cst_251 = arith.constant dense<0.000000e+00> : vector<1x512xf32>
    %339 = tpu.matmul %337, %338, %cst_251 {dimension_numbers = #tpu.dot_dimension_numbers<[1], [0], [0], [1], [0, 0, 1, 1], [], []>} : vector<1x512xbf16>, vector<512x512xbf16>, vector<1x512xf32> -> vector<1x512xf32>
    %c0_252 = arith.constant 0 : index
    %c0_253 = arith.constant 0 : index
    %340 = vector.load %arg11[%c0_252, %c0_253] : memref<1x512xf32, #tpu.memory_space<vmem>>, vector<1x512xf32>
    %341 = arith.addf %339, %340 : vector<1x512xf32>
    %cst_254 = arith.constant 0.000000e+00 : f32
    %342 = vector.broadcast %cst_254 : f32 to vector<1x512xf32>
    %343 = arith.maximumf %341, %342 : vector<1x512xf32>
    %344 = arith.truncf %343 : vector<1x512xf32> to vector<1x512xbf16>
    %c0_255 = arith.constant 0 : index
    %c0_256 = arith.constant 0 : index
    %345 = vector.load %arg12[%c0_255, %c0_256] : memref<512x128xbf16, #tpu.memory_space<vmem>>, vector<512x128xbf16>
    %cst_257 = arith.constant dense<0.000000e+00> : vector<1x128xf32>
    %346 = tpu.matmul %344, %345, %cst_257 {dimension_numbers = #tpu.dot_dimension_numbers<[1], [0], [0], [1], [0, 0, 1, 1], [], []>} : vector<1x512xbf16>, vector<512x128xbf16>, vector<1x128xf32> -> vector<1x128xf32>
    %c0_258 = arith.constant 0 : index
    %c0_259 = arith.constant 0 : index
    %347 = vector.load %arg13[%c0_258, %c0_259] : memref<1x128xf32, #tpu.memory_space<vmem>>, vector<1x128xf32>
    %348 = arith.addf %346, %347 : vector<1x128xf32>
    %c0_260 = arith.constant 0 : index
    %c0_261 = arith.constant 0 : index
    %c0_262 = arith.constant 0 : index
    %349 = vector.load %arg14[%c0_260, %c0_261, %c0_262] : memref<1x1x128xf32, #tpu.memory_space<vmem>>, vector<1x1x128xf32>
    %350 = vector.shape_cast %349 : vector<1x1x128xf32> to vector<1x128xf32>
    %351 = vector.shape_cast %348 : vector<1x128xf32> to vector<1x1x128xf32>
    tpu.vector_store %arg14[%c0_260, %c0_261, %c0_262], %351 {strides = array<i32>} : memref<1x1x128xf32, #tpu.memory_space<vmem>>, vector<1x1x128xf32>,
    return
  }
  func.func @transform_0(%arg0: i32) -> (i32, i32, i32) {
    %c0_i32 = arith.constant 0 : i32
    %c0_i32_0 = arith.constant 0 : i32
    %c0_i32_1 = arith.constant 0 : i32
    return %arg0, %c0_i32, %c0_i32_0 : i32, i32, i32
  }
  func.func @transform_1(%arg0: i32) -> (i32, i32, i32) {
    %c0_i32 = arith.constant 0 : i32
    %c0_i32_0 = arith.constant 0 : i32
    %c0_i32_1 = arith.constant 0 : i32
    %c0_i32_2 = arith.constant 0 : i32
    return %c0_i32, %c0_i32_0, %c0_i32_1 : i32, i32, i32
  }
  func.func @transform_2(%arg0: i32) -> (i32, i32) {
    %c0_i32 = arith.constant 0 : i32
    %c0_i32_0 = arith.constant 0 : i32
    %c0_i32_1 = arith.constant 0 : i32
    return %c0_i32, %c0_i32_0 : i32, i32
  }
  func.func @transform_3(%arg0: i32) -> (i32, i32, i32) {
    %c0_i32 = arith.constant 0 : i32
    %c0_i32_0 = arith.constant 0 : i32
    %c0_i32_1 = arith.constant 0 : i32
    %c0_i32_2 = arith.constant 0 : i32
    return %c0_i32, %c0_i32_0, %c0_i32_1 : i32, i32, i32
  }
  func.func @transform_4(%arg0: i32) -> (i32, i32) {
    %c0_i32 = arith.constant 0 : i32
    %c0_i32_0 = arith.constant 0 : i32
    %c0_i32_1 = arith.constant 0 : i32
    return %c0_i32, %c0_i32_0 : i32, i32
  }
  func.func @transform_5(%arg0: i32) -> (i32, i32, i32) {
    %c0_i32 = arith.constant 0 : i32
    %c0_i32_0 = arith.constant 0 : i32
    %c0_i32_1 = arith.constant 0 : i32
    %c0_i32_2 = arith.constant 0 : i32
    return %c0_i32, %c0_i32_0, %c0_i32_1 : i32, i32, i32
  }
  func.func @transform_6(%arg0: i32) -> (i32, i32) {
    %c0_i32 = arith.constant 0 : i32
    %c0_i32_0 = arith.constant 0 : i32
    %c0_i32_1 = arith.constant 0 : i32
    return %c0_i32, %c0_i32_0 : i32, i32
  }
  func.func @transform_7(%arg0: i32) -> (i32, i32) {
    %c0_i32 = arith.constant 0 : i32
    %c0_i32_0 = arith.constant 0 : i32
    %c0_i32_1 = arith.constant 0 : i32
    return %c0_i32, %c0_i32_0 : i32, i32
  }
  func.func @transform_8(%arg0: i32) -> (i32, i32) {
    %c0_i32 = arith.constant 0 : i32
    %c0_i32_0 = arith.constant 0 : i32
    %c0_i32_1 = arith.constant 0 : i32
    return %c0_i32, %c0_i32_0 : i32, i32
  }
  func.func @transform_9(%arg0: i32) -> (i32, i32) {
    %c0_i32 = arith.constant 0 : i32
    %c0_i32_0 = arith.constant 0 : i32
    %c0_i32_1 = arith.constant 0 : i32
    return %c0_i32, %c0_i32_0 : i32, i32
  }
  func.func @transform_10(%arg0: i32) -> (i32, i32) {
    %c0_i32 = arith.constant 0 : i32
    %c0_i32_0 = arith.constant 0 : i32
    %c0_i32_1 = arith.constant 0 : i32
    return %c0_i32, %c0_i32_0 : i32, i32
  }
  func.func @transform_11(%arg0: i32) -> (i32, i32) {
    %c0_i32 = arith.constant 0 : i32
    %c0_i32_0 = arith.constant 0 : i32
    %c0_i32_1 = arith.constant 0 : i32
    return %c0_i32, %c0_i32_0 : i32, i32
  }
  func.func @transform_12(%arg0: i32) -> (i32, i32) {
    %c0_i32 = arith.constant 0 : i32
    %c0_i32_0 = arith.constant 0 : i32
    %c0_i32_1 = arith.constant 0 : i32
    return %c0_i32, %c0_i32_0 : i32, i32
  }
  func.func @transform_13(%arg0: i32) -> (i32, i32, i32) {
    %c0_i32 = arith.constant 0 : i32
    %c0_i32_0 = arith.constant 0 : i32
    %c0_i32_1 = arith.constant 0 : i32
    return %arg0, %c0_i32, %c0_i32_0 : i32, i32, i32
  }
}

</mosaic_0001>

<bundles_post_ra>
// kernel: cyvgg_forward.1
= control target key start
LH: loop header
LB: loop body
LE: loop exit
PB: predicated region body
PF: predicated region fallthrough
CT: control target
= control target key end

     0   :  { %s12173_s0 = inlined_call_operand.vmem [shape: f32[2,128,4], index: 0, kind: input, shape index: {}]   ;;  %s12174_s1 = inlined_call_operand.hbm [shape: bf16[9,4,32], index: 1, kind: input, shape index: {}]   ;;  %s12175_s2 = inlined_call_operand.hbm [shape: f32[1,32], index: 2, kind: input, shape index: {}]   ;;  %s12176_s3 = inlined_call_operand.hbm [shape: bf16[9,32,128], index: 3, kind: input, shape index: {}]   ;;  %s12177_s4 = inlined_call_operand.hbm [shape: f32[1,128], index: 4, kind: input, shape index: {}]   ;;  %s12178_s5 = inlined_call_operand.hbm [shape: bf16[9,128,512], index: 5, kind: input, shape index: {}]   ;;  %s12179_s6 = inlined_call_operand.hbm [shape: f32[1,512], index: 6, kind: input, shape index: {}]   ;;  %s12180_s7 = inlined_call_operand.vmem [shape: bf16[512,512], index: 7, kind: input, shape index: {}]   ;;  %s12181_s8 = inlined_call_operand.hbm [shape: f32[1,512], index: 8, kind: input, shape index: {}]   ;;  %s12182_s9 = inlined_call_operand.hbm [shape: bf16[512,512], index: 9, kind: input, shape index: {}]   ;;  %s12183_s10 = inlined_call_operand.hbm [shape: f32[1,512], index: 10, kind: input, shape index: {}]   ;;  %s12184_s11 = inlined_call_operand.hbm [shape: bf16[512,128], index: 11, kind: input, shape index: {}]   ;;  %s12185_s12 = inlined_call_operand.hbm [shape: f32[1,128], index: 12, kind: input, shape index: {}]   ;;  %s12186_s13 = inlined_call_operand.hbm [shape: f32[2,1,128], index: 13, kind: output, shape index: {}]  }
   0x1   :  { %12198 = sst [smem:[#allocation34_spill]] %s12175_s2 }
   0x2   :  { %12199 = sst [smem:[#allocation35_spill]] %s12177_s4 }
   0x3   :  { %18 = vsyncpa [#allocation5], 0 }
   0x4   :  { %19 = vsyncpa [#allocation8], 0 }
   0x5   :  { %20 = vsyncpa [#allocation11], 0 }
   0x6   :  { %21 = vsyncpa [#allocation14], 0 }
   0x7   :  { %22 = vsyncpa [#allocation17], 0 }
   0x8   :  { %23 = vsyncpa [#allocation20], 0 }
   0x9   :  { %24 = vsyncpa [#allocation6], 0 }
   0xa   :  { %26 = vsyncpa [#allocation6 + $0x1], 0  ;;  %s10758_s25 = smov 0   ;;  %s10760_s26 = smov 0  }
   0xb   :  { %s10762_s27 = smov 0   ;;  %s10764_s28 = smov 0  }
   0xc LB: > { %12200 = sst [smem:[#allocation30_spill]] %s10661_s27  ;;  %s10779_s29 = sadd.s32 4294967295, %s10665_s28   ;;  %s10665_s28 = sphi %s10764_s28, %s12231_s28   ;;  %s10661_s27 = sphi %s10762_s27, %s12233_s27   ;;  %s10657_s26 = sphi %s10760_s26, %s12235_s26   ;;  %s10653_s25 = sphi %s10758_s25, %s12234_s25  }
   0xd   : > { %s7971_s30 = sadd.s32 4294967294, %s10665_s28   ;;  %s10783_s14 = sadd.s32 1, %s10665_s28  }
   0xe   : > { %12201 = sst [smem:[#allocation31_spill]] %s10783_s14  ;;  %s317_s15 = sadd.s32 1, %s10661_s27 }
   0xf   : > { %s314_s16 = ssub.s32 %s10665_s28, %s10783_s14  ;;  %p327_p0 = scmp.ne.s32.totalorder %s10661_s27, %s10657_s26 }
  0x10   : > { %p315_p1 = scmp.eq.s32.totalorder %s314_s16, 0  ;;  %p328_p2 = scmp.eq.s32.totalorder %s10779_s29, 1 }
  0x11   : > { %p333_p3 = scmp.ne.s32.totalorder %s10657_s26, %s10653_s25  ;;  %p334_p4 = scmp.eq.s32.totalorder %s7971_s30, 1 }
  0x12   : > { %s10794_s17 = scalar_select %p315_p1, %s10661_s27, %s317_s15  }
  0x13   : > { %p10796_p5 = por %p328_p2, %p327_p0  ;;  %p10800_p6 = por %p334_p4, %p333_p3 }
  0x14   : > { %12202 = sst [smem:[#allocation32_spill]] %s10794_s17  ;;  %p7972_p7 = scmp.ge.s32.totalorder %s10665_s28, 1 }
  0x15   : > { %s12203_s18 = scalar_select %p10796_p5, 1, 0 }
  0x16   : > { %s12204_s19 = scalar_select %p10800_p6, 1, 0 }
  0x17   : > { %p341_p8 = scmp.lt.s32.totalorder %s10665_s28, 3  ;;  %p12190_p9 = scmp.eq.s32.totalorder %s10779_s29, 0 }
  0x18   : > { %12205 = sst [smem:[#allocation33_spill]] %s12204_s19  ;;  %s10667_s21 = smov [#allocation7]  }
  0x19   : > { %p10807_p10 = pnand %p7972_p7, %p341_p8  ;;  %s367_s22 = sshll.u32 %s10667_s21, 4  ;;  %s368_s22 = int_to_ptr.vmem [resolvable:$true] %s367_s22 }
  0x1a   : > { %s10668_s23 = smov [#allocation10]   ;;  %s10669_s15 = smov [#allocation13]  }
  0x1b   : > { %s12206_s20 = scalar_select %p10807_p10, 1, 0 }
  0x1c   : > { %p9312_p11 = pneg %p10807_p10  ;;  %s391_s24 = sshll.u32 %s10668_s23, 4  ;;  %s392_s24 = int_to_ptr.vmem [resolvable:$true] %s391_s24 }
  0x1d   : > { %s415_s16 = sshll.u32 %s10669_s15, 4  ;;  %s10306_s21 = scalar_lea.vmem %s368_s22, 16  ;;  %s10819_s16 = int_to_ptr.vmem [resolvable:$true] %s415_s16 }
  0x1e   : > { %p10815_p12 = pnand %p12190_p9, %p9312_p11  ;;  %p10307_p0 = scmp.ne.s32.totalorder %s368_s22, %s10306_s21 }
  0x1f   : > { %s10313_s23 = scalar_lea.vmem %s368_s22, 32  ;;  %p10314_p3 = scmp.lt.s32.totalorder %s368_s22, %s368_s22 }
  0x20   : > { %p10823_p13 = pneg %p10815_p12  ;;  %p10315_p4 = scmp.lt.s32.totalorder %s10313_s23, %s10306_s21 }
  0x22   : > { %p10309_p1 = pnand %p10307_p0, %p10823_p13  ;;  %p10316_p7 = por %p10315_p4, %p10314_p3 }
  0x24   : > { %p10310_p2 = pneg %p10309_p1 }
  0x26   : > { %p10317_p8 = pnand %p10316_p7, %p10310_p2 }
  0x28   : > { %10320 = shalt.err (!%p10317_p8)
}
  0x29   : > { %s12209_s2 = sld [smem:[#allocation34_spill]]  ;;  %s10332_s14 = scalar_lea.vmem %s392_s24, 16 }
  0x2a   : > { %p10333_p11 = scmp.ne.s32.totalorder %s392_s24, %s10332_s14  ;;  %s10339_s19 = scalar_lea.vmem %s392_s24, 32 }
  0x2b   : > { %p10340_p0 = scmp.lt.s32.totalorder %s392_s24, %s392_s24  ;;  %p10341_p1 = scmp.lt.s32.totalorder %s10339_s19, %s10332_s14 }
  0x2c   : > { %p10335_p9 = pnand %p10333_p11, %p10823_p13 }
  0x2d   : > { %p10342_p5 = por %p10341_p1, %p10340_p0 }
  0x2e   : > { %p10336_p6 = pneg %p10335_p9 }
  0x2f   : > { %9318 = dma.hbm_to_vmem [thread:$0]  (!%p10815_p12), %s12209_s2, 16, %s368_s22, [#allocation8]  }
  0x30   : > { %p10343_p10 = pnand %p10342_p5, %p10336_p6 }
  0x32   : > { %10346 = shalt.err (!%p10343_p10)
}
  0x33   : > { %s12210_s4 = sld [smem:[#allocation35_spill]]  ;;  %s10358_s27 = scalar_lea.vmem %s10819_s16, 64 }
  0x34   : > { %p10359_p2 = scmp.ne.s32.totalorder %s10819_s16, %s10358_s27  ;;  %p10366_p4 = scmp.lt.s32.totalorder %s10819_s16, %s10819_s16 }
  0x35   : > { %p10367_p7 = scmp.lt.s32.totalorder %s10358_s27, %s10358_s27 }
  0x36   : > { %p10361_p9 = pnand %p10359_p2, %p10823_p13 }
  0x37   : > { %p10368_p5 = por %p10367_p7, %p10366_p4 }
  0x38   : > { %p10362_p3 = pneg %p10361_p9 }
  0x39   : > { %9324 = dma.hbm_to_vmem [thread:$0]  (!%p10815_p12), %s12210_s4, 16, %s392_s24, [#allocation11]  }
  0x3a   : > { %p10369_p6 = pnand %p10368_p5, %p10362_p3 }
  0x3c   : > { %10372 = shalt.err (!%p10369_p6)
}
  0x3d   : > { %9330 = dma.hbm_to_vmem [thread:$0]  (!%p10815_p12), %s12179_s6, 64, %s10819_s16, [#allocation14]  }
  0x3e   : > { %s10670_s22 = smov [#allocation16]  }
  0x3f   : > { %s439_s24 = sshll.u32 %s10670_s22, 4  ;;  %s440_s24 = int_to_ptr.vmem [resolvable:$true] %s439_s24 }
  0x40   : > { %s10384_s15 = scalar_lea.vmem %s440_s24, 16384  ;;  %p10392_p0 = scmp.lt.s32.totalorder %s440_s24, %s440_s24 }
  0x41   : > { %p10385_p10 = scmp.ne.s32.totalorder %s440_s24, %s10384_s15  ;;  %p10393_p1 = scmp.lt.s32.totalorder %s10384_s15, %s10384_s15 }
  0x43   : > { %p10387_p8 = pnand %p10385_p10, %p10823_p13  ;;  %p10394_p2 = por %p10393_p1, %p10392_p0 }
  0x45   : > { %p10388_p11 = pneg %p10387_p8 }
  0x47   : > { %p10395_p9 = pnand %p10394_p2, %p10388_p11 }
  0x49   : > { %10398 = shalt.err (!%p10395_p9)
}
  0x4a   : > { %s12194_s21 = smov 256   ;;  %s12195_s23 = smov 16  }
  0x4b   : > { %9336 = dma.hbm_to_vmem [thread:$0]  (!%p10815_p12), %s12182_s9, 16384, %s440_s24, [#allocation17], %s12194_s21, %s12194_s21, %s12195_s23  }
  0x4c   : > { %s10673_s14 = smov [#allocation19]   ;;  %s10674_s22 = smov [#allocation4]  }
  0x4d   : > { %s463_s19 = sshll.u32 %s10673_s14, 4  ;;  %s353_s2 = sshll.u32 %s10674_s22, 4  ;;  %s464_s19 = int_to_ptr.vmem [resolvable:$true] %s463_s19  ;;  %s354_s2 = int_to_ptr.vmem [resolvable:$true] %s353_s2 }
  0x4e   : > { %s10410_s15 = scalar_lea.vmem %s464_s19, 4096  ;;  %p10418_p5 = scmp.lt.s32.totalorder %s464_s19, %s464_s19 }
  0x4f   : > { %p10411_p3 = scmp.ne.s32.totalorder %s464_s19, %s10410_s15  ;;  %p10419_p6 = scmp.lt.s32.totalorder %s10410_s15, %s10410_s15 }
  0x51   : > { %p10413_p4 = pnand %p10411_p3, %p10823_p13  ;;  %p10420_p10 = por %p10419_p6, %p10418_p5 }
  0x53   : > { %p10414_p7 = pneg %p10413_p4 }
  0x55   : > { %p10421_p8 = pnand %p10420_p10, %p10414_p7 }
  0x57   : > { %10424 = shalt.err (!%p10421_p8)
}
  0x58   : > { %s12196_s4 = smov 64   ;;  %s12197_s24 = smov 4  }
  0x59   : > { %9342 = dma.hbm_to_vmem [thread:$0]  (!%p10815_p12), %s12184_s11, 4096, %s464_s19, [#allocation20], %s12196_s4, %s12196_s4, %s12197_s24  }
  0x5a   : > { %s10436_s14 = scalar_lea.vmem %s354_s2, 288  ;;  %p10444_p2 = scmp.lt.s32.totalorder %s354_s2, %s354_s2 }
  0x5b   : > { %p10437_p11 = scmp.ne.s32.totalorder %s354_s2, %s10436_s14  ;;  %p10445_p9 = scmp.lt.s32.totalorder %s10436_s14, %s10436_s14 }
  0x5d   : > { %p10439_p0 = pnand %p10437_p11, %p10823_p13  ;;  %p10446_p3 = por %p10445_p9, %p10444_p2 }
  0x5f   : > { %p10440_p1 = pneg %p10439_p0 }
  0x61   : > { %p10447_p4 = pnand %p10446_p3, %p10440_p1 }
  0x63   : > { %10450 = shalt.err (!%p10447_p4)
}
  0x64   : > { %s10677_s22 = smov 32   ;;  %s10678_s15 = smov 2  }
  0x65   : > { %9315 = dma.hbm_to_vmem [thread:$0]  (!%p10815_p12), %s12174_s1, 288, %s354_s2, [#allocation5], %s10677_s22, %s10677_s22, %s10678_s15  }
  0x66   : > { %s10679_s19 = smov [#allocation9]   ;;  %s10680_s27 = smov [#allocation12]  }
  0x67   : > { %s377_s16 = sshll.u32 %s10679_s19, 4  ;;  %s401_s4 = sshll.u32 %s10680_s27, 4  ;;  %s378_s16 = int_to_ptr.vmem [resolvable:$true] %s377_s16  ;;  %s402_s4 = int_to_ptr.vmem [resolvable:$true] %s401_s4 }
  0x68   : > { %s10462_s24 = scalar_lea.vmem %s378_s16, 2304  ;;  %p10470_p10 = scmp.lt.s32.totalorder %s378_s16, %s378_s16 }
  0x69   : > { %p10463_p7 = scmp.ne.s32.totalorder %s378_s16, %s10462_s24  ;;  %p10471_p8 = scmp.lt.s32.totalorder %s10462_s24, %s10462_s24 }
  0x6b   : > { %p10465_p5 = pnand %p10463_p7, %p10823_p13  ;;  %p10472_p11 = por %p10471_p8, %p10470_p10 }
  0x6d   : > { %p10466_p6 = pneg %p10465_p5 }
  0x6f   : > { %p10473_p0 = pnand %p10472_p11, %p10466_p6 }
  0x71   : > { %10476 = shalt.err (!%p10473_p0)
}
  0x72   : > { %s12211_s21 = smov 4   ;;  %s12212_s2 = smov 64  }
  0x73   : > { %9321 = dma.hbm_to_vmem [thread:$0]  (!%p10815_p12), %s12176_s3, 2304, %s378_s16, [#allocation8], %s12212_s2, %s12212_s2, %s12211_s21  }
  0x74   : > { %s10488_s22 = scalar_lea.vmem %s402_s4, 36864  ;;  %p10496_p3 = scmp.lt.s32.totalorder %s402_s4, %s402_s4 }
  0x75   : > { %p10489_p1 = scmp.ne.s32.totalorder %s402_s4, %s10488_s22  ;;  %p10497_p4 = scmp.lt.s32.totalorder %s10488_s22, %s10488_s22 }
  0x77   : > { %p10491_p2 = pnand %p10489_p1, %p10823_p13  ;;  %p10498_p7 = por %p10497_p4, %p10496_p3 }
  0x79   : > { %p10492_p9 = pneg %p10491_p2 }
  0x7b   : > { %p10499_p5 = pnand %p10498_p7, %p10492_p9 }
  0x7d   : > { %10502 = shalt.err (!%p10499_p5)
}
  0x7e   : > { %s12213_s24 = smov 16   ;;  %s12214_s15 = smov 256  }
  0x7f   : > { %9327 = dma.hbm_to_vmem [thread:$0]  (!%p10815_p12), %s12178_s5, 36864, %s402_s4, [#allocation11], %s12214_s15, %s12214_s15, %s12213_s24  }
  0x80   : > { %s10681_s16 = smov [#allocation15]   ;;  %s10682_s2 = smov [#allocation18]  }
  0x81   : > { %s429_s21 = sshll.u32 %s10681_s16, 4  ;;  %s453_s23 = sshll.u32 %s10682_s2, 4  ;;  %s430_s21 = int_to_ptr.vmem [resolvable:$true] %s429_s21  ;;  %s454_s23 = int_to_ptr.vmem [resolvable:$true] %s453_s23 }
  0x82   : > { %s10514_s14 = scalar_lea.vmem %s430_s21, 64  ;;  %p10522_p11 = scmp.lt.s32.totalorder %s430_s21, %s430_s21 }
  0x83   : > { %p10515_p6 = scmp.ne.s32.totalorder %s430_s21, %s10514_s14  ;;  %p10523_p0 = scmp.lt.s32.totalorder %s10514_s14, %s10514_s14 }
  0x85   : > { %p10517_p10 = pnand %p10515_p6, %p10823_p13  ;;  %p10524_p1 = por %p10523_p0, %p10522_p11 }
  0x87   : > { %p10518_p8 = pneg %p10517_p10 }
  0x89   : > { %p10525_p2 = pnand %p10524_p1, %p10518_p8 }
  0x8b   : > { %10528 = shalt.err (!%p10525_p2)
}
  0x8c   : > { %9333 = dma.hbm_to_vmem [thread:$0]  (!%p10815_p12), %s12181_s8, 64, %s430_s21, [#allocation14]  }
  0x8d   : > { %s10540_s24 = scalar_lea.vmem %s454_s23, 64  ;;  %p10548_p7 = scmp.lt.s32.totalorder %s454_s23, %s454_s23 }
  0x8e   : > { %p10541_p9 = scmp.ne.s32.totalorder %s454_s23, %s10540_s24  ;;  %p10549_p5 = scmp.lt.s32.totalorder %s10540_s24, %s10540_s24 }
  0x90   : > { %p10543_p3 = pnand %p10541_p9, %p10823_p13  ;;  %p10550_p6 = por %p10549_p5, %p10548_p7 }
  0x92   : > { %p10544_p4 = pneg %p10543_p3 }
  0x94   : > { %p10551_p10 = pnand %p10550_p6, %p10544_p4 }
  0x96   : > { %10554 = shalt.err (!%p10551_p10)
}
  0x97   : > { %9339 = dma.hbm_to_vmem [thread:$0]  (!%p10815_p12), %s12183_s10, 64, %s454_s23, [#allocation17]  }
  0x98   : > { %s10683_s27 = smov [#allocation21]  }
  0x99   : > { %s477_s16 = sshll.u32 %s10683_s27, 4  ;;  %s478_s16 = int_to_ptr.vmem [resolvable:$true] %s477_s16 }
  0x9a   : > { %s10566_s21 = scalar_lea.vmem %s478_s16, 16  ;;  %s10573_s2 = scalar_lea.vmem %s478_s16, 32 }
  0x9b   : > { %p10567_p8 = scmp.ne.s32.totalorder %s478_s16, %s10566_s21  ;;  %p10574_p1 = scmp.lt.s32.totalorder %s478_s16, %s478_s16 }
  0x9c   : > { %p10575_p2 = scmp.lt.s32.totalorder %s10573_s2, %s10566_s21 }
  0x9d   : > { %p10569_p11 = pnand %p10567_p8, %p10823_p13 }
  0x9e   : > { %p10576_p9 = por %p10575_p2, %p10574_p1 }
  0x9f   : > { %p10570_p0 = pneg %p10569_p11 }
  0xa1   : > { %p10577_p3 = pnand %p10576_p9, %p10570_p0 }
  0xa3   : > { %10580 = shalt.err (!%p10577_p3)
}
  0xa4   : > { %9345 = dma.hbm_to_vmem [thread:$0]  (!%p10815_p12), %s12185_s12, 16, %s478_s16, [#allocation20]  }
  0xa5   : > { %p12215_p4 = scmp.ne.s32.totalorder %s12206_s20, 0 }
  0xa6   : > { %p12216_p7 = scmp.eq.s32.totalorder (!%p12215_p4), %s10779_s29, 0 }
  0xa7   : > { %498 = sbr.rel (%p12215_p4) target bundleno = 2265 (0x8d9), region = 72 }
  0xac   : > { %10624 = dma.done.wait (%p12216_p7), [#allocation5], 288   ;;  %p12217_p13 = pmov %p12216_p7 }
  0xad   : > { %p12218_p5 = pmov %p12216_p7 }
  0xae   : > { %10626 = vsyncadd (%p12217_p13), [#allocation5], 4294967008 }
  0xaf   : > { %10628 = dma.done.wait (%p12218_p5), [#allocation8], 2320   ;;  %p12219_p6 = pmov %p12218_p5 }
  0xb0   : > { %p12220_p10 = pmov %p12218_p5 }
  0xb1   : > { %10630 = vsyncadd (%p12219_p6), [#allocation8], 4294964976 }
  0xb2   : > { %10632 = dma.done.wait (%p12220_p10), [#allocation11], 36880   ;;  %p12221_p12 = pmov %p12218_p5 }
  0xb3   : > { %p12222_p8 = pmov %p12218_p5 }
  0xb4   : > { %10634 = vsyncadd (%p12221_p12), [#allocation11], 4294930416 }
  0xb5   : > { %10636 = dma.done.wait (%p12222_p8), [#allocation14], 128   ;;  %p12223_p11 = pmov %p12218_p5 }
  0xb6   : > { %p12224_p0 = pmov %p12218_p5 }
  0xb7   : > { %10638 = vsyncadd (%p12223_p11), [#allocation14], 4294967168 }
  0xb8   : > { %10640 = dma.done.wait (%p12224_p0), [#allocation17], 16448   ;;  %p12225_p1 = pmov %p12224_p0 }
  0xb9   : > { %p12226_p2 = pmov %p12224_p0 }
  0xba   : > { %10642 = vsyncadd (%p12225_p1), [#allocation17], 4294950848 }
  0xbb   : > { %10644 = dma.done.wait (%p12226_p2), [#allocation20], 4112   ;;  %p12227_p9 = pmov %p12224_p0 }
  0xbc   : > { %p581_p3 = scmp.lt.s32.totalorder %s10779_s29, 1  ;;  %v10684_v0 = vmov 0.0   ;;  %vm10685_vm0 = vmmov 0   ;;  %vm664_vm1 = vcmask 1041408   ;;  %v641_v1 = vld [vmem:[#allocation4 + $0x2] sm:$0x3] }
  0xbd   : > { %10646 = vsyncadd (%p12227_p9), [#allocation20], 4294963184  ;;  %8850 = vmatprep.subr.bf16.mxu0 %v10684_v0  ;;  %595 = vst [vmem:[#allocation3] sm:$0xff] %v10684_v0  ;;  %8852 = vmatprep.mubr.msk.bf16.mxu0 %vm10685_vm0, %v10684_v0  ;;  %v666_v4 = vsel %vm664_vm1, %v641_v1, 0  ;;  %v619_v6 = vld [vmem:[#allocation4] sm:$0x3] }
  0xbe   : > { %596 = vst [vmem:[#allocation3 + $0x8] sm:$0xff] %v10684_v0  ;;  %597 = vst [vmem:[#allocation3 + $0x10] sm:$0xff] %v10684_v0  ;;  %s582_s17 = scalar_select %p581_p3, %s10779_s29, 1  ;;  %9264 = vmatprep.subr.bf16.mxu1 %v10684_v0  ;;  %8886 = vmatprep.mubr.msk.bf16.mxu1 %vm10685_vm0, %v10684_v0  ;;  %vm642_vm2 = vcmask 31744   ;;  %v775_v7 = vsel %vm664_vm1, %v619_v6, 0  ;;  %vm587_vm3 = vcmask 261120  }
  0xbf   : > { %598 = vst [vmem:[#allocation3 + $0x18] sm:$0xff] %v10684_v0  ;;  %8851 = vmatpush3.bf16.msra.mxu0 %v666_v4  ;;  %9265 = vmatpush3.bf16.msra.mxu1 %v775_v7  ;;  %v1024_v16 = vld [vmem:[#allocation4 + $0x6] sm:$0x3]  ;;  %v1306_v45 = vld [vmem:[#allocation4 + $0xa] sm:$0x3]  ;;  %vm1880_vm4 = vcmask 254976  }
  0xc0   : > { %s8688_s20 = sshll.u32 %s582_s17, 7  ;;  %8880 = vmatprep.subr.bf16.mxu0 %v10684_v0  ;;  %8940 = vmatprep.subr.bf16.mxu1 %v10684_v0  ;;  %v1047_v17 = vsel %vm664_vm1, %v1024_v16, 0  ;;  %v1329_v50 = vsel %vm664_vm1, %v1306_v45, 0  ;;  %v883_v51 = vld [vmem:[#allocation4 + $0x4] sm:$0x3]  ;;  %vm1890_vm5 = vcmask 257026  }
  0xc1   : > { %s10962_s4 = scalar_lea.vmem %s12173_s0, %s8688_s20  ;;  %v906_v55 = vsel %vm664_vm1, %v883_v51, 0  ;;  %v1165_v58 = vld [vmem:[#allocation4 + $0x8] sm:$0x3]  ;;  %vm1899_vm6 = vcmask 259076   ;;  %vm1912_vm7 = vcmask 261126   ;;  %vm1888_vm8 = vcmask 253952  }
  0xc2   : > { %v620_v2 = vld [vmem:[%s10962_s4 + $0x1] sm:$0xff]  ;;  %v621_v3 = vld [vmem:[%s10962_s4 + $0x9] sm:$0xff]  ;;  %v602_v9 = vld [vmem:[%s10962_s4 + $0x18] sm:$0xff]  ;;  %v1188_v62 = vsel %vm664_vm1, %v1165_v58, 0  ;;  %vm2892_vm9 = vcmask 1043458   ;;  %vm2907_vm10 = vcmask 1045508  }
  0xc3   : > { %v633_v5 = vpack.c.bf16 %v621_v3, %v620_v2  ;;  %v601_v8 = vld [vmem:[%s10962_s4 + $0x10] sm:$0xff]  ;;  %v623_v12 = vld [vmem:[%s10962_s4 + $0x19] sm:$0xff]  ;;  %v604_v14 = vld [vmem:[%s10962_s4 + $0x28] sm:$0xff]  ;;  %vm2916_vm11 = vcmask 1047558   ;;  %s579_s16 = sand.u32 1, %s10657_s26   ;;  %s8685_s21 = sshll.u32 %s10779_s29, 4 }
  0xc4   : > { %v613_v10 = vpack.c.bf16 %v602_v9, %v601_v8  ;;  %v622_v11 = vld [vmem:[%s10962_s4 + $0x11] sm:$0xff]  ;;  %v603_v13 = vld [vmem:[%s10962_s4 + $0x20] sm:$0xff]  ;;  %v625_v20 = vld [vmem:[%s10962_s4 + $0x29] sm:$0xff]  ;;  %s580_s2 = scalar_lea.vmem [#allocation22], %s579_s16  ;;  %s12138_s20 = scalar_lea.hbm %s12186_s13, %s8685_s21 }
  0xc5   : > { %8853 = vmatmul.mubr.msk.bf16.vlgmr.msra.gmra.mxu0 %vm642_vm2, %v633_v5  ;;  %v634_v15 = vpack.c.bf16 %v623_v12, %v622_v11  ;;  %v614_v18 = vpack.c.bf16 %v604_v14, %v603_v13  ;;  %v624_v19 = vld [vmem:[%s10962_s4 + $0x21] sm:$0xff]  ;;  %v605_v21 = vld [vmem:[%s10962_s4 + $0x30] sm:$0xff]  ;;  %v606_v22 = vld [vmem:[%s10962_s4 + $0x38] sm:$0xff]  ;;  %s7809_s14 = sshll.u32 %s580_s2, 4  ;;  %s7797_s30 = scalar_lea.sflag [#allocation6], %s579_s16  ;;  %s7810_s14 = int_to_ptr.vmem [resolvable:$true] %s7809_s14 }
  0xc6   : > { %8881 = vmatpush3.bf16.msra.mxu0 %v775_v7  ;;  %8856 = vmatprep.mubr.msk.bf16.mxu0 %vm10685_vm0, %v10684_v0  ;;  %v635_v23 = vpack.c.bf16 %v625_v20, %v624_v19  ;;  %v615_v24 = vpack.c.bf16 %v606_v22, %v605_v21  ;;  %v626_v25 = vld [vmem:[%s10962_s4 + $0x31] sm:$0xff]  ;;  %v627_v26 = vld [vmem:[%s10962_s4 + $0x39] sm:$0xff]  ;;  %v608_v28 = vld [vmem:[%s10962_s4 + $0x48] sm:$0xff]  ;;  %s10581_s23 = scalar_lea.vmem %s7810_s14, 16  ;;  %p12228_p7 = scmp.ne.s32.totalorder %s12203_s18, 0 }
  0xc7   : > { %8887 = vmatmul.mubr.msk.bf16.vlgmr.msra.gmra.mxu1 %vm642_vm2, %v613_v10  ;;  %8910 = vmatprep.subr.bf16.mxu0 %v10684_v0  ;;  %v607_v27 = vld [vmem:[%s10962_s4 + $0x40] sm:$0xff]  ;;  %v636_v29 = vpack.c.bf16 %v627_v26, %v626_v25  ;;  %v629_v32 = vld [vmem:[%s10962_s4 + $0x49] sm:$0xff]  ;;  %v610_v34 = vld [vmem:[%s10962_s4 + $0x58] sm:$0xff]  ;;  %p10582_p4 = scmp.ne.s32.totalorder %s7810_s14, %s10581_s23  ;;  %s10687_s29 = smov [#allocation22]  }
  0xc8   : > { %8890 = vmatprep.mubr.msk.bf16.mxu1 %vm10685_vm0, %v10684_v0  ;;  %8941 = vmatpush3.bf16.msra.mxu1 %v1047_v17  ;;  %v616_v30 = vpack.c.bf16 %v608_v28, %v607_v27  ;;  %v628_v31 = vld [vmem:[%s10962_s4 + $0x41] sm:$0xff]  ;;  %v609_v33 = vld [vmem:[%s10962_s4 + $0x50] sm:$0xff]  ;;  %v631_v38 = vld [vmem:[%s10962_s4 + $0x59] sm:$0xff] }
  0xc9   : > { %9000 = vmatprep.subr.bf16.mxu1 %v10684_v0  ;;  %v637_v35 = vpack.c.bf16 %v629_v32, %v628_v31  ;;  %v617_v36 = vpack.c.bf16 %v610_v34, %v609_v33  ;;  %v630_v37 = vld [vmem:[%s10962_s4 + $0x51] sm:$0xff]  ;;  %v611_v39 = vld [vmem:[%s10962_s4 + $0x60] sm:$0xff]  ;;  %v600_v49 = vld [vmem:[%s10962_s4 + $0x8] sm:$0xff]  ;;  %p10583_p13 = pnand %p10582_p4, %p12228_p7 }
  0xca   : > { %v638_v40 = vpack.c.bf16 %v631_v38, %v630_v37  ;;  %v618_v41 = vpack.c.bf16 %v611_v39, %v611_v39  ;;  %v632_v42 = vld [vmem:[%s10962_s4 + $0x61] sm:$0xff]  ;;  %v1004_v43 = vld [vmem:[%s10962_s4 + $0x12] sm:$0xff]  ;;  %v863_v44 = vld [vmem:[%s10962_s4 + $0xa] sm:$0xff] }
  0xcb   : > { %v639_v46 = vpack.c.bf16 %v632_v42, %v632_v42  ;;  %v1016_v47 = vpack.c.bf16 %v1004_v43, %v863_v44  ;;  %v599_v48 = vld [vmem:[%s10962_s4] sm:$0xff]  ;;  %v1008_v59 = vld [vmem:[%s10962_s4 + $0x32] sm:$0xff]  ;;  %v867_v60 = vld [vmem:[%s10962_s4 + $0x2a] sm:$0xff]  ;;  %p10584_p5 = pneg %p10583_p13 }
  0xcc   : > { %v1006_v52 = vld [vmem:[%s10962_s4 + $0x22] sm:$0xff]  ;;  %v865_v53 = vld [vmem:[%s10962_s4 + $0x1a] sm:$0xff]  ;;  %v612_v54 = vpack.c.bf16 %v600_v49, %v599_v48  ;;  %v1018_v63 = vpack.c.bf16 %v1008_v59, %v867_v60  ;;  %v1012_v5 = vld [vmem:[%s10962_s4 + $0x52] sm:$0xff] }
  0xcd   : > { %8857 = vmatmul.mubr.msk.bf16.gmra.mxu0 %vm642_vm2, %v634_v15  ;;  %v1017_v56 = vpack.c.bf16 %v1006_v52, %v865_v53  ;;  %v862_v57 = vld [vmem:[%s10962_s4 + $0x2] sm:$0xff]  ;;  %v869_v2 = vld [vmem:[%s10962_s4 + $0x3a] sm:$0xff]  ;;  %v876_v3 = vpack.c.bf16 %v865_v53, %v1004_v43  ;;  %v871_v6 = vld [vmem:[%s10962_s4 + $0x4a] sm:$0xff]  ;;  %v877_v7 = vpack.c.bf16 %v867_v60, %v1006_v52 }
  0xce   : > { %8860 = vmatprep.mubr.msk.bf16.mxu0 %vm10685_vm0, %v10684_v0  ;;  %v875_v61 = vpack.c.bf16 %v863_v44, %v862_v57  ;;  %v1010_v1 = vld [vmem:[%s10962_s4 + $0x42] sm:$0xff]  ;;  %v1020_v8 = vpack.c.bf16 %v1012_v5, %v871_v6  ;;  %v873_v10 = vld [vmem:[%s10962_s4 + $0x5a] sm:$0xff]  ;;  %v878_v11 = vpack.c.bf16 %v869_v2, %v1008_v59  ;;  %v1015_v13 = vld [vmem:[%s10962_s4 + $0x6a] sm:$0xff] }
  0xcf   : > { %8891 = vmatmul.mubr.msk.bf16.gmra.mxu1 %vm642_vm2, %v614_v18  ;;  %v1019_v4 = vpack.c.bf16 %v1010_v1, %v869_v2  ;;  %v1014_v9 = vld [vmem:[%s10962_s4 + $0x62] sm:$0xff]  ;;  %v879_v14 = vpack.c.bf16 %v871_v6, %v1010_v1  ;;  %v1022_v15 = vpack.c.bf16 %v1015_v13, %v1015_v13  ;;  %v1285_v16 = vld [vmem:[%s10962_s4 + $0xc] sm:$0xff]  ;;  %v11094_v17 = vld [vmem:[%s10962_s4 + $0x14] sm:$0xff]  ;;  %v880_v18 = vpack.c.bf16 %v873_v10, %v1012_v5 }
  0xd0   : > { %8894 = vmatprep.mubr.msk.bf16.mxu1 %vm10685_vm0, %v10684_v0  ;;  %v1021_v12 = vpack.c.bf16 %v1014_v9, %v873_v10  ;;  %v1588_v19 = vld [vmem:[#allocation4 + $0xe] sm:$0x3]  ;;  %v1298_v20 = vpack.c.bf16 %v11094_v17, %v1285_v16  ;;  %v11105_v22 = vld [vmem:[%s10962_s4 + $0x1c] sm:$0xff]  ;;  %v1144_v26 = vld [vmem:[%s10962_s4 + $0xb] sm:$0xff] }
  0xd1   : > { %v1611_v21 = vsel %vm664_vm1, %v1588_v19, 0  ;;  %v1145_v27 = vld [vmem:[%s10962_s4 + $0x13] sm:$0xff]  ;;  %v1447_v28 = vld [vmem:[#allocation4 + $0xc] sm:$0x3]  ;;  %v1146_v34 = vld [vmem:[%s10962_s4 + $0x1b] sm:$0xff] }
  0xd2   : > { %v1157_v31 = vpack.c.bf16 %v1145_v27, %v1144_v26  ;;  %v1470_v32 = vsel %vm664_vm1, %v1447_v28, 0  ;;  %v11142_v37 = vld [vmem:[%s10962_s4 + $0x44] sm:$0xff]  ;;  %v11156_v42 = vld [vmem:[%s10962_s4 + $0x4c] sm:$0xff]  ;;  %v11159_v43 = vld [vmem:[%s10962_s4 + $0x54] sm:$0xff] }
  0xd3   : > { %v11162_v44 = vld [vmem:[#allocation3] sm:$0xff]  ;;  %v11177_v49 = vld [vmem:[%s10962_s4 + $0x64] sm:$0xff]  ;;  %v1570_v2 = vld [vmem:[%s10962_s4 + $0x2d] sm:$0xff] }
  0xd4   : > { %v11174_v48 = vld [vmem:[%s10962_s4 + $0x5c] sm:$0xff]  ;;  %v1152_v52 = vld [vmem:[%s10962_s4 + $0x4b] sm:$0xff]  ;;  %v1153_v53 = vld [vmem:[%s10962_s4 + $0x53] sm:$0xff] }
  0xd5   : > { %8861 = vmatmul.mubr.msk.bf16.gmra.mxu0 %vm642_vm2, %v635_v23  ;;  %v11108_v23 = vld [vmem:[%s10962_s4 + $0x24] sm:$0xff]  ;;  %v1303_v51 = vpack.c.bf16 %v11177_v49, %v11174_v48  ;;  %v1154_v57 = vld [vmem:[%s10962_s4 + $0x5b] sm:$0xff] }
  0xd6   : > { %8864 = vmatprep.mubr.msk.bf16.mxu0 %vm10685_vm0, %v10684_v0  ;;  %v1299_v25 = vpack.c.bf16 %v11108_v23, %v11105_v22  ;;  %v1155_v58 = vld [vmem:[%s10962_s4 + $0x63] sm:$0xff]  ;;  %v1567_v59 = vld [vmem:[%s10962_s4 + $0x15] sm:$0xff] }
  0xd7   : > { %8895 = vmatmul.mubr.msk.bf16.gmra.mxu1 %vm642_vm2, %v615_v24  ;;  %v881_v24 = vpack.c.bf16 %v1014_v9, %v1014_v9  ;;  %v1568_v60 = vld [vmem:[%s10962_s4 + $0x1d] sm:$0xff]  ;;  %v1569_v1 = vld [vmem:[%s10962_s4 + $0x25] sm:$0xff]  ;;  %v1571_v6 = vld [vmem:[%s10962_s4 + $0x35] sm:$0xff] }
  0xd8   : > { %8898 = vmatprep.mubr.msk.bf16.mxu1 %vm10685_vm0, %v10684_v0  ;;  %v1729_v5 = vld [vmem:[#allocation4 + $0x10] sm:$0x3]  ;;  %v1576_v16 = vld [vmem:[%s10962_s4 + $0x5d] sm:$0xff] }
  0xd9   : > { %v1752_v9 = vsel %vm664_vm1, %v1729_v5, 0 }
  0xdd   : > { %8865 = vmatmul.mubr.msk.bf16.gmra.mxu0 %vm642_vm2, %v636_v29  ;;  %v11122_v29 = vld [vmem:[%s10962_s4 + $0x2c] sm:$0xff] }
  0xde   : > { %8868 = vmatprep.mubr.msk.bf16.mxu0 %vm10685_vm0, %v10684_v0  ;;  %v1440_v13 = vpack.c.bf16 %v11122_v29, %v11108_v23  ;;  %v1442_v23 = vpack.c.bf16 %v11156_v42, %v11142_v37 }
  0xdf   : > { %8899 = vmatmul.mubr.msk.bf16.gmra.mxu1 %vm642_vm2, %v616_v30  ;;  %v11125_v30 = vld [vmem:[%s10962_s4 + $0x34] sm:$0xff] }
  0xe0   : > { %8902 = vmatprep.mubr.msk.bf16.mxu1 %vm10685_vm0, %v10684_v0  ;;  %v1300_v33 = vpack.c.bf16 %v11125_v30, %v11122_v29 }
  0xe5   : > { %8869 = vmatmul.mubr.msk.bf16.gmra.mxu0 %vm642_vm2, %v637_v35  ;;  %v1147_v35 = vld [vmem:[%s10962_s4 + $0x23] sm:$0xff] }
  0xe6   : > { %8872 = vmatprep.mubr.msk.bf16.mxu0 %vm10685_vm0, %v10684_v0  ;;  %v1158_v38 = vpack.c.bf16 %v1147_v35, %v1146_v34 }
  0xe7   : > { %8903 = vmatmul.mubr.msk.bf16.gmra.mxu1 %vm642_vm2, %v617_v36  ;;  %v11139_v36 = vld [vmem:[%s10962_s4 + $0x3c] sm:$0xff] }
  0xe8   : > { %8906 = vmatprep.mubr.msk.bf16.mxu1 %vm10685_vm0, %v10684_v0  ;;  %v1301_v39 = vpack.c.bf16 %v11142_v37, %v11139_v36 }
  0xed   : > { %8873 = vmatmul.mubr.msk.bf16.gmra.mxu0 %vm642_vm2, %v638_v40  ;;  %v1148_v40 = vld [vmem:[%s10962_s4 + $0x2b] sm:$0xff] }
  0xee   : > { %8876 = vmatprep.mubr.msk.bf16.mxu0 %vm10685_vm0, %v10684_v0 }
  0xef   : > { %8907 = vmatmul.mubr.msk.bf16.gmra.mxu1 %vm642_vm2, %v618_v41  ;;  %v1149_v41 = vld [vmem:[%s10962_s4 + $0x33] sm:$0xff] }
  0xf0   : > { %8942 = vmatprep.mubr.msk.bf16.mxu1 %vm10685_vm0, %v10684_v0  ;;  %v1159_v45 = vpack.c.bf16 %v1149_v41, %v1148_v40 }
  0xf5   : > { %8877 = vmatmul.mubr.msk.bf16.gmra.mxu0 %vm642_vm2, %v639_v46  ;;  %v1302_v46 = vpack.c.bf16 %v11159_v43, %v11156_v42 }
  0xf6   : > { %8882 = vmatprep.mubr.msk.bf16.mxu0 %vm10685_vm0, %v10684_v0 }
  0xf7   : > { %8943 = vmatmul.mubr.msk.bf16.vlgmr.msra.gmra.mxu1 %vm642_vm2, %v1016_v47  ;;  %v1150_v47 = vld [vmem:[%s10962_s4 + $0x3b] sm:$0xff] }
  0xf8   : > { %8946 = vmatprep.mubr.msk.bf16.mxu1 %vm10685_vm0, %v10684_v0  ;;  %9001 = vmatpush3.bf16.msra.mxu1 %v1329_v50 }
  0xf9   : > { %9060 = vmatprep.subr.bf16.mxu1 %v10684_v0 }
  0xfd   : > { %8883 = vmatmul.mubr.msk.bf16.vlgmr.msra.gmra.mxu0 %vm642_vm2, %v612_v54  ;;  %v11190_v54 = vld [vmem:[%s10962_s4 + $0x6c] sm:$0xff] }
  0xfe   : > { %8911 = vmatpush3.bf16.msra.mxu0 %v906_v55  ;;  %8912 = vmatprep.mubr.msk.bf16.mxu0 %vm10685_vm0, %v10684_v0  ;;  %v1161_v55 = vpack.c.bf16 %v1153_v53, %v1152_v52 }
  0xff   : > { %8970 = vmatprep.subr.bf16.mxu0 %v10684_v0  ;;  %8947 = vmatmul.mubr.msk.bf16.gmra.mxu1 %vm642_vm2, %v1017_v56  ;;  %v1304_v56 = vpack.c.bf16 %v11190_v54, %v11190_v54 }
 0x100   : > { %8950 = vmatprep.mubr.msk.bf16.mxu1 %vm10685_vm0, %v10684_v0 }
 0x105   : > { %8913 = vmatmul.mubr.msk.bf16.vlgmr.msra.gmra.mxu0 %vm642_vm2, %v875_v61  ;;  %v1162_v61 = vpack.c.bf16 %v1155_v58, %v1154_v57 }
 0x106   : > { %8971 = vmatpush3.bf16.msra.mxu0 %v1188_v62  ;;  %8916 = vmatprep.mubr.msk.bf16.mxu0 %vm10685_vm0, %v10684_v0  ;;  %v1580_v62 = vpack.c.bf16 %v1568_v60, %v1567_v59 }
 0x107   : > { %8951 = vmatmul.mubr.msk.bf16.gmra.mxu1 %vm642_vm2, %v1018_v63  ;;  %9030 = vmatprep.subr.bf16.mxu0 %v10684_v0  ;;  %v1156_v63 = vld [vmem:[%s10962_s4 + $0x6b] sm:$0xff] }
 0x108   : > { %8954 = vmatprep.mubr.msk.bf16.mxu1 %vm10685_vm0, %v10684_v0 }
 0x10d   : > { %8917 = vmatmul.mubr.msk.bf16.gmra.mxu0 %vm642_vm2, %v876_v3  ;;  %v1163_v3 = vpack.c.bf16 %v1156_v63, %v1156_v63 }
 0x10e   : > { %8920 = vmatprep.mubr.msk.bf16.mxu0 %vm10685_vm0, %v10684_v0 }
 0x10f   : > { %8955 = vmatmul.mubr.msk.bf16.gmra.mxu1 %vm642_vm2, %v1019_v4  ;;  %v1581_v4 = vpack.c.bf16 %v1570_v2, %v1569_v1 }
 0x110   : > { %8958 = vmatprep.mubr.msk.bf16.mxu1 %vm10685_vm0, %v10684_v0 }
 0x115   : > { %8921 = vmatmul.mubr.msk.bf16.gmra.mxu0 %vm642_vm2, %v877_v7  ;;  %v1572_v7 = vld [vmem:[%s10962_s4 + $0x3d] sm:$0xff] }
 0x116   : > { %8924 = vmatprep.mubr.msk.bf16.mxu0 %vm10685_vm0, %v10684_v0  ;;  %v1582_v10 = vpack.c.bf16 %v1572_v7, %v1571_v6 }
 0x117   : > { %8959 = vmatmul.mubr.msk.bf16.gmra.mxu1 %vm642_vm2, %v1020_v8  ;;  %v1439_v8 = vpack.c.bf16 %v11105_v22, %v11094_v17  ;;  %v1441_v17 = vpack.c.bf16 %v11139_v36, %v11125_v30 }
 0x118   : > { %8962 = vmatprep.mubr.msk.bf16.mxu1 %vm10685_vm0, %v10684_v0 }
 0x11d   : > { %8925 = vmatmul.mubr.msk.bf16.gmra.mxu0 %vm642_vm2, %v878_v11  ;;  %v1573_v11 = vld [vmem:[%s10962_s4 + $0x45] sm:$0xff] }
 0x11e   : > { %8928 = vmatprep.mubr.msk.bf16.mxu0 %vm10685_vm0, %v10684_v0 }
 0x11f   : > { %8963 = vmatmul.mubr.msk.bf16.gmra.mxu1 %vm642_vm2, %v1021_v12  ;;  %v1574_v12 = vld [vmem:[%s10962_s4 + $0x4d] sm:$0xff] }
 0x120   : > { %8966 = vmatprep.mubr.msk.bf16.mxu1 %vm10685_vm0, %v10684_v0 }
 0x125   : > { %8929 = vmatmul.mubr.msk.bf16.gmra.mxu0 %vm642_vm2, %v879_v14  ;;  %v1583_v14 = vpack.c.bf16 %v1574_v12, %v1573_v11  ;;  %v1710_v11 = vld [vmem:[%s10962_s4 + $0x26] sm:$0xff]  ;;  %v1711_v12 = vld [vmem:[%s10962_s4 + $0x2e] sm:$0xff] }
 0x126   : > { %8932 = vmatprep.mubr.msk.bf16.mxu0 %vm10685_vm0, %v10684_v0 }
 0x127   : > { %8967 = vmatmul.mubr.msk.bf16.gmra.mxu1 %vm642_vm2, %v1022_v15  ;;  %v1575_v15 = vld [vmem:[%s10962_s4 + $0x55] sm:$0xff] }
 0x128   : > { %9002 = vmatprep.mubr.msk.bf16.mxu1 %vm10685_vm0, %v10684_v0 }
 0x12d   : > { %8933 = vmatmul.mubr.msk.bf16.gmra.mxu0 %vm642_vm2, %v880_v18  ;;  %v1584_v18 = vpack.c.bf16 %v1576_v16, %v1575_v15 }
 0x12e   : > { %8936 = vmatprep.mubr.msk.bf16.mxu0 %vm10685_vm0, %v10684_v0 }
 0x12f   : > { %9003 = vmatmul.mubr.msk.bf16.vlgmr.msra.gmra.mxu1 %vm642_vm2, %v1298_v20 }
 0x130   : > { %9006 = vmatprep.mubr.msk.bf16.mxu1 %vm10685_vm0, %v10684_v0  ;;  %9061 = vmatpush3.bf16.msra.mxu1 %v1611_v21 }
 0x131   : > { %9120 = vmatprep.subr.bf16.mxu1 %v10684_v0 }
 0x135   : > { %8937 = vmatmul.mubr.msk.bf16.gmra.mxu0 %vm642_vm2, %v881_v24 }
 0x136   : > { %8972 = vmatprep.mubr.msk.bf16.mxu0 %vm10685_vm0, %v10684_v0 }
 0x137   : > { %9007 = vmatmul.mubr.msk.bf16.gmra.mxu1 %vm642_vm2, %v1299_v25 }
 0x138   : > { %9010 = vmatprep.mubr.msk.bf16.mxu1 %vm10685_vm0, %v10684_v0 }
 0x13d   : > { %8973 = vmatmul.mubr.msk.bf16.vlgmr.msra.gmra.mxu0 %vm642_vm2, %v1157_v31 }
 0x13e   : > { %9031 = vmatpush3.bf16.msra.mxu0 %v1470_v32  ;;  %8976 = vmatprep.mubr.msk.bf16.mxu0 %vm10685_vm0, %v10684_v0 }
 0x13f   : > { %9011 = vmatmul.mubr.msk.bf16.gmra.mxu1 %vm642_vm2, %v1300_v33  ;;  %9090 = vmatprep.subr.bf16.mxu0 %v10684_v0  ;;  %v1443_v33 = vpack.c.bf16 %v11174_v48, %v11159_v43  ;;  %v1444_v43 = vpack.c.bf16 %v11190_v54, %v11177_v49 }
 0x140   : > { %9014 = vmatprep.mubr.msk.bf16.mxu1 %vm10685_vm0, %v10684_v0 }
 0x145   : > { %8977 = vmatmul.mubr.msk.bf16.gmra.mxu0 %vm642_vm2, %v1158_v38 }
 0x146   : > { %8980 = vmatprep.mubr.msk.bf16.mxu0 %vm10685_vm0, %v10684_v0  ;;  %v1151_v0 = vld [vmem:[%s10962_s4 + $0x43] sm:$0xff] }
 0x147   : > { %9015 = vmatmul.mubr.msk.bf16.gmra.mxu1 %vm642_vm2, %v1301_v39  ;;  %v1160_v50 = vpack.c.bf16 %v1151_v0, %v1150_v47 }
 0x148   : > { %9018 = vmatprep.mubr.msk.bf16.mxu1 %vm10685_vm0, %v11162_v44 }
 0x14d   : > { %8981 = vmatmul.mubr.msk.bf16.gmra.mxu0 %vm642_vm2, %v1159_v45 }
 0x14e   : > { %8984 = vmatprep.mubr.msk.bf16.mxu0 %vm10685_vm0, %v11162_v44 }
 0x14f   : > { %9019 = vmatmul.mubr.msk.bf16.gmra.mxu1 %vm642_vm2, %v1302_v46 }
 0x150   : > { %9022 = vmatprep.mubr.msk.bf16.mxu1 %vm10685_vm0, %v11162_v44 }
 0x155   : > { %8985 = vmatmul.mubr.msk.bf16.gmra.mxu0 %vm642_vm2, %v1160_v50  ;;  %v1438_v50 = vld [vmem:[%s10962_s4 + $0x74] sm:$0xff] }
 0x156   : > { %8988 = vmatprep.mubr.msk.bf16.mxu0 %vm10685_vm0, %v11162_v44  ;;  %v1445_v54 = vpack.c.bf16 %v1438_v50, %v1438_v50 }
 0x157   : > { %9023 = vmatmul.mubr.msk.bf16.gmra.mxu1 %vm642_vm2, %v1303_v51 }
 0x158   : > { %9026 = vmatprep.mubr.msk.bf16.mxu1 %vm10685_vm0, %v11162_v44 }
 0x15d   : > { %8989 = vmatmul.mubr.msk.bf16.gmra.mxu0 %vm642_vm2, %v1161_v55 }
 0x15e   : > { %8992 = vmatprep.mubr.msk.bf16.mxu0 %vm10685_vm0, %v11162_v44 }
 0x15f   : > { %9027 = vmatmul.mubr.msk.bf16.gmra.mxu1 %vm642_vm2, %v1304_v56 }
 0x160   : > { %9062 = vmatprep.mubr.msk.bf16.mxu1 %vm10685_vm0, %v11162_v44 }
 0x165   : > { %8993 = vmatmul.mubr.msk.bf16.gmra.mxu0 %vm642_vm2, %v1162_v61  ;;  %v1708_v61 = vld [vmem:[%s10962_s4 + $0x16] sm:$0xff] }
 0x166   : > { %8996 = vmatprep.mubr.msk.bf16.mxu0 %vm10685_vm0, %v11162_v44 }
 0x167   : > { %9063 = vmatmul.mubr.msk.bf16.vlgmr.msra.gmra.mxu1 %vm642_vm2, %v1580_v62  ;;  %v1709_v62 = vld [vmem:[%s10962_s4 + $0x1e] sm:$0xff] }
 0x168   : > { %9066 = vmatprep.mubr.msk.bf16.mxu1 %vm10685_vm0, %v11162_v44  ;;  %v1721_v6 = vpack.c.bf16 %v1709_v62, %v1708_v61 }
 0x16d   : > { %8997 = vmatmul.mubr.msk.bf16.gmra.mxu0 %vm642_vm2, %v1163_v3 }
 0x16e   : > { %9032 = vmatprep.mubr.msk.bf16.mxu0 %vm10685_vm0, %v11162_v44 }
 0x16f   : > { %9067 = vmatmul.mubr.msk.bf16.gmra.mxu1 %vm642_vm2, %v1581_v4 }
 0x170   : > { %9070 = vmatprep.mubr.msk.bf16.mxu1 %vm10685_vm0, %v11162_v44 }
 0x175   : > { %9033 = vmatmul.mubr.msk.bf16.vlgmr.msra.gmra.mxu0 %vm642_vm2, %v1439_v8 }
 0x176   : > { %9091 = vmatpush3.bf16.msra.mxu0 %v1752_v9  ;;  %9036 = vmatprep.mubr.msk.bf16.mxu0 %vm10685_vm0, %v11162_v44 }
 0x177   : > { %9071 = vmatmul.mubr.msk.bf16.gmra.mxu1 %vm642_vm2, %v1582_v10  ;;  %9168 = vmatprep.subr.bf16.mxu0 %v11162_v44 }
 0x178   : > { %9074 = vmatprep.mubr.msk.bf16.mxu1 %vm10685_vm0, %v11162_v44 }
 0x17d   : > { %9037 = vmatmul.mubr.msk.bf16.gmra.mxu0 %vm642_vm2, %v1440_v13 }
 0x17e   : > { %9040 = vmatprep.mubr.msk.bf16.mxu0 %vm10685_vm0, %v11162_v44 }
 0x17f   : > { %9075 = vmatmul.mubr.msk.bf16.gmra.mxu1 %vm642_vm2, %v1583_v14 }
 0x180   : > { %9078 = vmatprep.mubr.msk.bf16.mxu1 %vm10685_vm0, %v11162_v44 }
 0x185   : > { %v11248_v19 = vpop.f32.mrf.mxu0  ;;  %9041 = vmatmul.mubr.msk.bf16.gmra.mxu0 %vm642_vm2, %v1441_v17 }
 0x186   : > { %9044 = vmatprep.mubr.msk.bf16.mxu0 %vm10685_vm0, %v11162_v44 }
 0x187   : > { %v8854_v20 = vpop.f32.mrf.mxu0  ;;  %v819_v21 = vpop.f32.mrf.mxu1  ;;  %9079 = vmatmul.mubr.msk.bf16.gmra.mxu1 %vm642_vm2, %v1584_v18  ;;  %v1722_v18 = vpack.c.bf16 %v1711_v12, %v1710_v11 }
 0x188   : > { %9082 = vmatprep.mubr.msk.bf16.mxu1 %vm10685_vm0, %v11162_v44 }
 0x189   : > { %v11256_v22 = vpop.f32.mrf.mxu0  ;;  %v8888_v24 = vpop.f32.mrf.mxu1 }
 0x18a   : > { %v1712_v24 = vld [vmem:[%s10962_s4 + $0x36] sm:$0xff] }
 0x18b   : > { %v8855_v25 = vpop.f32.mrf.mxu0  ;;  %v822_v26 = vpop.f32.mrf.mxu1 }
 0x18d   : > { %v710_v27 = vpop.f32.mrf.mxu0  ;;  %9045 = vmatmul.mubr.msk.bf16.gmra.mxu0 %vm642_vm2, %v1442_v23  ;;  %v8889_v28 = vpop.f32.mrf.mxu1 }
 0x18e   : > { %v11261_v29 = vadd.f32 %v819_v21, %v710_v27  ;;  %9048 = vmatprep.mubr.msk.bf16.mxu0 %vm10685_vm0, %v11162_v44  ;;  %v1713_v27 = vld [vmem:[%s10962_s4 + $0x3e] sm:$0xff] }
 0x18f   : > { %v8858_v30 = vpop.f32.mrf.mxu0  ;;  %v827_v31 = vpop.f32.mrf.mxu1 }
 0x191   : > { %v713_v32 = vpop.f32.mrf.mxu0  ;;  %v8892_v34 = vpop.f32.mrf.mxu1 }
 0x192   : > { %v11267_v35 = vadd.f32 %v822_v26, %v713_v32  ;;  %v1723_v32 = vpack.c.bf16 %v1713_v27, %v1712_v24 }
 0x193   : > { %v8859_v36 = vpop.f32.mrf.mxu0  ;;  %v830_v37 = vpop.f32.mrf.mxu1 }
 0x195   : > { %v718_v38 = vpop.f32.mrf.mxu0  ;;  %9049 = vmatmul.mubr.msk.bf16.gmra.mxu0 %vm642_vm2, %v1443_v33  ;;  %v8893_v39 = vpop.f32.mrf.mxu1 }
 0x196   : > { %v11270_v40 = vadd.f32 %v827_v31, %v718_v38  ;;  %9052 = vmatprep.mubr.msk.bf16.mxu0 %vm10685_vm0, %v11162_v44 }
 0x197   : > { %v8862_v41 = vpop.f32.mrf.mxu0  ;;  %v835_v42 = vpop.f32.mrf.mxu1 }
 0x198   : > { %v1714_v41 = vld [vmem:[%s10962_s4 + $0x46] sm:$0xff] }
 0x199   : > { %v721_v45 = vpop.f32.mrf.mxu0  ;;  %v8896_v46 = vpop.f32.mrf.mxu1 }
 0x19a   : > { %v11276_v47 = vadd.f32 %v830_v37, %v721_v45 }
 0x19b   : > { %v8863_v0 = vpop.f32.mrf.mxu0  ;;  %v838_v48 = vpop.f32.mrf.mxu1 }
 0x19d   : > { %v726_v51 = vpop.f32.mrf.mxu0  ;;  %9053 = vmatmul.mubr.msk.bf16.gmra.mxu0 %vm642_vm2, %v1444_v43  ;;  %v8897_v52 = vpop.f32.mrf.mxu1 }
 0x19e   : > { %v11280_v53 = vadd.f32 %v835_v42, %v726_v51  ;;  %9056 = vmatprep.mubr.msk.bf16.mxu0 %vm10685_vm0, %v11162_v44  ;;  %v1715_v42 = vld [vmem:[%s10962_s4 + $0x4e] sm:$0xff] }
 0x19f   : > { %v8866_v55 = vpop.f32.mrf.mxu0  ;;  %v843_v56 = vpop.f32.mrf.mxu1  ;;  %v1724_v0 = vpack.c.bf16 %v1715_v42, %v1714_v41 }
 0x1a1   : > { %v729_v49 = vpop.f32.mrf.mxu0  ;;  %v8900_v57 = vpop.f32.mrf.mxu1 }
 0x1a2   : > { %v11284_v58 = vadd.f32 %v838_v48, %v729_v49  ;;  %v1716_v49 = vld [vmem:[%s10962_s4 + $0x56] sm:$0xff] }
 0x1a3   : > { %v8867_v59 = vpop.f32.mrf.mxu0  ;;  %v846_v60 = vpop.f32.mrf.mxu1 }
 0x1a5   : > { %v734_v63 = vpop.f32.mrf.mxu0  ;;  %9057 = vmatmul.mubr.msk.bf16.gmra.mxu0 %vm642_vm2, %v1445_v54  ;;  %v8901_v1 = vpop.f32.mrf.mxu1  ;;  %v1717_v54 = vld [vmem:[%s10962_s4 + $0x5e] sm:$0xff] }
 0x1a6   : > { %v11289_v2 = vadd.f32 %v843_v56, %v734_v63  ;;  %9092 = vmatprep.mubr.msk.bf16.mxu0 %vm10685_vm0, %v11162_v44  ;;  %v1725_v62 = vpack.c.bf16 %v1717_v54, %v1716_v49 }
 0x1a7   : > { %v8870_v3 = vpop.f32.mrf.mxu0  ;;  %v851_v4 = vpop.f32.mrf.mxu1 }
 0x1a9   : > { %v737_v5 = vpop.f32.mrf.mxu0  ;;  %v8904_v7 = vpop.f32.mrf.mxu1 }
 0x1aa   : > { %v11293_v8 = vadd.f32 %v846_v60, %v737_v5  ;;  %v11323_v7 = vld [vmem:[#allocation3] sm:$0xff] }
 0x1ab   : > { %v8871_v9 = vpop.f32.mrf.mxu0  ;;  %v853_v10 = vpop.f32.mrf.mxu1  ;;  %588 = vst.msk [vmem:[#allocation2] sm:$0xff] %vm587_vm3, %v11323_v7  ;;  %589 = vst.msk [vmem:[#allocation2 + $0x8] sm:$0xff] %vm587_vm3, %v11323_v7 }
 0x1ac   : > { %590 = vst.msk [vmem:[#allocation2 + $0x10] sm:$0xff] %vm587_vm3, %v11323_v7  ;;  %591 = vst.msk [vmem:[#allocation2 + $0x18] sm:$0xff] %vm587_vm3, %v11323_v7 }
 0x1ad   : > { %v742_v13 = vpop.f32.mrf.mxu0  ;;  %9093 = vmatmul.mubr.msk.bf16.vlgmr.msra.gmra.mxu0 %vm642_vm2, %v1721_v6  ;;  %v8905_v14 = vpop.f32.mrf.mxu1  ;;  %592 = vst.msk [vmem:[#allocation2 + $0x20] sm:$0xff] %vm587_vm3, %v11323_v7  ;;  %593 = vst.msk [vmem:[#allocation2 + $0x28] sm:$0xff] %vm587_vm3, %v11323_v7 }
 0x1ae   : > { %9096 = vmatprep.mubr.msk.bf16.mxu0 %vm10685_vm0, %v11162_v44  ;;  %594 = vst.msk [vmem:[#allocation2 + $0x30] sm:$0xff] %vm587_vm3, %v11323_v7 }
 0x1af   : > { %v8874_v15 = vpop.f32.mrf.mxu0  ;;  %v857_v16 = vpop.f32.mrf.mxu1 }
 0x1b1   : > { %v744_v17 = vpop.f32.mrf.mxu0  ;;  %v8908_v20 = vpop.f32.mrf.mxu1 }
 0x1b3   : > { %v8875_v21 = vpop.f32.mrf.mxu0  ;;  %v859_v23 = vpop.f32.mrf.mxu1 }
 0x1b5   : > { %v748_v25 = vpop.f32.mrf.mxu0  ;;  %9097 = vmatmul.mubr.msk.bf16.gmra.mxu0 %vm642_vm2, %v1722_v18  ;;  %v8909_v26 = vpop.f32.mrf.mxu1 }
 0x1b6   : > { %9100 = vmatprep.mubr.msk.bf16.mxu0 %vm10685_vm0, %v11162_v44 }
 0x1b7   : > { %v8878_v28 = vpop.f32.mrf.mxu0  ;;  %v1083_v30 = vpop.f32.mrf.mxu1 }
 0x1b9   : > { %v750_v31 = vpop.f32.mrf.mxu0  ;;  %v8944_v33 = vpop.f32.mrf.mxu1 }
 0x1bb   : > { %v8879_v34 = vpop.f32.mrf.mxu0  ;;  %v1086_v36 = vpop.f32.mrf.mxu1 }
 0x1bd   : > { %v811_v37 = vpop.f32.mrf.mxu0  ;;  %9101 = vmatmul.mubr.msk.bf16.gmra.mxu0 %vm642_vm2, %v1723_v32  ;;  %v8945_v38 = vpop.f32.mrf.mxu1 }
 0x1be   : > { %v812_v39 = vadd.f32 %v811_v37, %v11248_v19  ;;  %9104 = vmatprep.mubr.msk.bf16.mxu0 %vm10685_vm0, %v11162_v44 }
 0x1bf   : > { %v8884_v45 = vpop.f32.mrf.mxu0  ;;  %v1091_v43 = vpop.f32.mrf.mxu1 }
 0x1c1   : > { %v814_v46 = vpop.f32.mrf.mxu0  ;;  %v8948_v48 = vpop.f32.mrf.mxu1 }
 0x1c2   : > { %v815_v50 = vadd.f32 %v814_v46, %v11256_v22 }
 0x1c3   : > { %v8885_v51 = vpop.f32.mrf.mxu0  ;;  %v1094_v52 = vpop.f32.mrf.mxu1 }
 0x1c5   : > { %v942_v55 = vpop.f32.mrf.mxu0  ;;  %9105 = vmatmul.mubr.msk.bf16.gmra.mxu0 %vm642_vm2, %v1724_v0  ;;  %v8949_v19 = vpop.f32.mrf.mxu1 }
 0x1c6   : > { %v993_v56 = vadd.f32 %v942_v55, %v812_v39  ;;  %9108 = vmatprep.mubr.msk.bf16.mxu0 %vm10685_vm0, %v11162_v44 }
 0x1c7   : > { %v8914_v57 = vpop.f32.mrf.mxu0  ;;  %v1099_v59 = vpop.f32.mrf.mxu1 }
 0x1c8   : > { %v11317_v60 = vadd.f32 %v1083_v30, %v993_v56 }
 0x1c9   : > { %v945_v61 = vpop.f32.mrf.mxu0  ;;  %v8952_v63 = vpop.f32.mrf.mxu1 }
 0x1ca   : > { %v994_v22 = vadd.f32 %v945_v61, %v815_v50 }
 0x1cb   : > { %v8915_v1 = vpop.f32.mrf.mxu0  ;;  %v1102_v3 = vpop.f32.mrf.mxu1 }
 0x1cc   : > { %v11319_v4 = vadd.f32 %v1086_v36, %v994_v22 }
 0x1cd   : > { %v950_v5 = vpop.f32.mrf.mxu0  ;;  %9109 = vmatmul.mubr.msk.bf16.gmra.mxu0 %vm642_vm2, %v1725_v62  ;;  %v8953_v6 = vpop.f32.mrf.mxu1 }
 0x1ce   : > { %v995_v44 = vadd.f32 %v950_v5, %v11261_v29  ;;  %9112 = vmatprep.mubr.msk.bf16.mxu0 %vm10685_vm0, %v11323_v7 }
 0x1cf   : > { %v8918_v9 = vpop.f32.mrf.mxu0  ;;  %v1107_v10 = vpop.f32.mrf.mxu1 }
 0x1d0   : > { %v11327_v11 = vadd.f32 %v1091_v43, %v995_v44 }
 0x1d1   : > { %v953_v12 = vpop.f32.mrf.mxu0  ;;  %v8956_v13 = vpop.f32.mrf.mxu1 }
 0x1d2   : > { %v996_v14 = vadd.f32 %v953_v12, %v11267_v35 }
 0x1d3   : > { %v8919_v15 = vpop.f32.mrf.mxu0  ;;  %v1110_v16 = vpop.f32.mrf.mxu1 }
 0x1d4   : > { %v11330_v17 = vadd.f32 %v1094_v52, %v996_v14 }
 0x1d5   : > { %v958_v18 = vpop.f32.mrf.mxu0  ;;  %v8957_v20 = vpop.f32.mrf.mxu1 }
 0x1d6   : > { %v997_v29 = vadd.f32 %v958_v18, %v11270_v40 }
 0x1d7   : > { %v8922_v21 = vpop.f32.mrf.mxu0  ;;  %v1115_v23 = vpop.f32.mrf.mxu1 }
 0x1d8   : > { %v11333_v24 = vadd.f32 %v1099_v59, %v997_v29 }
 0x1d9   : > { %v961_v25 = vpop.f32.mrf.mxu0  ;;  %v8960_v26 = vpop.f32.mrf.mxu1 }
 0x1da   : > { %v998_v27 = vadd.f32 %v961_v25, %v11276_v47 }
 0x1db   : > { %v8923_v28 = vpop.f32.mrf.mxu0  ;;  %v1118_v30 = vpop.f32.mrf.mxu1 }
 0x1dc   : > { %v11336_v31 = vadd.f32 %v1102_v3, %v998_v27 }
 0x1dd   : > { %v966_v35 = vpop.f32.mrf.mxu0  ;;  %v8961_v32 = vpop.f32.mrf.mxu1 }
 0x1de   : > { %v999_v33 = vadd.f32 %v966_v35, %v11280_v53 }
 0x1df   : > { %v8926_v34 = vpop.f32.mrf.mxu0  ;;  %v1123_v36 = vpop.f32.mrf.mxu1 }
 0x1e0   : > { %v11339_v37 = vadd.f32 %v1107_v10, %v999_v33  ;;  %v9425_v33 = vld [vmem:[#allocation9 + $0x18] sm:$0xff]  }
 0x1e1   : > { %v969_v40 = vpop.f32.mrf.mxu0  ;;  %v8964_v38 = vpop.f32.mrf.mxu1  ;;  %9121 = vmatpush3.bf16.msra.mxu1 %v9425_v33 }
 0x1e2   : > { %v1000_v39 = vadd.f32 %v969_v40, %v11284_v58  ;;  %9122 = vmatprep.subr.bf16.mxu1 %v11323_v7 }
 0x1e3   : > { %v8927_v41 = vpop.f32.mrf.mxu0  ;;  %v1125_v42 = vpop.f32.mrf.mxu1 }
 0x1e4   : > { %v11342_v45 = vadd.f32 %v1110_v16, %v1000_v39 }
 0x1e5   : > { %v974_v47 = vpop.f32.mrf.mxu0  ;;  %v8965_v43 = vpop.f32.mrf.mxu1 }
 0x1e6   : > { %v1001_v46 = vadd.f32 %v974_v47, %v11289_v2  ;;  %v1577_v43 = vld [vmem:[%s10962_s4 + $0x65] sm:$0xff] }
 0x1e7   : > { %v8930_v0 = vpop.f32.mrf.mxu0  ;;  %v1129_v48 = vpop.f32.mrf.mxu1 }
 0x1e8   : > { %v11345_v50 = vadd.f32 %v1115_v23, %v1001_v46  ;;  %v1578_v46 = vld [vmem:[%s10962_s4 + $0x6d] sm:$0xff] }
 0x1e9   : > { %v977_v53 = vpop.f32.mrf.mxu0  ;;  %v8968_v51 = vpop.f32.mrf.mxu1  ;;  %v1585_v48 = vpack.c.bf16 %v1578_v46, %v1577_v43 }
 0x1ea   : > { %v1002_v52 = vadd.f32 %v977_v53, %v11293_v8 }
 0x1eb   : > { %v8931_v55 = vpop.f32.mrf.mxu0  ;;  %v1131_v19 = vpop.f32.mrf.mxu1  ;;  %9083 = vmatmul.mubr.msk.bf16.gmra.mxu1 %vm642_vm2, %v1585_v48 }
 0x1ec   : > { %v11348_v56 = vadd.f32 %v1118_v30, %v1002_v52  ;;  %9086 = vmatprep.mubr.msk.bf16.mxu1 %vm10685_vm0, %v11323_v7 }
 0x1ed   : > { %v982_v58 = vpop.f32.mrf.mxu0  ;;  %v8969_v49 = vpop.f32.mrf.mxu1 }
 0x1ef   : > { %v8934_v54 = vpop.f32.mrf.mxu0  ;;  %v1365_v57 = vpop.f32.mrf.mxu1 }
 0x1f1   : > { %v984_v59 = vpop.f32.mrf.mxu0  ;;  %v9004_v61 = vpop.f32.mrf.mxu1 }
 0x1f3   : > { %v8935_v2 = vpop.f32.mrf.mxu0  ;;  %v1368_v62 = vpop.f32.mrf.mxu1 }
 0x1f5   : > { %v988_v8 = vpop.f32.mrf.mxu0  ;;  %v9005_v63 = vpop.f32.mrf.mxu1 }
 0x1f7   : > { %v8938_v22 = vpop.f32.mrf.mxu0  ;;  %v1373_v1 = vpop.f32.mrf.mxu1 }
 0x1f9   : > { %v990_v3 = vpop.f32.mrf.mxu0  ;;  %v9008_v5 = vpop.f32.mrf.mxu1 }
 0x1fa   : > { %v1719_v3 = vld [vmem:[%s10962_s4 + $0x6e] sm:$0xff] }
 0x1fb   : > { %v8939_v6 = vpop.f32.mrf.mxu0  ;;  %v1376_v44 = vpop.f32.mrf.mxu1 }
 0x1fd   : > { %v1224_v9 = vpop.f32.mrf.mxu0  ;;  %v9009_v10 = vpop.f32.mrf.mxu1 }
 0x1fe   : > { %v1275_v12 = vadd.f32 %v1224_v9, %v11317_v60  ;;  %v9426_v9 = vld [vmem:[#allocation9 + $0x10] sm:$0xff]  }
 0x1ff   : > { %v8974_v13 = vpop.f32.mrf.mxu0  ;;  %v1381_v14 = vpop.f32.mrf.mxu1  ;;  %9123 = vmatpush3.bf16.msra.mxu1 %v9426_v9 }
 0x200   : > { %v11365_v15 = vadd.f32 %v1365_v57, %v1275_v12  ;;  %9136 = vmatprep.subr.bf16.mxu1 %v11323_v7 }
 0x201   : > { %v1227_v16 = vpop.f32.mrf.mxu0  ;;  %v9012_v18 = vpop.f32.mrf.mxu1 }
 0x202   : > { %v1276_v20 = vadd.f32 %v1227_v16, %v11319_v4 }
 0x203   : > { %v8975_v29 = vpop.f32.mrf.mxu0  ;;  %v1384_v21 = vpop.f32.mrf.mxu1 }
 0x204   : > { %v11368_v23 = vadd.f32 %v1368_v62, %v1276_v20  ;;  %v1720_v29 = vld [vmem:[%s10962_s4 + $0x76] sm:$0xff] }
 0x205   : > { %v1232_v25 = vpop.f32.mrf.mxu0  ;;  %v9013_v26 = vpop.f32.mrf.mxu1 }
 0x206   : > { %v1277_v27 = vadd.f32 %v1232_v25, %v11327_v11  ;;  %v1727_v26 = vpack.c.bf16 %v1720_v29, %v1720_v29 }
 0x207   : > { %v8978_v28 = vpop.f32.mrf.mxu0  ;;  %v1389_v30 = vpop.f32.mrf.mxu1 }
 0x208   : > { %v11371_v35 = vadd.f32 %v1373_v1, %v1277_v27  ;;  %v1718_v1 = vld [vmem:[%s10962_s4 + $0x66] sm:$0xff] }
 0x209   : > { %v1235_v60 = vpop.f32.mrf.mxu0  ;;  %v9016_v32 = vpop.f32.mrf.mxu1  ;;  %v1726_v6 = vpack.c.bf16 %v1719_v3, %v1718_v1  ;;  %v9427_v27 = vld [vmem:[#allocation9 + $0x38] sm:$0xff]  }
 0x20a   : > { %v1278_v34 = vadd.f32 %v1235_v60, %v11330_v17  ;;  %9169 = vmatpush3.bf16.msra.mxu0 %v9427_v27 }
 0x20b   : > { %v8979_v4 = vpop.f32.mrf.mxu0  ;;  %v1392_v36 = vpop.f32.mrf.mxu1  ;;  %9113 = vmatmul.mubr.msk.bf16.gmra.mxu0 %vm642_vm2, %v1726_v6  ;;  %9170 = vmatprep.subr.bf16.mxu0 %v11323_v7 }
 0x20c   : > { %v11374_v40 = vadd.f32 %v1376_v44, %v1278_v34  ;;  %9116 = vmatprep.mubr.msk.bf16.mxu0 %vm10685_vm0, %v11323_v7 }
 0x20d   : > { %v1240_v38 = vpop.f32.mrf.mxu0  ;;  %v9017_v11 = vpop.f32.mrf.mxu1 }
 0x20e   : > { %v1279_v39 = vadd.f32 %v1240_v38, %v11333_v24 }
 0x20f   : > { %v8982_v41 = vpop.f32.mrf.mxu0  ;;  %v1397_v42 = vpop.f32.mrf.mxu1 }
 0x210   : > { %v11378_v47 = vadd.f32 %v1381_v14, %v1279_v39 }
 0x211   : > { %v1243_v0 = vpop.f32.mrf.mxu0  ;;  %v9020_v17 = vpop.f32.mrf.mxu1 }
 0x212   : > { %v1280_v53 = vadd.f32 %v1243_v0, %v11336_v31  ;;  %v1579_v31 = vld [vmem:[%s10962_s4 + $0x75] sm:$0xff]  ;;  %s10585_s4 = sshll.u32 %s10687_s29, 4  ;;  %s10586_s4 = int_to_ptr.vmem [resolvable:$false] %s10585_s4 }
 0x213   : > { %v8983_v51 = vpop.f32.mrf.mxu0  ;;  %v1400_v52 = vpop.f32.mrf.mxu1  ;;  %v1586_v2 = vpack.c.bf16 %v1579_v31, %v1579_v31  ;;  %9117 = vmatmul.mubr.msk.bf16.gmra.mxu0 %vm642_vm2, %v1727_v26  ;;  %s10587_s24 = scalar_lea.vmem %s10586_s4, 32  ;;  %p10588_p6 = scmp.lt.s32.totalorder %s7810_s14, %s10586_s4 }
 0x214   : > { %v11384_v55 = vadd.f32 %v1384_v21, %v1280_v53  ;;  %9172 = vmatprep.mubr.msk.bf16.mxu0 %vm10685_vm0, %v11323_v7  ;;  %p10589_p10 = scmp.lt.s32.totalorder %s10587_s24, %s10581_s23 }
 0x215   : > { %v1248_v24 = vpop.f32.mrf.mxu0  ;;  %v9021_v19 = vpop.f32.mrf.mxu1  ;;  %9087 = vmatmul.mubr.msk.bf16.gmra.mxu1 %vm642_vm2, %v1586_v2 }
 0x216   : > { %v1281_v58 = vadd.f32 %v1248_v24, %v11339_v37  ;;  %9124 = vmatprep.mubr.msk.bf16.mxu1 %vm10685_vm0, %v11323_v7  ;;  %p10590_p12 = por %p10589_p10, %p10588_p6 }
 0x217   : > { %v8986_v49 = vpop.f32.mrf.mxu0  ;;  %v1405_v54 = vpop.f32.mrf.mxu1 }
 0x218   : > { %v11389_v57 = vadd.f32 %v1389_v30, %v1281_v58  ;;  %p10591_p8 = pnand %p10590_p12, %p10584_p5 }
 0x219   : > { %v1251_v59 = vpop.f32.mrf.mxu0  ;;  %v9024_v61 = vpop.f32.mrf.mxu1 }
 0x21a   : > { %v1282_v62 = vadd.f32 %v1251_v59, %v11342_v45 }
 0x21b   : > { %v8987_v8 = vpop.f32.mrf.mxu0  ;;  %v1407_v63 = vpop.f32.mrf.mxu1 }
 0x21c   : > { %v11394_v22 = vadd.f32 %v1392_v36, %v1282_v62 }
 0x21d   : > { %v1256_v37 = vpop.f32.mrf.mxu0  ;;  %v9025_v5 = vpop.f32.mrf.mxu1 }
 0x21e   : > { %v1283_v44 = vadd.f32 %v1256_v37, %v11345_v50 }
 0x21f   : > { %v8990_v10 = vpop.f32.mrf.mxu0  ;;  %v1411_v45 = vpop.f32.mrf.mxu1 }
 0x220   : > { %v11402_v12 = vadd.f32 %v1397_v42, %v1283_v44 }
 0x221   : > { %v1259_v13 = vpop.f32.mrf.mxu0  ;;  %v9028_v14 = vpop.f32.mrf.mxu1 }
 0x222   : > { %v1284_v16 = vadd.f32 %v1259_v13, %v11348_v56  ;;  %v9428_v56 = vld [vmem:[#allocation9 + $0x30] sm:$0xff]  }
 0x223   : > { %v8991_v18 = vpop.f32.mrf.mxu0  ;;  %v1413_v20 = vpop.f32.mrf.mxu1  ;;  %9171 = vmatpush3.bf16.msra.mxu0 %v9428_v56 }
 0x224   : > { %v11408_v50 = vadd.f32 %v1400_v52, %v1284_v16  ;;  %9200 = vmatprep.subr.bf16.mxu0 %v11323_v7 }
 0x225   : > { %v1264_v21 = vpop.f32.mrf.mxu0  ;;  %v9029_v25 = vpop.f32.mrf.mxu1 }
 0x227   : > { %v8994_v28 = vpop.f32.mrf.mxu0  ;;  %v1647_v30 = vpop.f32.mrf.mxu1 }
 0x229   : > { %v1266_v60 = vpop.f32.mrf.mxu0  ;;  %v9064_v32 = vpop.f32.mrf.mxu1 }
 0x22b   : > { %v8995_v33 = vpop.f32.mrf.mxu0  ;;  %v1650_v34 = vpop.f32.mrf.mxu1 }
 0x22d   : > { %v1270_v4 = vpop.f32.mrf.mxu0  ;;  %v9065_v36 = vpop.f32.mrf.mxu1 }
 0x22f   : > { %v8998_v38 = vpop.f32.mrf.mxu0  ;;  %v1655_v11 = vpop.f32.mrf.mxu1 }
 0x231   : > { %v1272_v39 = vpop.f32.mrf.mxu0  ;;  %v9068_v41 = vpop.f32.mrf.mxu1 }
 0x233   : > { %v8999_v42 = vpop.f32.mrf.mxu0  ;;  %v1658_v43 = vpop.f32.mrf.mxu1 }
 0x235   : > { %v1506_v46 = vpop.f32.mrf.mxu0  ;;  %v9069_v0 = vpop.f32.mrf.mxu1 }
 0x236   : > { %v1557_v17 = vadd.f32 %v1506_v46, %v11365_v15 }
 0x237   : > { %v9034_v48 = vpop.f32.mrf.mxu0  ;;  %v1663_v53 = vpop.f32.mrf.mxu1 }
 0x238   : > { %v1698_v51 = vadd.f32 %v1647_v30, %v1557_v17  ;;  %v11438_v17 = vld [vmem:[#allocation7] ss:$0 sm:$0xff] }
 0x239   : > { %v1509_v52 = vpop.f32.mrf.mxu0  ;;  %v9072_v24 = vpop.f32.mrf.mxu1 }
 0x23a   : > { %v1558_v19 = vadd.f32 %v1509_v52, %v11368_v23 }
 0x23b   : > { %v9035_v58 = vpop.f32.mrf.mxu0  ;;  %v1666_v49 = vpop.f32.mrf.mxu1 }
 0x23c   : > { %v1699_v54 = vadd.f32 %v1650_v34, %v1558_v19 }
 0x23d   : > { %v1514_v31 = vpop.f32.mrf.mxu0  ;;  %v9073_v59 = vpop.f32.mrf.mxu1 }
 0x23e   : > { %v1559_v61 = vadd.f32 %v1514_v31, %v11371_v35 }
 0x23f   : > { %v9038_v2 = vpop.f32.mrf.mxu0  ;;  %v1671_v62 = vpop.f32.mrf.mxu1 }
 0x240   : > { %v1700_v8 = vadd.f32 %v1655_v11, %v1559_v61 }
 0x241   : > { %v1517_v63 = vpop.f32.mrf.mxu0  ;;  %v9076_v1 = vpop.f32.mrf.mxu1 }
 0x242   : > { %v1560_v15 = vadd.f32 %v1517_v63, %v11374_v40 }
 0x243   : > { %v9039_v3 = vpop.f32.mrf.mxu0  ;;  %v1674_v37 = vpop.f32.mrf.mxu1 }
 0x244   : > { %v1701_v5 = vadd.f32 %v1658_v43, %v1560_v15 }
 0x245   : > { %v1522_v6 = vpop.f32.mrf.mxu0  ;;  %v9077_v44 = vpop.f32.mrf.mxu1 }
 0x246   : > { %v1561_v23 = vadd.f32 %v1522_v6, %v11378_v47 }
 0x247   : > { %v9042_v9 = vpop.f32.mrf.mxu0  ;;  %v1679_v10 = vpop.f32.mrf.mxu1 }
 0x248   : > { %v11421_v45 = vadd.f32 %v1663_v53, %v1561_v23 }
 0x249   : > { %v1525_v13 = vpop.f32.mrf.mxu0  ;;  %v9080_v35 = vpop.f32.mrf.mxu1 }
 0x24a   : > { %v1562_v14 = vadd.f32 %v1525_v13, %v11384_v55 }
 0x24b   : > { %v9043_v16 = vpop.f32.mrf.mxu0  ;;  %v1682_v18 = vpop.f32.mrf.mxu1 }
 0x24c   : > { %v11424_v20 = vadd.f32 %v1666_v49, %v1562_v14 }
 0x24d   : > { %v1530_v40 = vpop.f32.mrf.mxu0  ;;  %v9081_v29 = vpop.f32.mrf.mxu1 }
 0x24e   : > { %v1563_v21 = vadd.f32 %v1530_v40, %v11389_v57 }
 0x24f   : > { %v9046_v25 = vpop.f32.mrf.mxu0 }
 0x250   : > { %v11427_v26 = vadd.f32 %v1671_v62, %v1563_v21 }
 0x251   : > { %v1533_v47 = vpop.f32.mrf.mxu0 }
 0x252   : > { %v1564_v27 = vadd.f32 %v1533_v47, %v11394_v22 }
 0x253   : > { %v9047_v28 = vpop.f32.mrf.mxu0 }
 0x254   : > { %v11430_v30 = vadd.f32 %v1674_v37, %v1564_v27 }
 0x255   : > { %v1538_v60 = vpop.f32.mrf.mxu0 }
 0x256   : > { %v1565_v55 = vadd.f32 %v1538_v60, %v11402_v12 }
 0x257   : > { %v9050_v32 = vpop.f32.mrf.mxu0 }
 0x258   : > { %v11433_v56 = vadd.f32 %v1679_v10, %v1565_v55 }
 0x259   : > { %v1541_v33 = vpop.f32.mrf.mxu0 }
 0x25a   : > { %v1566_v34 = vadd.f32 %v1541_v33, %v11408_v50 }
 0x25b   : > { %v9051_v4 = vpop.f32.mrf.mxu0 }
 0x25c   : > { %v11436_v57 = vadd.f32 %v1682_v18, %v1566_v34 }
 0x25d   : > { %v1546_v36 = vpop.f32.mrf.mxu0 }
 0x25f   : > { %v9054_v38 = vpop.f32.mrf.mxu0 }
 0x261   : > { %v1548_v11 = vpop.f32.mrf.mxu0 }
 0x263   : > { %v9055_v39 = vpop.f32.mrf.mxu0 }
 0x265   : > { %v1552_v22 = vpop.f32.mrf.mxu0 }
 0x267   : > { %v9058_v41 = vpop.f32.mrf.mxu0 }
 0x269   : > { %v1554_v42 = vpop.f32.mrf.mxu0 }
 0x26b   : > { %v9059_v43 = vpop.f32.mrf.mxu0 }
 0x26d   : > { %v1788_v46 = vpop.f32.mrf.mxu0 }
 0x26e   : > { %v1839_v12 = vadd.f32 %v1788_v46, %v1698_v51 }
 0x26f   : > { %v9094_v0 = vpop.f32.mrf.mxu0 }
 0x270   : > { %v1856_v50 = vadd.f32 %v11438_v17, %v1839_v12 }
 0x271   : > { %v1791_v48 = vpop.f32.mrf.mxu0 }
 0x272   : > { %v1840_v53 = vadd.f32 %v1791_v48, %v1699_v54  ;;  %v1866_v59 = vmax.f32 %v1856_v50, 0.0 }
 0x273   : > { %v9095_v52 = vpop.f32.mrf.mxu0 }
 0x274   : > { %v1857_v24 = vadd.f32 %v11438_v17, %v1840_v53 }
 0x275   : > { %v1796_v19 = vpop.f32.mrf.mxu0 }
 0x276   : > { %v1867_v58 = vmax.f32 %v1857_v24, 0.0  ;;  %v1841_v49 = vadd.f32 %v1796_v19, %v1700_v8 }
 0x277   : > { %v9098_v31 = vpop.f32.mrf.mxu0 }
 0x278   : > { %v1877_v61 = vrot.slane %v1867_v58, 2  ;;  %v1858_v2 = vadd.f32 %v11438_v17, %v1841_v49 }
 0x279   : > { %v1799_v51 = vpop.f32.mrf.mxu0 }
 0x27a   : > { %v1879_v62 = vmax.f32 %v1866_v59, %v1877_v61  ;;  %v1868_v63 = vmax.f32 %v1858_v2, 0.0  ;;  %v1842_v54 = vadd.f32 %v1799_v51, %v1701_v5 }
 0x27b   : > { %v9099_v1 = vpop.f32.mrf.mxu0 }
 0x27c   : > { %v1881_v15 = vsel %vm1880_vm4, %v1879_v62, -inf  ;;  %v1891_v3 = vsel %vm1890_vm5, %v1879_v62, -inf  ;;  %v1900_v8 = vsel %vm1899_vm6, %v1879_v62, -inf  ;;  %v1909_v37 = vrot.slane %v1868_v63, 2 }
 0x27d   : > { %v1882_v6 = vrot.slane %v1881_v15, 4  ;;  %v1892_v44 = vrot.slane %v1891_v3, 4  ;;  %v1901_v23 = vrot.slane %v1900_v8, 4  ;;  %v1859_v9 = vadd.f32 %v11438_v17, %v1842_v54  ;;  %v1804_v10 = vpop.f32.mrf.mxu0 }
 0x27e   : > { %v1911_v13 = vmax.f32 %v1866_v59, %v1909_v37  ;;  %v1843_v35 = vadd.f32 %v1804_v10, %v11421_v45 }
 0x27f   : > { %v1883_v14 = vmax.f32 %v1881_v15, %v1882_v6  ;;  %v1893_v5 = vmax.f32 %v1891_v3, %v1892_v44  ;;  %v1902_v16 = vmax.f32 %v1900_v8, %v1901_v23  ;;  %v1869_v18 = vmax.f32 %v1859_v9, 0.0  ;;  %v9102_v40 = vpop.f32.mrf.mxu0 }
 0x280   : > { %v1913_v29 = vsel %vm1912_vm7, %v1911_v13, -inf  ;;  %v1860_v21 = vadd.f32 %v11438_v17, %v1843_v35 }
 0x281   : > { %v1884_v25 = vrot.slane %v1883_v14, 2  ;;  %v1894_v47 = vrot.slane %v1893_v5, 2  ;;  %v1903_v27 = vrot.slane %v1902_v16, 2  ;;  %v1914_v28 = vrot.slane %v1913_v29, 4  ;;  %v1807_v60 = vpop.f32.mrf.mxu0 }
 0x282   : > { %v1924_v55 = vrot.slane %v1869_v18, 2  ;;  %v1870_v32 = vmax.f32 %v1860_v21, 0.0  ;;  %v1844_v48 = vadd.f32 %v1807_v60, %v11424_v20 }
 0x283   : > { %v1885_v33 = vmax.f32 %v1883_v14, %v1884_v25  ;;  %v1895_v34 = vmax.f32 %v1893_v5, %v1894_v47  ;;  %v1904_v4 = vmax.f32 %v1902_v16, %v1903_v27  ;;  %v1915_v45 = vmax.f32 %v1913_v29, %v1914_v28  ;;  %v9103_v36 = vpop.f32.mrf.mxu0 }
 0x284   : > { %v1926_v38 = vmax.f32 %v1868_v63, %v1924_v55  ;;  %v1936_v11 = vrot.slane %v1870_v32, 2  ;;  %v1861_v54 = vadd.f32 %v11438_v17, %v1844_v48 }
 0x285   : > { %v1886_v39 = vrot.slane %v1885_v33, 1  ;;  %v1896_v22 = vrot.slane %v1895_v34, 1  ;;  %v1905_v41 = vrot.slane %v1904_v4, 1  ;;  %v1916_v42 = vrot.slane %v1915_v45, 2  ;;  %v1812_v43 = vpop.f32.mrf.mxu0 }
 0x286   : > { %v1927_v46 = vsel %vm1899_vm6, %v1926_v38, -inf  ;;  %v1938_v0 = vmax.f32 %v1868_v63, %v1936_v11  ;;  %v1947_v12 = vmax.f32 %v1869_v18, %v1936_v11  ;;  %v1845_v1 = vadd.f32 %v1812_v43, %v11427_v26 }
 0x287   : > { %v1887_v53 = vmax.f32 %v1885_v33, %v1886_v39  ;;  %v1897_v52 = vmax.f32 %v1895_v34, %v1896_v22  ;;  %v1906_v50 = vmax.f32 %v1904_v4, %v1905_v41  ;;  %v1917_v24 = vmax.f32 %v1915_v45, %v1916_v42  ;;  %v9106_v19 = vpop.f32.mrf.mxu0 }
 0x288   : > { %v1928_v58 = vrot.slane %v1927_v46, 4  ;;  %v1939_v49 = vsel %vm1912_vm7, %v1938_v0, -inf  ;;  %v1948_v31 = vsel %vm1880_vm4, %v1947_v12, -inf  ;;  %v1956_v59 = vsel %vm1890_vm5, %v1947_v12, -inf }
 0x289   : > { %1889 = vst.msk [vmem:[#allocation2 + $0x7] sm:$0x1] %vm1888_vm8, %v1887_v53  ;;  %1898 = vst.msk [vmem:[#allocation2 + $0x8] sm:$0x1] %vm1888_vm8, %v1897_v52  ;;  %v1918_v20 = vrot.slane %v1917_v24, 1  ;;  %v1940_v61 = vrot.slane %v1939_v49, 4  ;;  %v1815_v62 = vpop.f32.mrf.mxu0  ;;  %v1862_v9 = vadd.f32 %v11438_v17, %v1845_v1 }
 0x28a   : > { %1907 = vst.msk [vmem:[#allocation2 + $0x9] sm:$0x1] %vm1888_vm8, %v1906_v50  ;;  %1922 = vst.msk [vmem:[#allocation2 + $0xb] sm:$0x1] %vm1888_vm8, %v1887_v53  ;;  %v1949_v2 = vrot.slane %v1948_v31, 4  ;;  %v1957_v51 = vrot.slane %v1956_v59, 4  ;;  %v1929_v63 = vmax.f32 %v1927_v46, %v1928_v58  ;;  %v1846_v15 = vadd.f32 %v1815_v62, %v11430_v30 }
 0x28b   : > { %v1919_v3 = vmax.f32 %v1917_v24, %v1918_v20  ;;  %v1941_v8 = vmax.f32 %v1939_v49, %v1940_v61  ;;  %v9107_v44 = vpop.f32.mrf.mxu0  ;;  %v1872_v30 = vmax.f32 %v1862_v9, 0.0  ;;  %v1871_v25 = vmax.f32 %v1861_v54, 0.0 }
 0x28c   : > { %v1950_v37 = vmax.f32 %v1948_v31, %v1949_v2  ;;  %v1958_v6 = vmax.f32 %v1956_v59, %v1957_v51  ;;  %v1930_v23 = vrot.slane %v1929_v63, 2  ;;  %v1863_v10 = vadd.f32 %v11438_v17, %v1846_v15 }
 0x28d   : > { %1920 = vst.msk [vmem:[#allocation2 + $0xa] sm:$0x1] %vm1888_vm8, %v1919_v3  ;;  %1921 = vst.msk [vmem:[#allocation2 + $0x6] sm:$0x1] %vm1888_vm8, %v1919_v3  ;;  %v1942_v13 = vrot.slane %v1941_v8, 2  ;;  %v1820_v26 = vpop.f32.mrf.mxu0  ;;  %v1967_v28 = vrot.slane %v1872_v30, 2 }
 0x28e   : > { %v1951_v35 = vrot.slane %v1950_v37, 2  ;;  %v1959_v14 = vrot.slane %v1958_v6, 2  ;;  %v1931_v5 = vmax.f32 %v1929_v63, %v1930_v23  ;;  %v11466_v16 = vmax.f32 %v1863_v10, 0.0 }
 0x28f   : > { %v1847_v18 = vadd.f32 %v1820_v26, %v11433_v56  ;;  %v1943_v40 = vmax.f32 %v1941_v8, %v1942_v13  ;;  %v9110_v47 = vpop.f32.mrf.mxu0  ;;  %v1969_v36 = vmax.f32 %v1871_v25, %v1967_v28  ;;  %v9429_v28 = vld [vmem:[#allocation9 + $0x8] sm:$0xff]  }
 0x290   : > { %v1952_v29 = vmax.f32 %v1950_v37, %v1951_v35  ;;  %v1960_v21 = vmax.f32 %v1958_v6, %v1959_v14  ;;  %v1932_v27 = vrot.slane %v1931_v5, 1  ;;  %v1995_v60 = vrot.slane %v11466_v16, 2 }
 0x291   : > { %v1864_v55 = vadd.f32 %v11438_v17, %v1847_v18  ;;  %v1944_v32 = vrot.slane %v1943_v40, 1  ;;  %v1823_v4 = vpop.f32.mrf.mxu0  ;;  %v1970_v43 = vsel %vm1880_vm4, %v1969_v36, -inf  ;;  %v1978_v46 = vsel %vm1890_vm5, %v1969_v36, -inf }
 0x292   : > { %v1953_v33 = vrot.slane %v1952_v29, 1  ;;  %v1961_v34 = vrot.slane %v1960_v21, 1  ;;  %v1933_v45 = vmax.f32 %v1931_v5, %v1932_v27  ;;  %v1997_v38 = vmax.f32 %v1871_v25, %v1995_v60 }
 0x293   : > { %v1874_v11 = vmax.f32 %v1864_v55, 0.0  ;;  %v1945_v56 = vmax.f32 %v1943_v40, %v1944_v32  ;;  %v1848_v41 = vadd.f32 %v1823_v4, %v11436_v57  ;;  %v9111_v42 = vpop.f32.mrf.mxu0  ;;  %v1986_v0 = vsel %vm1899_vm6, %v1969_v36, -inf }
 0x294   : > { %v1954_v39 = vmax.f32 %v1952_v29, %v1953_v33  ;;  %v1962_v22 = vmax.f32 %v1960_v21, %v1961_v34  ;;  %1934 = vst.msk [vmem:[#allocation2 + $0xd] sm:$0x1] %vm1888_vm8, %v1933_v45  ;;  %1965 = vst.msk [vmem:[#allocation2 + $0x11] sm:$0x1] %vm1888_vm8, %v1933_v45  ;;  %v1998_v12 = vsel %vm1912_vm7, %v1997_v38, -inf  ;;  %v1971_v57 = vrot.slane %v1970_v43, 4 }
 0x295   : > { %1946 = vst.msk [vmem:[#allocation2 + $0xe] sm:$0x1] %vm1888_vm8, %v1945_v56  ;;  %v1979_v48 = vrot.slane %v1978_v46, 4  ;;  %v1987_v53 = vrot.slane %v1986_v0, 4  ;;  %v1999_v52 = vrot.slane %v1998_v12, 4  ;;  %v2009_v50 = vrot.slane %v1874_v11, 2 }
 0x296   : > { %1955 = vst.msk [vmem:[#allocation2 + $0xf] sm:$0x1] %vm1888_vm8, %v1954_v39  ;;  %1963 = vst.msk [vmem:[#allocation2 + $0x10] sm:$0x1] %vm1888_vm8, %v1962_v22  ;;  %v1865_v24 = vadd.f32 %v11438_v17, %v1848_v41  ;;  %v1972_v19 = vmax.f32 %v1970_v43, %v1971_v57  ;;  %v2063_v27 = vld [vmem:[#allocation2 + $0x1] sm:$0xff] }
 0x297   : > { %1964 = vst.msk [vmem:[#allocation2 + $0xc] sm:$0x1] %vm1888_vm8, %v1962_v22  ;;  %v1980_v58 = vmax.f32 %v1978_v46, %v1979_v48  ;;  %v1988_v49 = vmax.f32 %v1986_v0, %v1987_v53  ;;  %v2000_v31 = vmax.f32 %v1998_v12, %v1999_v52  ;;  %v2011_v59 = vmax.f32 %v11466_v16, %v2009_v50  ;;  %v9431_v57 = vld [vmem:[#allocation9 + $0x58] sm:$0xff]  }
 0x298   : > { %v1875_v20 = vmax.f32 %v1865_v24, 0.0  ;;  %v1973_v61 = vrot.slane %v1972_v19, 2  ;;  %v9432_v24 = vld [vmem:[#allocation9 + $0x50] sm:$0xff]  }
 0x299   : > { %v1981_v2 = vrot.slane %v1980_v58, 2  ;;  %v1989_v51 = vrot.slane %v1988_v49, 2  ;;  %v2001_v62 = vrot.slane %v2000_v31, 2  ;;  %v2012_v63 = vsel %vm1899_vm6, %v2011_v59, -inf }
 0x29a   : > { %v2021_v54 = vrot.slane %v1875_v20, 2  ;;  %v1974_v1 = vmax.f32 %v1972_v19, %v1973_v61  ;;  %v2013_v37 = vrot.slane %v2012_v63, 4  ;;  %v11513_v19 = vld [vmem:[#allocation2 + $0x1e] sm:$0xff] }
 0x29b   : > { %v1982_v15 = vmax.f32 %v1980_v58, %v1981_v2  ;;  %v1990_v3 = vmax.f32 %v1988_v49, %v1989_v51  ;;  %v2002_v8 = vmax.f32 %v2000_v31, %v2001_v62  ;;  %v2067_v2 = vld [vmem:[#allocation2 + $0x21] sm:$0xff] }
 0x29c   : > { %v2023_v17 = vmax.f32 %v11466_v16, %v2021_v54  ;;  %v2032_v6 = vmax.f32 %v1874_v11, %v2021_v54  ;;  %v1975_v44 = vrot.slane %v1974_v1, 1  ;;  %v2014_v13 = vmax.f32 %v2012_v63, %v2013_v37  ;;  %v9430_v11 = vld [vmem:[#allocation9] sm:$0xff]  }
 0x29d   : > { %v1983_v23 = vrot.slane %v1982_v15, 1  ;;  %v1991_v9 = vrot.slane %v1990_v3, 1  ;;  %v2003_v10 = vrot.slane %v2002_v8, 1  ;;  %v11528_v51 = vld [vmem:[#allocation2 + $0x26] sm:$0xff]  ;;  %v2070_v62 = vpack.c.bf16 %v2067_v2, %v2067_v2 }
 0x29e   : > { %v2024_v35 = vsel %vm1912_vm7, %v2023_v17, -inf  ;;  %v2033_v14 = vsel %vm1880_vm4, %v2032_v6, -inf  ;;  %v2041_v26 = vsel %vm1890_vm5, %v2032_v6, -inf  ;;  %v2064_v5 = vld [vmem:[#allocation2 + $0x9] sm:$0xff]  ;;  %v1976_v30 = vmax.f32 %v1974_v1, %v1975_v44 }
 0x29f   : > { %v1984_v18 = vmax.f32 %v1982_v15, %v1983_v23  ;;  %v1992_v40 = vmax.f32 %v1990_v3, %v1991_v9  ;;  %v2004_v29 = vmax.f32 %v2002_v8, %v2003_v10  ;;  %v2015_v21 = vrot.slane %v2014_v13, 2  ;;  %v2317_v0 = vld [vmem:[#allocation2 + $0x6] sm:$0xff]  ;;  %v9433_v3 = vld [vmem:[#allocation9 + $0x28] sm:$0xff]   ;;  %v9436_v9 = vld [vmem:[#allocation9 + $0x70] sm:$0xff]  }
 0x2a0   : > { %v2025_v25 = vrot.slane %v2024_v35, 4  ;;  %v2034_v16 = vrot.slane %v2033_v14, 4  ;;  %v2042_v47 = vrot.slane %v2041_v26, 4  ;;  %1977 = vst.msk [vmem:[#allocation2 + $0x13] sm:$0x1] %vm1888_vm8, %v1976_v30  ;;  %v2068_v60 = vpack.c.bf16 %v2064_v5, %v2063_v27  ;;  %v2052_v54 = vld [vmem:[#allocation2 + $0x8] sm:$0xff] }
 0x2a1   : > { %1985 = vst.msk [vmem:[#allocation2 + $0x14] sm:$0x1] %vm1888_vm8, %v1984_v18  ;;  %1993 = vst.msk [vmem:[#allocation2 + $0x15] sm:$0x1] %vm1888_vm8, %v1992_v40  ;;  %v2016_v55 = vmax.f32 %v2014_v13, %v2015_v21  ;;  %v2324_v63 = vpack.c.bf16 %v11528_v51, %v11528_v51  ;;  %v2051_v15 = vld [vmem:[#allocation2] sm:$0xff]  ;;  %v9434_v6 = vld [vmem:[#allocation9 + $0x20] sm:$0xff]  }
 0x2a2   : > { %2007 = vst.msk [vmem:[#allocation2 + $0x17] sm:$0x1] %vm1888_vm8, %v1976_v30  ;;  %2005 = vst.msk [vmem:[#allocation2 + $0x16] sm:$0x1] %vm1888_vm8, %v2004_v29  ;;  %v2026_v32 = vmax.f32 %v2024_v35, %v2025_v25  ;;  %v2035_v33 = vmax.f32 %v2033_v14, %v2034_v16  ;;  %v2043_v34 = vmax.f32 %v2041_v26, %v2042_v47  ;;  %9125 = vmatmul.mubr.msk.bf16.vlgmr.msra.gmra.mxu1 %vm587_vm3, %v2068_v60  ;;  %v9435_v17 = vld [vmem:[#allocation9 + $0x78] sm:$0xff]   ;;  %v11549_v35 = vld [vmem:[#allocation3] sm:$0xff] }
 0x2a3   : > { %2006 = vst.msk [vmem:[#allocation2 + $0x12] sm:$0x1] %vm1888_vm8, %v2004_v29  ;;  %v2017_v4 = vrot.slane %v2016_v55, 1  ;;  %9137 = vmatpush3.bf16.msra.mxu1 %v9429_v28  ;;  %9128 = vmatprep.mubr.msk.bf16.mxu1 %vm10685_vm0, %v11323_v7  ;;  %v2056_v8 = vpack.c.bf16 %v2052_v54, %v2051_v15  ;;  %v2502_v23 = vld [vmem:[#allocation2 + $0x20] sm:$0xff]  ;;  %v2503_v14 = vld [vmem:[#allocation2 + $0x28] sm:$0xff]  ;;  %v9437_v47 = vld [vmem:[#allocation9 + $0x48] sm:$0xff]  }
 0x2a4   : > { %v2027_v45 = vrot.slane %v2026_v32, 2  ;;  %v2036_v36 = vrot.slane %v2035_v33, 2  ;;  %v2044_v38 = vrot.slane %v2043_v34, 2  ;;  %9138 = vmatprep.subr.bf16.mxu1 %v11323_v7  ;;  %v2058_v26 = vpack.c.bf16 %v2502_v23, %v2502_v23  ;;  %v2227_v40 = vld [vmem:[#allocation2 + $0xa] sm:$0xff]  ;;  %v2226_v25 = vld [vmem:[#allocation2 + $0x2] sm:$0xff]  ;;  %v9441_v15 = vld [vmem:[#allocation9 + $0x88] sm:$0xff]  }
 0x2a5   : > { %v2018_v56 = vmax.f32 %v2016_v55, %v2017_v4  ;;  %v2506_v5 = vpack.c.bf16 %v2503_v14, %v2503_v14  ;;  %v2231_v28 = vpack.c.bf16 %v2227_v40, %v2226_v25  ;;  %v2684_v4 = vld [vmem:[#allocation2 + $0x25] sm:$0xff]  ;;  %v9449_v40 = vld [vmem:[#allocation12 + $0x1c0] ss:$16 sps:$4 sm:$0xff]  }
 0x2a6   : > { %v2028_v39 = vmax.f32 %v2026_v32, %v2027_v45  ;;  %v2037_v22 = vmax.f32 %v2035_v33, %v2036_v36  ;;  %v2045_v41 = vmax.f32 %v2043_v34, %v2044_v38  ;;  %v9438_v32 = vld [vmem:[#allocation9 + $0x40] sm:$0xff]  }
 0x2a7   : > { %2019 = vst.msk [vmem:[#allocation2 + $0x19] sm:$0x1] %vm1888_vm8, %v2018_v56  ;;  %2050 = vst.msk [vmem:[#allocation2 + $0x1d] sm:$0x1] %vm1888_vm8, %v2018_v56  ;;  %9139 = vmatpush3.bf16.msra.mxu1 %v9430_v11 }
 0x2a8   : > { %v2029_v42 = vrot.slane %v2028_v39, 1  ;;  %v2038_v43 = vrot.slane %v2037_v22, 1  ;;  %v2046_v46 = vrot.slane %v2045_v41, 1  ;;  %9152 = vmatprep.subr.bf16.mxu1 %v11323_v7 }
 0x2aa   : > { %v11501_v12 = vld [vmem:[#allocation2 + $0xe] sm:$0xff]  ;;  %v2030_v53 = vmax.f32 %v2028_v39, %v2029_v42  ;;  %v2039_v52 = vmax.f32 %v2037_v22, %v2038_v43  ;;  %v2047_v50 = vmax.f32 %v2045_v41, %v2046_v46  ;;  %v2230_v43 = vld [vmem:[#allocation2 + $0x22] sm:$0xff] }
 0x2ab   : > { %v2322_v48 = vpack.c.bf16 %v11501_v12, %v2317_v0  ;;  %v2500_v1 = vld [vmem:[#allocation2 + $0x10] sm:$0xff]  ;;  %v1687_v30 = vpop.f32.mrf.mxu1 }
 0x2ac   : > { %2031 = vst.msk [vmem:[#allocation2 + $0x1a] sm:$0x1] %vm1888_vm8, %v2030_v53  ;;  %2040 = vst.msk [vmem:[#allocation2 + $0x1b] sm:$0x1] %vm1888_vm8, %v2039_v52  ;;  %v2504_v37 = vpack.c.bf16 %v2500_v1, %v2052_v54  ;;  %v2681_v16 = vld [vmem:[#allocation2 + $0xd] sm:$0xff] }
 0x2ad   : > { %9173 = vmatmul.mubr.msk.bf16.vlgmr.msra.gmra.mxu0 %vm587_vm3, %v2322_v48  ;;  %2048 = vst.msk [vmem:[#allocation2 + $0x1c] sm:$0x1] %vm1888_vm8, %v2047_v50  ;;  %2049 = vst.msk [vmem:[#allocation2 + $0x18] sm:$0x1] %vm1888_vm8, %v2047_v50  ;;  %v9084_v18 = vpop.f32.mrf.mxu1  ;;  %v2409_v52 = vld [vmem:[#allocation2 + $0xf] sm:$0xff]  ;;  %v2408_v50 = vld [vmem:[#allocation2 + $0x7] sm:$0xff] }
 0x2ae   : > { %9176 = vmatprep.mubr.msk.bf16.mxu0 %vm10685_vm0, %v11323_v7  ;;  %9201 = vmatpush3.bf16.msra.mxu0 %v9431_v57  ;;  %v2683_v38 = vld [vmem:[#allocation2 + $0x1d] sm:$0xff]  ;;  %v2233_v57 = vpack.c.bf16 %v2230_v43, %v2230_v43 }
 0x2af   : > { %9202 = vmatprep.subr.bf16.mxu0 %v11323_v7  ;;  %v2687_v41 = vpack.c.bf16 %v2684_v4, %v2683_v38  ;;  %v9448_v30 = vld [vmem:[#allocation12 + $0x1ec] ss:$16 sps:$4 sm:$0xff]   ;;  %v9461_v38 = vld [vmem:[#allocation12 + $0x180] ss:$16 sps:$4 sm:$0xff]  }
 0x2b0   : > { %v9472_v43 = vld [vmem:[#allocation12 + $0x16c] ss:$16 sps:$4 sm:$0xff]  }
 0x2b2   : > { %9203 = vmatpush3.bf16.msra.mxu0 %v9432_v24  ;;  %v9439_v24 = vld [vmem:[#allocation9 + $0x68] sm:$0xff]  }
 0x2b3   : > { %9232 = vmatprep.subr.bf16.mxu0 %v11323_v7 }
 0x2b4   : > { %v2065_v58 = vld [vmem:[#allocation2 + $0x11] sm:$0xff]  ;;  %v2066_v49 = vld [vmem:[#allocation2 + $0x19] sm:$0xff] }
 0x2b5   : > { %v11516_v31 = vld [vmem:[#allocation2 + $0x16] sm:$0xff]  ;;  %v2069_v59 = vpack.c.bf16 %v2066_v49, %v2065_v58  ;;  %v2413_v58 = vpack.c.bf16 %v2409_v52, %v2408_v50  ;;  %v9440_v49 = vld [vmem:[#allocation9 + $0x60] sm:$0xff]  }
 0x2b6   : > { %v2323_v20 = vpack.c.bf16 %v11513_v19, %v11516_v31  ;;  %v2777_v61 = vpack.c.bf16 %v11516_v31, %v11501_v12  ;;  %v2054_v44 = vld [vmem:[#allocation2 + $0x18] sm:$0xff] }
 0x2b7   : > { %9129 = vmatmul.mubr.msk.bf16.gmra.mxu1 %vm587_vm3, %v2069_v59  ;;  %v2057_v10 = vpack.c.bf16 %v2054_v44, %v2500_v1  ;;  %v2505_v13 = vpack.c.bf16 %v2502_v23, %v2054_v44  ;;  %v2682_v29 = vld [vmem:[#allocation2 + $0x15] sm:$0xff]  ;;  %v2590_v1 = vld [vmem:[#allocation2 + $0xc] sm:$0xff] }
 0x2b8   : > { %9177 = vmatmul.mubr.msk.bf16.gmra.mxu0 %vm587_vm3, %v2323_v20  ;;  %9132 = vmatprep.mubr.msk.bf16.mxu1 %vm10685_vm0, %v11323_v7  ;;  %v2686_v60 = vpack.c.bf16 %v2682_v29, %v2681_v16  ;;  %v2228_v45 = vld [vmem:[#allocation2 + $0x12] sm:$0xff]  ;;  %v2229_v36 = vld [vmem:[#allocation2 + $0x1a] sm:$0xff] }
 0x2b9   : > { %9180 = vmatprep.mubr.msk.bf16.mxu0 %vm10685_vm0, %v11323_v7  ;;  %v2232_v22 = vpack.c.bf16 %v2229_v36, %v2228_v45  ;;  %v2410_v59 = vld [vmem:[#allocation2 + $0x17] sm:$0xff]  ;;  %v2411_v20 = vld [vmem:[#allocation2 + $0x1f] sm:$0xff]  ;;  %v2594_v44 = vld [vmem:[#allocation2 + $0x2c] sm:$0xff] }
 0x2ba   : > { %v2414_v2 = vpack.c.bf16 %v2411_v20, %v2410_v59  ;;  %v2591_v54 = vld [vmem:[#allocation2 + $0x14] sm:$0xff]  ;;  %v2597_v23 = vpack.c.bf16 %v2594_v44, %v2594_v44  ;;  %v9473_v20 = vld [vmem:[#allocation12 + $0x140] ss:$16 sps:$4 sm:$0xff]  }
 0x2bb   : > { %v9452_v29 = vld [vmem:[#allocation12 + $0x1c8] ss:$16 sps:$4 sm:$0xff]   ;;  %v9463_v45 = vld [vmem:[#allocation12 + $0x184] ss:$16 sps:$4 sm:$0xff]   ;;  %v9466_v36 = vld [vmem:[#allocation12 + $0x18c] ss:$16 sps:$4 sm:$0xff]  }
 0x2bc   : > { %v2776_v59 = vld [vmem:[#allocation2 + $0x2e] sm:$0xff] }
 0x2bd   : > { %v9487_v44 = vld [vmem:[#allocation12 + $0x104] ss:$16 sps:$4 sm:$0xff]  }
 0x2bf   : > { %9133 = vmatmul.mubr.msk.bf16.gmra.mxu1 %vm587_vm3, %v2070_v62  ;;  %v2412_v62 = vld [vmem:[#allocation2 + $0x27] sm:$0xff] }
 0x2c0   : > { %9181 = vmatmul.mubr.msk.bf16.gmra.mxu0 %vm587_vm3, %v2324_v63  ;;  %9140 = vmatprep.mubr.msk.bf16.mxu1 %vm10685_vm0, %v11323_v7  ;;  %v2415_v63 = vpack.c.bf16 %v2412_v62, %v2412_v62  ;;  %v2779_v62 = vpack.c.bf16 %v2776_v59, %v2776_v59 }
 0x2c1   : > { %9204 = vmatprep.mubr.msk.bf16.mxu0 %vm10685_vm0, %v11323_v7 }
 0x2c7   : > { %9141 = vmatmul.mubr.msk.bf16.vlgmr.msra.gmra.mxu1 %vm587_vm3, %v2056_v8  ;;  %v9442_v8 = vld [vmem:[#allocation9 + $0x80] sm:$0xff]  }
 0x2c8   : > { %9205 = vmatmul.mubr.msk.bf16.vlgmr.msra.gmra.mxu0 %vm587_vm3, %v2504_v37  ;;  %9153 = vmatpush3.bf16.msra.mxu1 %v9433_v3  ;;  %v2595_v3 = vpack.c.bf16 %v2591_v54, %v2590_v1  ;;  %v2592_v37 = vld [vmem:[#allocation2 + $0x1c] sm:$0xff] }
 0x2c9   : > { %9144 = vmatprep.mubr.msk.bf16.mxu1 %vm10685_vm0, %v11323_v7  ;;  %9208 = vmatprep.mubr.msk.bf16.mxu0 %vm10685_vm0, %v11323_v7  ;;  %v9481_v1 = vld [vmem:[#allocation12 + $0x124] ss:$16 sps:$4 sm:$0xff]  }
 0x2ca   : > { %9154 = vmatprep.subr.bf16.mxu1 %v11323_v7  ;;  %9233 = vmatpush3.bf16.msra.mxu0 %v9435_v17  ;;  %v2593_v17 = vld [vmem:[#allocation2 + $0x24] sm:$0xff] }
 0x2cb   : > { %9234 = vmatprep.subr.bf16.mxu0 %v11323_v7  ;;  %v1828_v34 = vpop.f32.mrf.mxu0 }
 0x2cc   : > { %9155 = vmatpush3.bf16.msra.mxu1 %v9434_v6  ;;  %v2596_v6 = vpack.c.bf16 %v2593_v17, %v2592_v37  ;;  %v9484_v37 = vld [vmem:[#allocation12 + $0x12c] ss:$16 sps:$4 sm:$0xff]  }
 0x2cd   : > { %9184 = vmatprep.subr.bf16.mxu1 %v11323_v7  ;;  %v1689_v7 = vpop.f32.mrf.mxu1  ;;  %v9114_v56 = vpop.f32.mrf.mxu0 }
 0x2ce   : > { %9235 = vmatpush3.bf16.msra.mxu0 %v9436_v9  ;;  %v2778_v9 = vpack.c.bf16 %v11528_v51, %v11513_v19  ;;  %v9443_v19 = vld [vmem:[#allocation12 + $0x1e0] ss:$16 sps:$4 sm:$0xff]   ;;  %v9446_v51 = vld [vmem:[#allocation12 + $0x1e8] ss:$16 sps:$4 sm:$0xff]   ;;  %v9454_v7 = vld [vmem:[#allocation12 + $0x1cc] ss:$16 sps:$4 sm:$0xff]  }
 0x2cf   : > { %9145 = vmatmul.mubr.msk.bf16.gmra.mxu1 %vm587_vm3, %v2057_v10  ;;  %v9085_v21 = vpop.f32.mrf.mxu1  ;;  %v1830_v39 = vpop.f32.mrf.mxu0 }
 0x2d0   : > { %9209 = vmatmul.mubr.msk.bf16.gmra.mxu0 %vm587_vm3, %v2505_v13  ;;  %9148 = vmatprep.mubr.msk.bf16.mxu1 %vm10685_vm0, %v11549_v35 }
 0x2d1   : > { %9212 = vmatprep.mubr.msk.bf16.mxu0 %vm10685_vm0, %v11549_v35  ;;  %v9115_v42 = vpop.f32.mrf.mxu0 }
 0x2d2   : > { %v9469_v42 = vld [vmem:[#allocation12 + $0x164] ss:$16 sps:$4 sm:$0xff]  }
 0x2d3   : > { %v1834_v46 = vpop.f32.mrf.mxu0 }
 0x2d4   : > { %v9467_v46 = vld [vmem:[#allocation12 + $0x160] ss:$16 sps:$4 sm:$0xff]  }
 0x2d5   : > { %v1693_v27 = vpop.f32.mrf.mxu1  ;;  %v9118_v0 = vpop.f32.mrf.mxu0 }
 0x2d6   : > { %v9457_v27 = vld [vmem:[#allocation12 + $0x1a4] ss:$16 sps:$4 sm:$0xff]   ;;  %v9470_v0 = vld [vmem:[#allocation12 + $0x168] ss:$16 sps:$4 sm:$0xff]  }
 0x2d7   : > { %9149 = vmatmul.mubr.msk.bf16.gmra.mxu1 %vm587_vm3, %v2058_v26  ;;  %v9088_v55 = vpop.f32.mrf.mxu1  ;;  %v1836_v48 = vpop.f32.mrf.mxu0 }
 0x2d8   : > { %9213 = vmatmul.mubr.msk.bf16.gmra.mxu0 %vm587_vm3, %v2506_v5  ;;  %9156 = vmatprep.mubr.msk.bf16.mxu1 %vm10685_vm0, %v11549_v35  ;;  %v9445_v5 = vld [vmem:[#allocation12 + $0x1e4] ss:$16 sps:$4 sm:$0xff]   ;;  %v9458_v55 = vld [vmem:[#allocation12 + $0x1a8] ss:$16 sps:$4 sm:$0xff]  }
 0x2d9   : > { %9236 = vmatprep.mubr.msk.bf16.mxu0 %vm10685_vm0, %v11549_v35  ;;  %v1695_v33 = vpop.f32.mrf.mxu1  ;;  %v9119_v53 = vpop.f32.mrf.mxu0  ;;  %3158 = vmatprep.subr.bf16.mxu0 %v9445_v5  ;;  %v9488_v5 = vld [vmem:[#allocation12 + $0x108] ss:$16 sps:$4 sm:$0xff]  }
 0x2da   : > { %v2685_v53 = vld [vmem:[#allocation2 + $0x2d] sm:$0xff] }
 0x2db   : > { %v9089_v11 = vpop.f32.mrf.mxu1  ;;  %v2688_v52 = vpack.c.bf16 %v2685_v53, %v2685_v53 }
 0x2dc   : > { %v9464_v11 = vld [vmem:[#allocation12 + $0x188] ss:$16 sps:$4 sm:$0xff]  }
 0x2df   : > { %9157 = vmatmul.mubr.msk.bf16.vlgmr.msra.gmra.mxu1 %vm587_vm3, %v2231_v28  ;;  %v9460_v28 = vld [vmem:[#allocation12 + $0x1ac] ss:$16 sps:$4 sm:$0xff]  }
 0x2e0   : > { %9237 = vmatmul.mubr.msk.bf16.vlgmr.msra.gmra.mxu0 %vm587_vm3, %v2686_v60  ;;  %9185 = vmatpush3.bf16.msra.mxu1 %v9437_v47  ;;  %v9455_v60 = vld [vmem:[#allocation12 + $0x1a0] ss:$16 sps:$4 sm:$0xff]  }
 0x2e1   : > { %9160 = vmatprep.mubr.msk.bf16.mxu1 %vm10685_vm0, %v11549_v35  ;;  %9240 = vmatprep.mubr.msk.bf16.mxu0 %vm10685_vm0, %v11549_v35 }
 0x2e2   : > { %9186 = vmatprep.subr.bf16.mxu1 %v11549_v35  ;;  %3159 = vmatpush1.bf16.msra.mxu0 %v9443_v19  ;;  %v9493_v19 = vld [vmem:[#allocation12 + $0xe4] ss:$16 sps:$4 sm:$0xff]  }
 0x2e4   : > { %9187 = vmatpush3.bf16.msra.mxu1 %v9438_v32 }
 0x2e5   : > { %9216 = vmatprep.subr.bf16.mxu1 %v11549_v35 }
 0x2e7   : > { %9161 = vmatmul.mubr.msk.bf16.gmra.mxu1 %vm587_vm3, %v2232_v22 }
 0x2e8   : > { %9241 = vmatmul.mubr.msk.bf16.gmra.mxu0 %vm587_vm3, %v2687_v41  ;;  %9164 = vmatprep.mubr.msk.bf16.mxu1 %vm10685_vm0, %v11549_v35 }
 0x2e9   : > { %9244 = vmatprep.mubr.msk.bf16.mxu0 %vm10685_vm0, %v11549_v35 }
 0x2ef   : > { %9165 = vmatmul.mubr.msk.bf16.gmra.mxu1 %vm587_vm3, %v2233_v57 }
 0x2f0   : > { %9188 = vmatprep.mubr.msk.bf16.mxu1 %vm10685_vm0, %v11549_v35  ;;  %9245 = vmatmul.mubr.msk.bf16.gmra.mxu0 %vm587_vm3, %v2688_v52 }
 0x2f7   : > { %9189 = vmatmul.mubr.msk.bf16.vlgmr.msra.gmra.mxu1 %vm587_vm3, %v2413_v58  ;;  %v9475_v58 = vld [vmem:[#allocation12 + $0x144] ss:$16 sps:$4 sm:$0xff]  }
 0x2f8   : > { %9217 = vmatpush3.bf16.msra.mxu1 %v9439_v24  ;;  %9192 = vmatprep.mubr.msk.bf16.mxu1 %vm10685_vm0, %v11549_v35 }
 0x2f9   : > { %9218 = vmatprep.subr.bf16.mxu1 %v11549_v35 }
 0x2fc   : > { %9219 = vmatpush3.bf16.msra.mxu1 %v9440_v49  ;;  %v9478_v49 = vld [vmem:[#allocation12 + $0x14c] ss:$16 sps:$4 sm:$0xff]  }
 0x2fd   : > { %9248 = vmatprep.subr.bf16.mxu1 %v11549_v35 }
 0x2ff   : > { %9193 = vmatmul.mubr.msk.bf16.gmra.mxu1 %vm587_vm3, %v2414_v2  ;;  %v9476_v2 = vld [vmem:[#allocation12 + $0x148] ss:$16 sps:$4 sm:$0xff]  }
 0x300   : > { %9196 = vmatprep.mubr.msk.bf16.mxu1 %vm10685_vm0, %v11549_v35 }
 0x307   : > { %9197 = vmatmul.mubr.msk.bf16.gmra.mxu1 %vm587_vm3, %v2415_v63 }
 0x308   : > { %9220 = vmatprep.mubr.msk.bf16.mxu1 %vm10685_vm0, %v11549_v35 }
 0x30f   : > { %9221 = vmatmul.mubr.msk.bf16.vlgmr.msra.gmra.mxu1 %vm587_vm3, %v2595_v3  ;;  %v9479_v3 = vld [vmem:[#allocation12 + $0x120] ss:$16 sps:$4 sm:$0xff]  }
 0x310   : > { %9249 = vmatpush3.bf16.msra.mxu1 %v9441_v15  ;;  %9224 = vmatprep.mubr.msk.bf16.mxu1 %vm10685_vm0, %v11549_v35 }
 0x311   : > { %9250 = vmatprep.subr.bf16.mxu1 %v11549_v35 }
 0x314   : > { %9251 = vmatpush3.bf16.msra.mxu1 %v9442_v8  ;;  %v9482_v8 = vld [vmem:[#allocation12 + $0x128] ss:$16 sps:$4 sm:$0xff]  }
 0x315   : > { %3199 = vmatprep.subr.bf16.mxu1 %v9448_v30 }
 0x317   : > { %9225 = vmatmul.mubr.msk.bf16.gmra.mxu1 %vm587_vm3, %v2596_v6 }
 0x318   : > { %9228 = vmatprep.mubr.msk.bf16.mxu1 %vm10685_vm0, %v11549_v35 }
 0x31f   : > { %9229 = vmatmul.mubr.msk.bf16.gmra.mxu1 %vm587_vm3, %v2597_v23  ;;  %v9490_v23 = vld [vmem:[#allocation12 + $0x10c] ss:$16 sps:$4 sm:$0xff]  }
 0x320   : > { %9252 = vmatprep.mubr.msk.bf16.mxu1 %vm10685_vm0, %v11549_v35 }
 0x327   : > { %9253 = vmatmul.mubr.msk.bf16.vlgmr.msra.gmra.mxu1 %vm587_vm3, %v2777_v61 }
 0x328   : > { %9256 = vmatprep.mubr.msk.bf16.mxu1 %vm10685_vm0, %v11549_v35  ;;  %3200 = vmatpush1.bf16.msra.mxu1 %v9446_v51  ;;  %v9496_v51 = vld [vmem:[#allocation12 + $0xec] ss:$16 sps:$4 sm:$0xff]  }
 0x329   : > { %3201 = vmatprep.subr.bf16.mxu1 %v9454_v7 }
 0x32c   : > { %3202 = vmatpush1.bf16.msra.mxu1 %v9452_v29 }
 0x32d   : > { %3203 = vmatprep.subr.bf16.mxu1 %v9460_v28 }
 0x32f   : > { %9257 = vmatmul.mubr.msk.bf16.gmra.mxu1 %vm587_vm3, %v2778_v9  ;;  %v10686_v9 = vmov 0  }
 0x330   : > { %9260 = vmatprep.mubr.msk.bf16.mxu1 %vm10685_vm0, %v11549_v35  ;;  %v9451_v35 = vld [vmem:[#allocation12 + $0x1c4] ss:$16 sps:$4 sm:$0xff]   ;;  %3204 = vmatpush1.bf16.msra.mxu1 %v9458_v55 }
 0x331   : > { %3160 = vmatprep.subr.bf16.mxu0 %v9451_v35  ;;  %3205 = vmatprep.subr.bf16.mxu1 %v9466_v36 }
 0x332   : > { %3161 = vmatpush1.bf16.msra.mxu0 %v9449_v40  ;;  %3190 = vmatprep.mubr.bf16.mxu0 %v10686_v9 }
 0x333   : > { %3162 = vmatprep.subr.bf16.mxu0 %v9457_v27 }
 0x334   : > { %3206 = vmatpush1.bf16.msra.mxu1 %v9464_v11 }
 0x335   : > { %3207 = vmatprep.subr.bf16.mxu1 %v9472_v43 }
 0x336   : > { %3163 = vmatpush1.bf16.msra.mxu0 %v9455_v60 }
 0x337   : > { %3164 = vmatprep.subr.bf16.mxu0 %v9463_v45  ;;  %9261 = vmatmul.mubr.msk.bf16.gmra.mxu1 %vm587_vm3, %v2779_v62 }
 0x338   : > { %3208 = vmatpush1.bf16.msra.mxu1 %v9470_v0  ;;  %3231 = vmatprep.mubr.bf16.mxu1 %v10686_v9 }
 0x339   : > { %3209 = vmatprep.subr.bf16.mxu1 %v9478_v49 }
 0x33a   : > { %3165 = vmatpush1.bf16.msra.mxu0 %v9461_v38 }
 0x33b   : > { %3166 = vmatprep.subr.bf16.mxu0 %v9469_v42 }
 0x33c   : > { %3210 = vmatpush1.bf16.msra.mxu1 %v9476_v2 }
 0x33d   : > { %3211 = vmatprep.subr.bf16.mxu1 %v9484_v37 }
 0x33e   : > { %3167 = vmatpush1.bf16.msra.mxu0 %v9467_v46 }
 0x33f   : > { %3168 = vmatprep.subr.bf16.mxu0 %v9475_v58 }
 0x340   : > { %3212 = vmatpush1.bf16.msra.mxu1 %v9482_v8 }
 0x341   : > { %3213 = vmatprep.subr.bf16.mxu1 %v9490_v23 }
 0x342   : > { %3169 = vmatpush1.bf16.msra.mxu0 %v9473_v20 }
 0x343   : > { %3170 = vmatprep.subr.bf16.mxu0 %v9481_v1 }
 0x344   : > { %3214 = vmatpush1.bf16.msra.mxu1 %v9488_v5 }
 0x345   : > { %3441 = vmatprep.subr.bf16.mxu1 %v9496_v51 }
 0x346   : > { %3171 = vmatpush1.bf16.msra.mxu0 %v9479_v3 }
 0x347   : > { %3172 = vmatprep.subr.bf16.mxu0 %v9487_v44 }
 0x362   : > { %v11610_v10 = vpop.f32.mrf.mxu1 }
 0x364   : > { %v9126_v13 = vpop.f32.mrf.mxu1 }
 0x366   : > { %v11612_v14 = vpop.f32.mrf.mxu1 }
 0x368   : > { %v9127_v26 = vpop.f32.mrf.mxu1 }
 0x36d   : > { %v11614_v12 = vpop.f32.mrf.mxu0 }
 0x36f   : > { %v9174_v31 = vpop.f32.mrf.mxu0 }
 0x370   : > { %v9485_v31 = vld [vmem:[#allocation12 + $0x100] ss:$16 sps:$4 sm:$0xff]  }
 0x371   : > { %v11616_v61 = vpop.f32.mrf.mxu0  ;;  %3173 = vmatpush1.bf16.msra.mxu0 %v9485_v31 }
 0x372   : > { %3400 = vmatprep.subr.bf16.mxu0 %v9493_v19 }
 0x373   : > { %v9175_v18 = vpop.f32.mrf.mxu0 }
 0x377   : > { %v11618_v21 = vpop.f32.mrf.mxu1 }
 0x378   : > { %v11620_v25 = vpop.f32.mrf.mxu0 }
 0x379   : > { %v9130_v16 = vpop.f32.mrf.mxu1 }
 0x37a   : > { %v9178_v47 = vpop.f32.mrf.mxu0 }
 0x37b   : > { %v2142_v32 = vpop.f32.mrf.mxu1 }
 0x37c   : > { %v2396_v33 = vpop.f32.mrf.mxu0 }
 0x37d   : > { %v9131_v34 = vpop.f32.mrf.mxu1 }
 0x37e   : > { %v9179_v4 = vpop.f32.mrf.mxu0 }
 0x37f   : > { %v2146_v56 = vpop.f32.mrf.mxu1 }
 0x380   : > { %v2400_v39 = vpop.f32.mrf.mxu0 }
 0x381   : > { %v9134_v22 = vpop.f32.mrf.mxu1 }
 0x382   : > { %v9182_v41 = vpop.f32.mrf.mxu0 }
 0x383   : > { %v2148_v57 = vpop.f32.mrf.mxu1 }
 0x384   : > { %v2402_v48 = vpop.f32.mrf.mxu0 }
 0x385   : > { %v9135_v50 = vpop.f32.mrf.mxu1 }
 0x386   : > { %v9183_v24 = vpop.f32.mrf.mxu0 }
 0x387   : > { %v2206_v63 = vpop.f32.mrf.mxu1 }
 0x388   : > { %v11623_v54 = vpop.f32.mrf.mxu0  ;;  %v2207_v15 = vadd.f32 %v2206_v63, %v11610_v10 }
 0x389   : > { %v9142_v17 = vpop.f32.mrf.mxu1 }
 0x38a   : > { %v9206_v6 = vpop.f32.mrf.mxu0 }
 0x38b   : > { %v2209_v13 = vpop.f32.mrf.mxu1 }
 0x38c   : > { %v11628_v26 = vpop.f32.mrf.mxu0  ;;  %v2210_v10 = vadd.f32 %v2209_v13, %v11612_v14 }
 0x38d   : > { %v9143_v30 = vpop.f32.mrf.mxu1 }
 0x38e   : > { %v9207_v18 = vpop.f32.mrf.mxu0 }
 0x38f   : > { %v2214_v35 = vpop.f32.mrf.mxu1 }
 0x390   : > { %v2575_v7 = vpop.f32.mrf.mxu0  ;;  %v2215_v40 = vadd.f32 %v2214_v35, %v11618_v21 }
 0x391   : > { %v9146_v29 = vpop.f32.mrf.mxu1 }
 0x392   : > { %v9210_v16 = vpop.f32.mrf.mxu0 }
 0x393   : > { %v2217_v14 = vpop.f32.mrf.mxu1 }
 0x394   : > { %v2578_v47 = vpop.f32.mrf.mxu0 }
 0x395   : > { %v9147_v27 = vpop.f32.mrf.mxu1 }
 0x396   : > { %v9211_v28 = vpop.f32.mrf.mxu0 }
 0x397   : > { %v2221_v60 = vpop.f32.mrf.mxu1 }
 0x398   : > { %v2582_v55 = vpop.f32.mrf.mxu0 }
 0x399   : > { %v9150_v32 = vpop.f32.mrf.mxu1 }
 0x39a   : > { %v9214_v33 = vpop.f32.mrf.mxu0 }
 0x39b   : > { %v2223_v34 = vpop.f32.mrf.mxu1 }
 0x39c   : > { %v2584_v4 = vpop.f32.mrf.mxu0 }
 0x39d   : > { %v9151_v45 = vpop.f32.mrf.mxu1 }
 0x39e   : > { %v9215_v36 = vpop.f32.mrf.mxu0 }
 0x39f   : > { %v2294_v38 = vpop.f32.mrf.mxu1 }
 0x3a0   : > { %v2749_v21 = vpop.f32.mrf.mxu0  ;;  %v2314_v11 = vadd.f32 %v2294_v38, %v2207_v15  ;;  %v8108_v38 = vld [vmem:[#allocation10] ss:$0 sm:$0xff] }
 0x3a1   : > { %v9158_v56 = vpop.f32.mrf.mxu1 }
 0x3a2   : > { %v9238_v39 = vpop.f32.mrf.mxu0  ;;  %v2405_v22 = vadd.f32 %v11614_v12, %v2314_v11 }
 0x3a3   : > { %v2297_v41 = vpop.f32.mrf.mxu1 }
 0x3a4   : > { %v2752_v42 = vpop.f32.mrf.mxu0  ;;  %v2315_v43 = vadd.f32 %v2297_v41, %v2210_v10 }
 0x3a5   : > { %v9159_v46 = vpop.f32.mrf.mxu1 }
 0x3a6   : > { %v9239_v0 = vpop.f32.mrf.mxu0  ;;  %v2406_v57 = vadd.f32 %v11616_v61, %v2315_v43 }
 0x3a7   : > { %v2302_v48 = vpop.f32.mrf.mxu1 }
 0x3a8   : > { %v2757_v53 = vpop.f32.mrf.mxu0  ;;  %v2316_v52 = vadd.f32 %v2302_v48, %v2215_v40 }
 0x3a9   : > { %v9162_v50 = vpop.f32.mrf.mxu1 }
 0x3aa   : > { %v9242_v24 = vpop.f32.mrf.mxu0  ;;  %v2407_v58 = vadd.f32 %v11620_v25, %v2316_v52 }
 0x3ab   : > { %v2305_v49 = vpop.f32.mrf.mxu1 }
 0x3ac   : > { %v2760_v59 = vpop.f32.mrf.mxu0 }
 0x3ad   : > { %v9163_v20 = vpop.f32.mrf.mxu1 }
 0x3ae   : > { %v9243_v2 = vpop.f32.mrf.mxu0 }
 0x3af   : > { %v2309_v62 = vpop.f32.mrf.mxu1 }
 0x3b1   : > { %v9166_v12 = vpop.f32.mrf.mxu1 }
 0x3b3   : > { %v2311_v63 = vpop.f32.mrf.mxu1 }
 0x3b5   : > { %v9167_v1 = vpop.f32.mrf.mxu1 }
 0x3b7   : > { %v2476_v15 = vpop.f32.mrf.mxu1 }
 0x3b8   : > { %v2496_v3 = vadd.f32 %v2476_v15, %v2405_v22 }
 0x3b9   : > { %v9190_v8 = vpop.f32.mrf.mxu1 }
 0x3ba   : > { %v2587_v61 = vadd.f32 %v11623_v54, %v2496_v3 }
 0x3bb   : > { %v2479_v37 = vpop.f32.mrf.mxu1 }
 0x3bc   : > { %v2497_v17 = vadd.f32 %v2479_v37, %v2406_v57 }
 0x3bd   : > { %v9191_v6 = vpop.f32.mrf.mxu1 }
 0x3be   : > { %v2588_v44 = vadd.f32 %v11628_v26, %v2497_v17 }
 0x3bf   : > { %v2484_v23 = vpop.f32.mrf.mxu1 }
 0x3c0   : > { %v2498_v25 = vadd.f32 %v2484_v23, %v2407_v58 }
 0x3c1   : > { %v9194_v13 = vpop.f32.mrf.mxu1 }
 0x3c2   : > { %v2589_v10 = vadd.f32 %v2575_v7, %v2498_v25 }
 0x3c3   : > { %v2487_v31 = vpop.f32.mrf.mxu1 }
 0x3c5   : > { %v9195_v5 = vpop.f32.mrf.mxu1 }
 0x3c7   : > { %v2491_v30 = vpop.f32.mrf.mxu1 }
 0x3c9   : > { %v9198_v18 = vpop.f32.mrf.mxu1 }
 0x3cb   : > { %v2493_v19 = vpop.f32.mrf.mxu1 }
 0x3cd   : > { %v9199_v51 = vpop.f32.mrf.mxu1 }
 0x3cf   : > { %v2658_v35 = vpop.f32.mrf.mxu1 }
 0x3d0   : > { %v2678_v40 = vadd.f32 %v2658_v35, %v2587_v61 }
 0x3d1   : > { %v9222_v29 = vpop.f32.mrf.mxu1 }
 0x3d2   : > { %v2769_v16 = vadd.f32 %v2749_v21, %v2678_v40 }
 0x3d3   : > { %v2661_v54 = vpop.f32.mrf.mxu1 }
 0x3d4   : > { %v2679_v14 = vadd.f32 %v2661_v54, %v2588_v44 }
 0x3d5   : > { %v9223_v47 = vpop.f32.mrf.mxu1 }
 0x3d6   : > { %v2770_v27 = vadd.f32 %v2752_v42, %v2679_v14 }
 0x3d7   : > { %v2666_v28 = vpop.f32.mrf.mxu1 }
 0x3d8   : > { %v2680_v26 = vadd.f32 %v2666_v28, %v2589_v10  ;;  %v9494_v28 = vld [vmem:[#allocation12 + $0xe8] ss:$16 sps:$4 sm:$0xff]  }
 0x3d9   : > { %v9226_v60 = vpop.f32.mrf.mxu1 }
 0x3da   : > { %v2771_v55 = vadd.f32 %v2757_v53, %v2680_v26 }
 0x3db   : > { %v2669_v32 = vpop.f32.mrf.mxu1 }
 0x3dc   : > { %v9499_v32 = vld [vmem:[#allocation12 + $0xc4] ss:$16 sps:$4 sm:$0xff]  }
 0x3dd   : > { %v9227_v7 = vpop.f32.mrf.mxu1 }
 0x3de   : > { %v9502_v7 = vld [vmem:[#allocation12 + $0xcc] ss:$16 sps:$4 sm:$0xff]  }
 0x3df   : > { %v2673_v33 = vpop.f32.mrf.mxu1 }
 0x3e0   : > { %v9497_v33 = vld [vmem:[#allocation12 + $0xc0] ss:$16 sps:$4 sm:$0xff]  }
 0x3e1   : > { %v9230_v34 = vpop.f32.mrf.mxu1 }
 0x3e2   : > { %v9500_v34 = vld [vmem:[#allocation12 + $0xc8] ss:$16 sps:$4 sm:$0xff]  }
 0x3e3   : > { %v2675_v4 = vpop.f32.mrf.mxu1 }
 0x3e4   : > { %v9505_v4 = vld [vmem:[#allocation12 + $0xa4] ss:$16 sps:$4 sm:$0xff]  }
 0x3e5   : > { %v9231_v45 = vpop.f32.mrf.mxu1 }
 0x3e6   : > { %v9508_v45 = vld [vmem:[#allocation12 + $0xac] ss:$16 sps:$4 sm:$0xff]  }
 0x3e7   : > { %v2840_v36 = vpop.f32.mrf.mxu1 }
 0x3e8   : > { %v2860_v11 = vadd.f32 %v2840_v36, %v2769_v16  ;;  %v9503_v36 = vld [vmem:[#allocation12 + $0xa0] ss:$16 sps:$4 sm:$0xff]  }
 0x3e9   : > { %v9254_v56 = vpop.f32.mrf.mxu1 }
 0x3ea   : > { %v2870_v39 = vadd.f32 %v8108_v38, %v2860_v11  ;;  %v9511_v11 = vld [vmem:[#allocation12 + $0x84] ss:$16 sps:$4 sm:$0xff]   ;;  %v9514_v56 = vld [vmem:[#allocation12 + $0x8c] ss:$16 sps:$4 sm:$0xff]  }
 0x3eb   : > { %v2843_v21 = vpop.f32.mrf.mxu1 }
 0x3ec   : > { %v2873_v22 = vmax.f32 %v2870_v39, 0.0  ;;  %v2861_v41 = vadd.f32 %v2843_v21, %v2770_v27  ;;  %v9491_v27 = vld [vmem:[#allocation12 + $0xe0] ss:$16 sps:$4 sm:$0xff]   ;;  %v9512_v21 = vld [vmem:[#allocation12 + $0x88] ss:$16 sps:$4 sm:$0xff]  }
 0x3ed   : > { %v9255_v43 = vpop.f32.mrf.mxu1  ;;  %v9509_v39 = vld [vmem:[#allocation12 + $0x80] ss:$16 sps:$4 sm:$0xff]  }
 0x3ee   : > { %v2877_v42 = vrot.slane %v2873_v22, 6  ;;  %v2871_v46 = vadd.f32 %v8108_v38, %v2861_v41  ;;  %v9520_v41 = vld [vmem:[#allocation12 + $0x6c] ss:$16 sps:$4 sm:$0xff]   ;;  %v9515_v43 = vld [vmem:[#allocation12 + $0x60] ss:$16 sps:$4 sm:$0xff]  }
 0x3ef   : > { %v2848_v0 = vpop.f32.mrf.mxu1 }
 0x3f0   : > { %v2879_v57 = vmax.f32 %v2873_v22, %v2877_v42  ;;  %v2874_v48 = vmax.f32 %v2871_v46, 0.0  ;;  %v2862_v53 = vadd.f32 %v2848_v0, %v2771_v55  ;;  %v9518_v42 = vld [vmem:[#allocation12 + $0x68] ss:$16 sps:$4 sm:$0xff]   ;;  %v9523_v46 = vld [vmem:[#allocation12 + $0x44] ss:$16 sps:$4 sm:$0xff]  }
 0x3f1   : > { %v9258_v52 = vpop.f32.mrf.mxu1  ;;  %v9526_v0 = vld [vmem:[#allocation12 + $0x4c] ss:$16 sps:$4 sm:$0xff]  }
 0x3f2   : > { %v2880_v50 = vsel %vm664_vm1, %v2879_v57, -inf  ;;  %v2889_v24 = vrot.slane %v2874_v48, 6  ;;  %v2872_v58 = vadd.f32 %v8108_v38, %v2862_v53  ;;  %v9506_v38 = vld [vmem:[#allocation12 + $0xa8] ss:$16 sps:$4 sm:$0xff]   ;;  %v9521_v57 = vld [vmem:[#allocation12 + $0x40] ss:$16 sps:$4 sm:$0xff]  }
 0x3f3   : > { %v2881_v49 = vrot.slane %v2880_v50, 4  ;;  %v2851_v59 = vpop.f32.mrf.mxu1  ;;  %v9529_v53 = vld [vmem:[#allocation12 + $0x24] ss:$16 sps:$4 sm:$0xff]   ;;  %v9532_v52 = vld [vmem:[#allocation12 + $0x2c] ss:$16 sps:$4 sm:$0xff]  }
 0x3f4   : > { %v2891_v20 = vmax.f32 %v2873_v22, %v2889_v24  ;;  %v2875_v2 = vmax.f32 %v2872_v58, 0.0  ;;  %v9517_v22 = vld [vmem:[#allocation12 + $0x64] ss:$16 sps:$4 sm:$0xff]   ;;  %v9530_v24 = vld [vmem:[#allocation12 + $0x28] ss:$16 sps:$4 sm:$0xff]  }
 0x3f5   : > { %v2882_v62 = vmax.f32 %v2880_v50, %v2881_v49  ;;  %v9259_v12 = vpop.f32.mrf.mxu1  ;;  %v9527_v50 = vld [vmem:[#allocation12 + $0x20] ss:$16 sps:$4 sm:$0xff]   ;;  %v9535_v58 = vld [vmem:[#allocation12 + $0x4] ss:$16 sps:$4 sm:$0xff]   ;;  %v9538_v49 = vld [vmem:[#allocation12 + $0xc] ss:$16 sps:$4 sm:$0xff]  }
 0x3f6   : > { %v2893_v63 = vsel %vm2892_vm9, %v2891_v20, -inf  ;;  %v2904_v1 = vrot.slane %v2875_v2, 6  ;;  %v9533_v59 = vld [vmem:[#allocation12] ss:$16 sps:$4 sm:$0xff]   ;;  %v9536_v20 = vld [vmem:[#allocation12 + $0x8] ss:$16 sps:$4 sm:$0xff]  }
 0x3f7   : > { %v2883_v15 = vrot.slane %v2882_v62, 2  ;;  %v2894_v3 = vrot.slane %v2893_v63, 4  ;;  %v9541_v2 = vld [vmem:[#allocation12 + $0x2e4] ss:$16 sps:$4 sm:$0xff]  }
 0x3f8   : > { %v2906_v8 = vmax.f32 %v2874_v48, %v2904_v1  ;;  %v9524_v48 = vld [vmem:[#allocation12 + $0x48] ss:$16 sps:$4 sm:$0xff]   ;;  %v9539_v1 = vld [vmem:[#allocation12 + $0x2e0] ss:$16 sps:$4 sm:$0xff]  }
 0x3f9   : > { %v2884_v61 = vmax.f32 %v2882_v62, %v2883_v15  ;;  %v2895_v37 = vmax.f32 %v2893_v63, %v2894_v3  ;;  %v9544_v62 = vld [vmem:[#allocation12 + $0x2ec] ss:$16 sps:$4 sm:$0xff]   ;;  %v9542_v15 = vld [vmem:[#allocation12 + $0x2e8] ss:$16 sps:$4 sm:$0xff]  }
 0x3fa   : > { %v2908_v17 = vsel %vm2907_vm10, %v2906_v8, -inf  ;;  %v2917_v6 = vsel %vm2916_vm11, %v2906_v8, -inf  ;;  %v9547_v8 = vld [vmem:[#allocation12 + $0x2c4] ss:$16 sps:$4 sm:$0xff]  }
 0x3fb   : > { %v2885_v44 = vrot.slane %v2884_v61, 1  ;;  %v2896_v23 = vrot.slane %v2895_v37, 2  ;;  %v2909_v25 = vrot.slane %v2908_v17, 4  ;;  %v2918_v13 = vrot.slane %v2917_v6, 4 }
 0x3fd   : > { %v2886_v10 = vmax.f32 %v2884_v61, %v2885_v44  ;;  %v2897_v31 = vmax.f32 %v2895_v37, %v2896_v23  ;;  %v2910_v5 = vmax.f32 %v2908_v17, %v2909_v25  ;;  %v2919_v30 = vmax.f32 %v2917_v6, %v2918_v13  ;;  %v9550_v61 = vld [vmem:[#allocation12 + $0x2cc] ss:$16 sps:$4 sm:$0xff]   ;;  %v9545_v37 = vld [vmem:[#allocation12 + $0x2c0] ss:$16 sps:$4 sm:$0xff]   ;;  %v9548_v17 = vld [vmem:[#allocation12 + $0x2c8] ss:$16 sps:$4 sm:$0xff]  }
 0x3fe   : > { %v9553_v6 = vld [vmem:[#allocation12 + $0x2a4] ss:$16 sps:$4 sm:$0xff]   ;;  %v9556_v44 = vld [vmem:[#allocation12 + $0x2ac] ss:$16 sps:$4 sm:$0xff]   ;;  %v9551_v23 = vld [vmem:[#allocation12 + $0x2a0] ss:$16 sps:$4 sm:$0xff]  }
 0x3ff   : > { %2887 = vst [vmem:[#allocation3 + $0x5] sm:$0x1] %v2886_v10  ;;  %2902 = vst [vmem:[#allocation3 + $0x7] sm:$0x1] %v2886_v10  ;;  %v2898_v18 = vrot.slane %v2897_v31, 1  ;;  %v2911_v19 = vrot.slane %v2910_v5, 2 }
 0x400   : > { %v2920_v51 = vrot.slane %v2919_v30, 2  ;;  %v9554_v25 = vld [vmem:[#allocation12 + $0x2a8] ss:$16 sps:$4 sm:$0xff]   ;;  %v9559_v13 = vld [vmem:[#allocation12 + $0x284] ss:$16 sps:$4 sm:$0xff]  }
 0x401   : > { %v2899_v35 = vmax.f32 %v2897_v31, %v2898_v18  ;;  %v2912_v40 = vmax.f32 %v2910_v5, %v2911_v19  ;;  %v9562_v10 = vld [vmem:[#allocation12 + $0x28c] ss:$16 sps:$4 sm:$0xff]   ;;  %v9557_v31 = vld [vmem:[#allocation12 + $0x280] ss:$16 sps:$4 sm:$0xff]   ;;  %v9560_v5 = vld [vmem:[#allocation12 + $0x288] ss:$16 sps:$4 sm:$0xff]  }
 0x402   : > { %v2921_v29 = vmax.f32 %v2919_v30, %v2920_v51  ;;  %v9565_v30 = vld [vmem:[#allocation12 + $0x264] ss:$16 sps:$4 sm:$0xff]   ;;  %v9568_v18 = vld [vmem:[#allocation12 + $0x26c] ss:$16 sps:$4 sm:$0xff]   ;;  %v9563_v19 = vld [vmem:[#allocation12 + $0x260] ss:$16 sps:$4 sm:$0xff]  }
 0x403   : > { %2900 = vst [vmem:[#allocation3 + $0x6] sm:$0x1] %v2899_v35  ;;  %2901 = vst [vmem:[#allocation3 + $0x4] sm:$0x1] %v2899_v35  ;;  %v2913_v16 = vrot.slane %v2912_v40, 1 }
 0x404   : > { %v2922_v54 = vrot.slane %v2921_v29, 1  ;;  %v9566_v51 = vld [vmem:[#allocation12 + $0x268] ss:$16 sps:$4 sm:$0xff]   ;;  %v9571_v35 = vld [vmem:[#allocation12 + $0x244] ss:$16 sps:$4 sm:$0xff]  }
 0x405   : > { %v2914_v14 = vmax.f32 %v2912_v40, %v2913_v16  ;;  %v9574_v40 = vld [vmem:[#allocation12 + $0x24c] ss:$16 sps:$4 sm:$0xff]   ;;  %v9572_v16 = vld [vmem:[#allocation12 + $0x248] ss:$16 sps:$4 sm:$0xff]  }
 0x406   : > { %v2923_v47 = vmax.f32 %v2921_v29, %v2922_v54  ;;  %v9569_v29 = vld [vmem:[#allocation12 + $0x240] ss:$16 sps:$4 sm:$0xff]   ;;  %v9577_v54 = vld [vmem:[#allocation12 + $0x224] ss:$16 sps:$4 sm:$0xff]  }
 0x407   : > { %2915 = vst [vmem:[#allocation3 + $0x9] sm:$0x1] %v2914_v14  ;;  %2926 = vst [vmem:[#allocation3 + $0xb] sm:$0x1] %v2914_v14  ;;  %v9580_v14 = vld [vmem:[#allocation12 + $0x22c] ss:$16 sps:$4 sm:$0xff]  }
 0x408   : > { %2924 = vst [vmem:[#allocation3 + $0xa] sm:$0x1] %v2923_v47  ;;  %2925 = vst [vmem:[#allocation3 + $0x8] sm:$0x1] %v2923_v47  ;;  %v9575_v47 = vld [vmem:[#allocation12 + $0x220] ss:$16 sps:$4 sm:$0xff]  }
 0x40a   : > { %v2927_v63 = vld [vmem:[#allocation3] sm:$0xff] }
 0x40f   : > { %v2962_v26 = vld [vmem:[#allocation3 + $0x1] sm:$0xff]  ;;  %v2963_v60 = vld [vmem:[#allocation3 + $0x9] sm:$0xff] }
 0x410   : > { %v2964_v55 = vpack.c.bf16 %v2963_v60, %v2962_v26  ;;  %v2928_v12 = vld [vmem:[#allocation3 + $0x8] sm:$0xff]  ;;  %v9586_v60 = vld [vmem:[#allocation12 + $0x20c] ss:$16 sps:$4 sm:$0xff]  }
 0x411   : > { %v2929_v3 = vpack.c.bf16 %v2928_v12, %v2927_v63  ;;  %v9583_v26 = vld [vmem:[#allocation12 + $0x204] ss:$16 sps:$4 sm:$0xff]   ;;  %v9614_v12 = vld [vmem:[#allocation12 + $0x368] ss:$16 sps:$4 sm:$0xff]  }
 0x412   : > { %3191 = vmatmul.mubr.bf16.vlgmr.msra.gmra.mxu0 %v2964_v55  ;;  %3232 = vmatmul.mubr.bf16.vlgmr.msra.gmra.mxu1 %v2964_v55  ;;  %v9619_v63 = vld [vmem:[#allocation12 + $0x344] ss:$16 sps:$4 sm:$0xff]  }
 0x413   : > { %3401 = vmatpush1.bf16.msra.mxu0 %v9491_v27  ;;  %3442 = vmatpush1.bf16.msra.mxu1 %v9494_v28  ;;  %v9578_v27 = vld [vmem:[#allocation12 + $0x228] ss:$16 sps:$4 sm:$0xff]   ;;  %v2764_v28 = vpop.f32.mrf.mxu0 }
 0x414   : > { %3402 = vmatprep.subr.bf16.mxu0 %v9499_v32  ;;  %3443 = vmatprep.subr.bf16.mxu1 %v9502_v7  ;;  %v2855_v32 = vpop.f32.mrf.mxu1  ;;  %v9581_v7 = vld [vmem:[#allocation12 + $0x200] ss:$16 sps:$4 sm:$0xff]   ;;  %v9658_v28 = vld [vmem:[#allocation12 + $0x48c] ss:$16 sps:$4 sm:$0xff]  }
 0x415   : > { %3432 = vmatprep.mubr.bf16.mxu0 %v10686_v9  ;;  %3473 = vmatprep.mubr.bf16.mxu1 %v10686_v9  ;;  %v9246_v55 = vpop.f32.mrf.mxu0  ;;  %v9664_v32 = vld [vmem:[#allocation12 + $0x46c] ss:$16 sps:$4 sm:$0xff]  }
 0x416   : > { %v9661_v55 = vld [vmem:[#allocation12 + $0x464] ss:$16 sps:$4 sm:$0xff]  }
 0x417   : > { %3403 = vmatpush1.bf16.msra.mxu0 %v9497_v33  ;;  %3444 = vmatpush1.bf16.msra.mxu1 %v9500_v34  ;;  %v9584_v33 = vld [vmem:[#allocation12 + $0x208] ss:$16 sps:$4 sm:$0xff]   ;;  %v2766_v34 = vpop.f32.mrf.mxu0 }
 0x418   : > { %3404 = vmatprep.subr.bf16.mxu0 %v9505_v4  ;;  %3445 = vmatprep.subr.bf16.mxu1 %v9508_v45  ;;  %v9589_v4 = vld [vmem:[#allocation12 + $0x3e4] ss:$16 sps:$4 sm:$0xff]   ;;  %v9592_v45 = vld [vmem:[#allocation12 + $0x3ec] ss:$16 sps:$4 sm:$0xff]  }
 0x419   : > { %v9667_v34 = vld [vmem:[#allocation12 + $0x444] ss:$16 sps:$4 sm:$0xff]  }
 0x41b   : > { %3405 = vmatpush1.bf16.msra.mxu0 %v9503_v36  ;;  %3446 = vmatpush1.bf16.msra.mxu1 %v9506_v38  ;;  %v9262_v36 = vpop.f32.mrf.mxu1  ;;  %v3482_v38 = vld [vmem:[#allocation3 + $0x2] sm:$0xff] }
 0x41c   : > { %3406 = vmatprep.subr.bf16.mxu0 %v9511_v11  ;;  %3447 = vmatprep.subr.bf16.mxu1 %v9514_v56  ;;  %v3483_v11 = vld [vmem:[#allocation3 + $0xa] sm:$0xff]  ;;  %v9247_v56 = vpop.f32.mrf.mxu0 }
 0x41d   : > { %v9668_v36 = vld [vmem:[#allocation12 + $0x448] ss:$16 sps:$4 sm:$0xff]   ;;  %v9671_v56 = vld [vmem:[#allocation12 + $0x420] ss:$16 sps:$4 sm:$0xff]  }
 0x41f   : > { %3407 = vmatpush1.bf16.msra.mxu0 %v9509_v39  ;;  %3448 = vmatpush1.bf16.msra.mxu1 %v9512_v21  ;;  %v2857_v39 = vpop.f32.mrf.mxu1  ;;  %v9587_v21 = vld [vmem:[#allocation12 + $0x3e0] ss:$16 sps:$4 sm:$0xff]  }
 0x420   : > { %3408 = vmatprep.subr.bf16.mxu0 %v9517_v22  ;;  %3449 = vmatprep.subr.bf16.mxu1 %v9520_v41  ;;  %v9590_v22 = vld [vmem:[#allocation12 + $0x3e8] ss:$16 sps:$4 sm:$0xff]   ;;  %v3484_v41 = vpack.c.bf16 %v3483_v11, %v3482_v38  ;;  %v9673_v38 = vld [vmem:[#allocation12 + $0x424] ss:$16 sps:$4 sm:$0xff]   ;;  %v9676_v11 = vld [vmem:[#allocation12 + $0x42c] ss:$16 sps:$4 sm:$0xff]  }
 0x421   : > { %v9674_v39 = vld [vmem:[#allocation12 + $0x428] ss:$16 sps:$4 sm:$0xff]  }
 0x423   : > { %3409 = vmatpush1.bf16.msra.mxu0 %v9515_v43  ;;  %3450 = vmatpush1.bf16.msra.mxu1 %v9518_v42  ;;  %v9595_v43 = vld [vmem:[#allocation12 + $0x3c4] ss:$16 sps:$4 sm:$0xff]   ;;  %v9598_v42 = vld [vmem:[#allocation12 + $0x3cc] ss:$16 sps:$4 sm:$0xff]  }
 0x424   : > { %3410 = vmatprep.subr.bf16.mxu0 %v9523_v46  ;;  %3451 = vmatprep.subr.bf16.mxu1 %v9526_v0  ;;  %v9263_v46 = vpop.f32.mrf.mxu1  ;;  %v9593_v0 = vld [vmem:[#allocation12 + $0x3c0] ss:$16 sps:$4 sm:$0xff]  }
 0x425   : > { %v9688_v46 = vld [vmem:[#allocation12 + $0x5ec] ss:$16 sps:$4 sm:$0xff]  }
 0x427   : > { %3411 = vmatpush1.bf16.msra.mxu0 %v9521_v57  ;;  %3452 = vmatpush1.bf16.msra.mxu1 %v9524_v48  ;;  %v9596_v57 = vld [vmem:[#allocation12 + $0x3c8] ss:$16 sps:$4 sm:$0xff]   ;;  %v9601_v48 = vld [vmem:[#allocation12 + $0x3a4] ss:$16 sps:$4 sm:$0xff]  }
 0x428   : > { %3412 = vmatprep.subr.bf16.mxu0 %v9529_v53  ;;  %3453 = vmatprep.subr.bf16.mxu1 %v9532_v52  ;;  %v9604_v53 = vld [vmem:[#allocation12 + $0x3ac] ss:$16 sps:$4 sm:$0xff]   ;;  %v9599_v52 = vld [vmem:[#allocation12 + $0x3a0] ss:$16 sps:$4 sm:$0xff]  }
 0x42b   : > { %3413 = vmatpush1.bf16.msra.mxu0 %v9527_v50  ;;  %3454 = vmatpush1.bf16.msra.mxu1 %v9530_v24  ;;  %v9602_v50 = vld [vmem:[#allocation12 + $0x3a8] ss:$16 sps:$4 sm:$0xff]   ;;  %v9607_v24 = vld [vmem:[#allocation12 + $0x384] ss:$16 sps:$4 sm:$0xff]  }
 0x42c   : > { %3414 = vmatprep.subr.bf16.mxu0 %v9535_v58  ;;  %3455 = vmatprep.subr.bf16.mxu1 %v9538_v49  ;;  %v9610_v58 = vld [vmem:[#allocation12 + $0x38c] ss:$16 sps:$4 sm:$0xff]   ;;  %v9605_v49 = vld [vmem:[#allocation12 + $0x380] ss:$16 sps:$4 sm:$0xff]  }
 0x42f   : > { %3415 = vmatpush1.bf16.msra.mxu0 %v9533_v59  ;;  %3456 = vmatpush1.bf16.msra.mxu1 %v9536_v20  ;;  %v9608_v59 = vld [vmem:[#allocation12 + $0x388] ss:$16 sps:$4 sm:$0xff]   ;;  %v9613_v20 = vld [vmem:[#allocation12 + $0x364] ss:$16 sps:$4 sm:$0xff]  }
 0x430   : > { %3678 = vmatprep.subr.bf16.mxu0 %v9541_v2  ;;  %3719 = vmatprep.subr.bf16.mxu1 %v9544_v62  ;;  %v9616_v2 = vld [vmem:[#allocation12 + $0x36c] ss:$16 sps:$4 sm:$0xff]   ;;  %v9611_v62 = vld [vmem:[#allocation12 + $0x360] ss:$16 sps:$4 sm:$0xff]  }
 0x432   : > { %3433 = vmatmul.mubr.bf16.vlgmr.msra.gmra.mxu0 %v2929_v3  ;;  %3474 = vmatmul.mubr.bf16.vlgmr.msra.gmra.mxu1 %v2929_v3  ;;  %v9620_v3 = vld [vmem:[#allocation12 + $0x348] ss:$16 sps:$4 sm:$0xff]  }
 0x433   : > { %3679 = vmatpush1.bf16.msra.mxu0 %v9539_v1  ;;  %3720 = vmatpush1.bf16.msra.mxu1 %v9542_v15  ;;  %v9622_v1 = vld [vmem:[#allocation12 + $0x34c] ss:$16 sps:$4 sm:$0xff]   ;;  %v9617_v15 = vld [vmem:[#allocation12 + $0x340] ss:$16 sps:$4 sm:$0xff]  }
 0x434   : > { %3680 = vmatprep.subr.bf16.mxu0 %v9547_v8  ;;  %3721 = vmatprep.subr.bf16.mxu1 %v9550_v61  ;;  %v9625_v8 = vld [vmem:[#allocation12 + $0x324] ss:$16 sps:$4 sm:$0xff]   ;;  %v9628_v61 = vld [vmem:[#allocation12 + $0x32c] ss:$16 sps:$4 sm:$0xff]  }
 0x435   : > { %3710 = vmatprep.mubr.bf16.mxu0 %v10686_v9  ;;  %3751 = vmatprep.mubr.bf16.mxu1 %v10686_v9 }
 0x437   : > { %3681 = vmatpush1.bf16.msra.mxu0 %v9545_v37  ;;  %3722 = vmatpush1.bf16.msra.mxu1 %v9548_v17  ;;  %v9623_v37 = vld [vmem:[#allocation12 + $0x320] ss:$16 sps:$4 sm:$0xff]   ;;  %v9626_v17 = vld [vmem:[#allocation12 + $0x328] ss:$16 sps:$4 sm:$0xff]  }
 0x438   : > { %3682 = vmatprep.subr.bf16.mxu0 %v9553_v6  ;;  %3723 = vmatprep.subr.bf16.mxu1 %v9556_v44  ;;  %v9631_v6 = vld [vmem:[#allocation12 + $0x304] ss:$16 sps:$4 sm:$0xff]   ;;  %v9634_v44 = vld [vmem:[#allocation12 + $0x30c] ss:$16 sps:$4 sm:$0xff]  }
 0x43b   : > { %3683 = vmatpush1.bf16.msra.mxu0 %v9551_v23  ;;  %3724 = vmatpush1.bf16.msra.mxu1 %v9554_v25  ;;  %v9629_v23 = vld [vmem:[#allocation12 + $0x300] ss:$16 sps:$4 sm:$0xff]   ;;  %v9632_v25 = vld [vmem:[#allocation12 + $0x308] ss:$16 sps:$4 sm:$0xff]  }
 0x43c   : > { %3684 = vmatprep.subr.bf16.mxu0 %v9559_v13  ;;  %3725 = vmatprep.subr.bf16.mxu1 %v9562_v10  ;;  %v9637_v13 = vld [vmem:[#allocation12 + $0x4e4] ss:$16 sps:$4 sm:$0xff]   ;;  %v9640_v10 = vld [vmem:[#allocation12 + $0x4ec] ss:$16 sps:$4 sm:$0xff]  }
 0x43f   : > { %3685 = vmatpush1.bf16.msra.mxu0 %v9557_v31  ;;  %3726 = vmatpush1.bf16.msra.mxu1 %v9560_v5  ;;  %v3764_v31 = vld [vmem:[#allocation3 + $0x4] sm:$0xff]  ;;  %v3765_v5 = vld [vmem:[#allocation3 + $0xc] sm:$0xff] }
 0x440   : > { %3686 = vmatprep.subr.bf16.mxu0 %v9565_v30  ;;  %3727 = vmatprep.subr.bf16.mxu1 %v9568_v18  ;;  %v9635_v30 = vld [vmem:[#allocation12 + $0x4e0] ss:$16 sps:$4 sm:$0xff]   ;;  %v9638_v18 = vld [vmem:[#allocation12 + $0x4e8] ss:$16 sps:$4 sm:$0xff]  }
 0x443   : > { %3687 = vmatpush1.bf16.msra.mxu0 %v9563_v19  ;;  %3728 = vmatpush1.bf16.msra.mxu1 %v9566_v51  ;;  %v3766_v19 = vpack.c.bf16 %v3765_v5, %v3764_v31  ;;  %v9643_v51 = vld [vmem:[#allocation12 + $0x4c4] ss:$16 sps:$4 sm:$0xff]   ;;  %v9722_v31 = vld [vmem:[#allocation12 + $0x528] ss:$16 sps:$4 sm:$0xff]  }
 0x444   : > { %3688 = vmatprep.subr.bf16.mxu0 %v9571_v35  ;;  %3729 = vmatprep.subr.bf16.mxu1 %v9574_v40  ;;  %v9646_v35 = vld [vmem:[#allocation12 + $0x4cc] ss:$16 sps:$4 sm:$0xff]   ;;  %v9641_v40 = vld [vmem:[#allocation12 + $0x4c0] ss:$16 sps:$4 sm:$0xff]   ;;  %v9727_v5 = vld [vmem:[#allocation12 + $0x504] ss:$16 sps:$4 sm:$0xff]  }
 0x447   : > { %3689 = vmatpush1.bf16.msra.mxu0 %v9569_v29  ;;  %3730 = vmatpush1.bf16.msra.mxu1 %v9572_v16  ;;  %v9644_v29 = vld [vmem:[#allocation12 + $0x4c8] ss:$16 sps:$4 sm:$0xff]   ;;  %v9649_v16 = vld [vmem:[#allocation12 + $0x4a4] ss:$16 sps:$4 sm:$0xff]  }
 0x448   : > { %3690 = vmatprep.subr.bf16.mxu0 %v9577_v54  ;;  %3731 = vmatprep.subr.bf16.mxu1 %v9580_v14  ;;  %v9652_v54 = vld [vmem:[#allocation12 + $0x4ac] ss:$16 sps:$4 sm:$0xff]   ;;  %v9647_v14 = vld [vmem:[#allocation12 + $0x4a0] ss:$16 sps:$4 sm:$0xff]  }
 0x44b   : > { %3691 = vmatpush1.bf16.msra.mxu0 %v9575_v47  ;;  %3732 = vmatpush1.bf16.msra.mxu1 %v9578_v27  ;;  %v9650_v47 = vld [vmem:[#allocation12 + $0x4a8] ss:$16 sps:$4 sm:$0xff]   ;;  %v9655_v27 = vld [vmem:[#allocation12 + $0x484] ss:$16 sps:$4 sm:$0xff]  }
 0x44c   : > { %3692 = vmatprep.subr.bf16.mxu0 %v9583_v26  ;;  %3733 = vmatprep.subr.bf16.mxu1 %v9586_v60  ;;  %v9653_v26 = vld [vmem:[#allocation12 + $0x480] ss:$16 sps:$4 sm:$0xff]   ;;  %v9656_v60 = vld [vmem:[#allocation12 + $0x488] ss:$16 sps:$4 sm:$0xff]  }
 0x44f   : > { %3693 = vmatpush1.bf16.msra.mxu0 %v9581_v7  ;;  %3734 = vmatpush1.bf16.msra.mxu1 %v9584_v33  ;;  %v9659_v7 = vld [vmem:[#allocation12 + $0x460] ss:$16 sps:$4 sm:$0xff]   ;;  %v9662_v33 = vld [vmem:[#allocation12 + $0x468] ss:$16 sps:$4 sm:$0xff]  }
 0x450   : > { %3960 = vmatprep.subr.bf16.mxu0 %v9589_v4  ;;  %4001 = vmatprep.subr.bf16.mxu1 %v9592_v45  ;;  %v9670_v4 = vld [vmem:[#allocation12 + $0x44c] ss:$16 sps:$4 sm:$0xff]   ;;  %v9665_v45 = vld [vmem:[#allocation12 + $0x440] ss:$16 sps:$4 sm:$0xff]  }
 0x452   : > { %3711 = vmatmul.mubr.bf16.vlgmr.msra.gmra.mxu0 %v3484_v41  ;;  %3752 = vmatmul.mubr.bf16.vlgmr.msra.gmra.mxu1 %v3484_v41  ;;  %v9677_v41 = vld [vmem:[#allocation12 + $0x400] ss:$16 sps:$4 sm:$0xff]  }
 0x453   : > { %3961 = vmatpush1.bf16.msra.mxu0 %v9587_v21  ;;  %4002 = vmatpush1.bf16.msra.mxu1 %v9590_v22  ;;  %v9679_v21 = vld [vmem:[#allocation12 + $0x404] ss:$16 sps:$4 sm:$0xff]   ;;  %v9682_v22 = vld [vmem:[#allocation12 + $0x40c] ss:$16 sps:$4 sm:$0xff]  }
 0x454   : > { %3962 = vmatprep.subr.bf16.mxu0 %v9595_v43  ;;  %4003 = vmatprep.subr.bf16.mxu1 %v9598_v42  ;;  %v9680_v43 = vld [vmem:[#allocation12 + $0x408] ss:$16 sps:$4 sm:$0xff]   ;;  %v9685_v42 = vld [vmem:[#allocation12 + $0x5e4] ss:$16 sps:$4 sm:$0xff]  }
 0x455   : > { %3992 = vmatprep.mubr.bf16.mxu0 %v10686_v9  ;;  %4033 = vmatprep.mubr.bf16.mxu1 %v10686_v9 }
 0x457   : > { %3963 = vmatpush1.bf16.msra.mxu0 %v9593_v0  ;;  %4004 = vmatpush1.bf16.msra.mxu1 %v9596_v57  ;;  %v4046_v0 = vld [vmem:[#allocation3 + $0x5] sm:$0xff]  ;;  %v4047_v57 = vld [vmem:[#allocation3 + $0xd] sm:$0xff] }
 0x458   : > { %3964 = vmatprep.subr.bf16.mxu0 %v9601_v48  ;;  %4005 = vmatprep.subr.bf16.mxu1 %v9604_v53  ;;  %v9683_v48 = vld [vmem:[#allocation12 + $0x5e0] ss:$16 sps:$4 sm:$0xff]   ;;  %v9686_v53 = vld [vmem:[#allocation12 + $0x5e8] ss:$16 sps:$4 sm:$0xff]  }
 0x45b   : > { %3965 = vmatpush1.bf16.msra.mxu0 %v9599_v52  ;;  %4006 = vmatpush1.bf16.msra.mxu1 %v9602_v50  ;;  %v4048_v52 = vpack.c.bf16 %v4047_v57, %v4046_v0  ;;  %v9691_v50 = vld [vmem:[#allocation12 + $0x5c4] ss:$16 sps:$4 sm:$0xff]   ;;  %v9770_v0 = vld [vmem:[#allocation12 + $0x628] ss:$16 sps:$4 sm:$0xff]  }
 0x45c   : > { %3966 = vmatprep.subr.bf16.mxu0 %v9607_v24  ;;  %4007 = vmatprep.subr.bf16.mxu1 %v9610_v58  ;;  %v9694_v24 = vld [vmem:[#allocation12 + $0x5cc] ss:$16 sps:$4 sm:$0xff]   ;;  %v9689_v58 = vld [vmem:[#allocation12 + $0x5c0] ss:$16 sps:$4 sm:$0xff]   ;;  %v9775_v57 = vld [vmem:[#allocation12 + $0x604] ss:$16 sps:$4 sm:$0xff]  }
 0x45f   : > { %3967 = vmatpush1.bf16.msra.mxu0 %v9605_v49  ;;  %4008 = vmatpush1.bf16.msra.mxu1 %v9608_v59  ;;  %v9692_v49 = vld [vmem:[#allocation12 + $0x5c8] ss:$16 sps:$4 sm:$0xff]   ;;  %v9697_v59 = vld [vmem:[#allocation12 + $0x5a4] ss:$16 sps:$4 sm:$0xff]  }
 0x460   : > { %3968 = vmatprep.subr.bf16.mxu0 %v9613_v20  ;;  %4009 = vmatprep.subr.bf16.mxu1 %v9616_v2  ;;  %v9700_v20 = vld [vmem:[#allocation12 + $0x5ac] ss:$16 sps:$4 sm:$0xff]   ;;  %v9695_v2 = vld [vmem:[#allocation12 + $0x5a0] ss:$16 sps:$4 sm:$0xff]  }
 0x463   : > { %3969 = vmatpush1.bf16.msra.mxu0 %v9611_v62  ;;  %4010 = vmatpush1.bf16.msra.mxu1 %v9614_v12  ;;  %v9698_v62 = vld [vmem:[#allocation12 + $0x5a8] ss:$16 sps:$4 sm:$0xff]   ;;  %v9703_v12 = vld [vmem:[#allocation12 + $0x584] ss:$16 sps:$4 sm:$0xff]  }
 0x464   : > { %3970 = vmatprep.subr.bf16.mxu0 %v9619_v63  ;;  %4011 = vmatprep.subr.bf16.mxu1 %v9622_v1  ;;  %v9706_v63 = vld [vmem:[#allocation12 + $0x58c] ss:$16 sps:$4 sm:$0xff]   ;;  %v9701_v1 = vld [vmem:[#allocation12 + $0x580] ss:$16 sps:$4 sm:$0xff]  }
 0x467   : > { %3971 = vmatpush1.bf16.msra.mxu0 %v9617_v15  ;;  %4012 = vmatpush1.bf16.msra.mxu1 %v9620_v3  ;;  %v9704_v15 = vld [vmem:[#allocation12 + $0x588] ss:$16 sps:$4 sm:$0xff]   ;;  %v9709_v3 = vld [vmem:[#allocation12 + $0x564] ss:$16 sps:$4 sm:$0xff]  }
 0x468   : > { %3972 = vmatprep.subr.bf16.mxu0 %v9625_v8  ;;  %4013 = vmatprep.subr.bf16.mxu1 %v9628_v61  ;;  %v9712_v8 = vld [vmem:[#allocation12 + $0x56c] ss:$16 sps:$4 sm:$0xff]   ;;  %v9707_v61 = vld [vmem:[#allocation12 + $0x560] ss:$16 sps:$4 sm:$0xff]  }
 0x46b   : > { %3973 = vmatpush1.bf16.msra.mxu0 %v9623_v37  ;;  %4014 = vmatpush1.bf16.msra.mxu1 %v9626_v17  ;;  %v9710_v37 = vld [vmem:[#allocation12 + $0x568] ss:$16 sps:$4 sm:$0xff]   ;;  %v9715_v17 = vld [vmem:[#allocation12 + $0x544] ss:$16 sps:$4 sm:$0xff]  }
 0x46c   : > { %3974 = vmatprep.subr.bf16.mxu0 %v9631_v6  ;;  %4015 = vmatprep.subr.bf16.mxu1 %v9634_v44  ;;  %v9718_v6 = vld [vmem:[#allocation12 + $0x54c] ss:$16 sps:$4 sm:$0xff]   ;;  %v9713_v44 = vld [vmem:[#allocation12 + $0x540] ss:$16 sps:$4 sm:$0xff]  }
 0x46f   : > { %3975 = vmatpush1.bf16.msra.mxu0 %v9629_v23  ;;  %4016 = vmatpush1.bf16.msra.mxu1 %v9632_v25  ;;  %v9716_v23 = vld [vmem:[#allocation12 + $0x548] ss:$16 sps:$4 sm:$0xff]   ;;  %v9721_v25 = vld [vmem:[#allocation12 + $0x524] ss:$16 sps:$4 sm:$0xff]  }
 0x470   : > { %4242 = vmatprep.subr.bf16.mxu0 %v9637_v13  ;;  %4283 = vmatprep.subr.bf16.mxu1 %v9640_v10  ;;  %v9724_v13 = vld [vmem:[#allocation12 + $0x52c] ss:$16 sps:$4 sm:$0xff]   ;;  %v9719_v10 = vld [vmem:[#allocation12 + $0x520] ss:$16 sps:$4 sm:$0xff]  }
 0x472   : > { %3993 = vmatmul.mubr.bf16.vlgmr.msra.gmra.mxu0 %v3766_v19  ;;  %4034 = vmatmul.mubr.bf16.vlgmr.msra.gmra.mxu1 %v3766_v19  ;;  %v9728_v19 = vld [vmem:[#allocation12 + $0x508] ss:$16 sps:$4 sm:$0xff]  }
 0x473   : > { %4243 = vmatpush1.bf16.msra.mxu0 %v9635_v30  ;;  %4284 = vmatpush1.bf16.msra.mxu1 %v9638_v18  ;;  %v9730_v30 = vld [vmem:[#allocation12 + $0x50c] ss:$16 sps:$4 sm:$0xff]   ;;  %v9725_v18 = vld [vmem:[#allocation12 + $0x500] ss:$16 sps:$4 sm:$0xff]  }
 0x474   : > { %4244 = vmatprep.subr.bf16.mxu0 %v9643_v51  ;;  %4285 = vmatprep.subr.bf16.mxu1 %v9646_v35  ;;  %v9733_v51 = vld [vmem:[#allocation12 + $0x6e4] ss:$16 sps:$4 sm:$0xff]   ;;  %v9736_v35 = vld [vmem:[#allocation12 + $0x6ec] ss:$16 sps:$4 sm:$0xff]  }
 0x475   : > { %4274 = vmatprep.mubr.bf16.mxu0 %v10686_v9  ;;  %4315 = vmatprep.mubr.bf16.mxu1 %v10686_v9 }
 0x477   : > { %4245 = vmatpush1.bf16.msra.mxu0 %v9641_v40  ;;  %4286 = vmatpush1.bf16.msra.mxu1 %v9644_v29  ;;  %v4328_v40 = vld [vmem:[#allocation3 + $0x6] sm:$0xff]  ;;  %v4329_v29 = vld [vmem:[#allocation3 + $0xe] sm:$0xff] }
 0x478   : > { %4246 = vmatprep.subr.bf16.mxu0 %v9649_v16  ;;  %4287 = vmatprep.subr.bf16.mxu1 %v9652_v54  ;;  %v9731_v16 = vld [vmem:[#allocation12 + $0x6e0] ss:$16 sps:$4 sm:$0xff]   ;;  %v9734_v54 = vld [vmem:[#allocation12 + $0x6e8] ss:$16 sps:$4 sm:$0xff]  }
 0x47b   : > { %4247 = vmatpush1.bf16.msra.mxu0 %v9647_v14  ;;  %4288 = vmatpush1.bf16.msra.mxu1 %v9650_v47  ;;  %v4330_v14 = vpack.c.bf16 %v4329_v29, %v4328_v40  ;;  %v9739_v47 = vld [vmem:[#allocation12 + $0x6c4] ss:$16 sps:$4 sm:$0xff]   ;;  %v9806_v40 = vld [vmem:[#allocation12 + $0x768] ss:$16 sps:$4 sm:$0xff]  }
 0x47c   : > { %4248 = vmatprep.subr.bf16.mxu0 %v9655_v27  ;;  %4289 = vmatprep.subr.bf16.mxu1 %v9658_v28  ;;  %v9742_v27 = vld [vmem:[#allocation12 + $0x6cc] ss:$16 sps:$4 sm:$0xff]   ;;  %v9737_v28 = vld [vmem:[#allocation12 + $0x6c0] ss:$16 sps:$4 sm:$0xff]   ;;  %v9811_v29 = vld [vmem:[#allocation12 + $0x744] ss:$16 sps:$4 sm:$0xff]  }
 0x47f   : > { %4249 = vmatpush1.bf16.msra.mxu0 %v9653_v26  ;;  %4290 = vmatpush1.bf16.msra.mxu1 %v9656_v60  ;;  %v9740_v26 = vld [vmem:[#allocation12 + $0x6c8] ss:$16 sps:$4 sm:$0xff]   ;;  %v9745_v60 = vld [vmem:[#allocation12 + $0x6a4] ss:$16 sps:$4 sm:$0xff]  }
 0x480   : > { %4250 = vmatprep.subr.bf16.mxu0 %v9661_v55  ;;  %4291 = vmatprep.subr.bf16.mxu1 %v9664_v32  ;;  %v9748_v55 = vld [vmem:[#allocation12 + $0x6ac] ss:$16 sps:$4 sm:$0xff]   ;;  %v9743_v32 = vld [vmem:[#allocation12 + $0x6a0] ss:$16 sps:$4 sm:$0xff]  }
 0x483   : > { %4251 = vmatpush1.bf16.msra.mxu0 %v9659_v7  ;;  %4292 = vmatpush1.bf16.msra.mxu1 %v9662_v33  ;;  %v9746_v7 = vld [vmem:[#allocation12 + $0x6a8] ss:$16 sps:$4 sm:$0xff]   ;;  %v9751_v33 = vld [vmem:[#allocation12 + $0x684] ss:$16 sps:$4 sm:$0xff]  }
 0x484   : > { %4252 = vmatprep.subr.bf16.mxu0 %v9667_v34  ;;  %4293 = vmatprep.subr.bf16.mxu1 %v9670_v4  ;;  %v9754_v34 = vld [vmem:[#allocation12 + $0x68c] ss:$16 sps:$4 sm:$0xff]   ;;  %v9749_v4 = vld [vmem:[#allocation12 + $0x680] ss:$16 sps:$4 sm:$0xff]  }
 0x487   : > { %4253 = vmatpush1.bf16.msra.mxu0 %v9665_v45  ;;  %4294 = vmatpush1.bf16.msra.mxu1 %v9668_v36  ;;  %v9752_v45 = vld [vmem:[#allocation12 + $0x688] ss:$16 sps:$4 sm:$0xff]   ;;  %v9757_v36 = vld [vmem:[#allocation12 + $0x664] ss:$16 sps:$4 sm:$0xff]  }
 0x488   : > { %4254 = vmatprep.subr.bf16.mxu0 %v9673_v38  ;;  %4295 = vmatprep.subr.bf16.mxu1 %v9676_v11  ;;  %v9760_v38 = vld [vmem:[#allocation12 + $0x66c] ss:$16 sps:$4 sm:$0xff]   ;;  %v9755_v11 = vld [vmem:[#allocation12 + $0x660] ss:$16 sps:$4 sm:$0xff]  }
 0x48b   : > { %4255 = vmatpush1.bf16.msra.mxu0 %v9671_v56  ;;  %4296 = vmatpush1.bf16.msra.mxu1 %v9674_v39  ;;  %v9758_v56 = vld [vmem:[#allocation12 + $0x668] ss:$16 sps:$4 sm:$0xff]   ;;  %v9763_v39 = vld [vmem:[#allocation12 + $0x644] ss:$16 sps:$4 sm:$0xff]  }
 0x48c   : > { %4256 = vmatprep.subr.bf16.mxu0 %v9679_v21  ;;  %4297 = vmatprep.subr.bf16.mxu1 %v9682_v22  ;;  %v9766_v21 = vld [vmem:[#allocation12 + $0x64c] ss:$16 sps:$4 sm:$0xff]   ;;  %v9761_v22 = vld [vmem:[#allocation12 + $0x640] ss:$16 sps:$4 sm:$0xff]  }
 0x48f   : > { %4257 = vmatpush1.bf16.msra.mxu0 %v9677_v41  ;;  %4298 = vmatpush1.bf16.msra.mxu1 %v9680_v43  ;;  %v9764_v41 = vld [vmem:[#allocation12 + $0x648] ss:$16 sps:$4 sm:$0xff]   ;;  %v9769_v43 = vld [vmem:[#allocation12 + $0x624] ss:$16 sps:$4 sm:$0xff]  }
 0x490   : > { %4524 = vmatprep.subr.bf16.mxu0 %v9685_v42  ;;  %4565 = vmatprep.subr.bf16.mxu1 %v9688_v46  ;;  %v9772_v42 = vld [vmem:[#allocation12 + $0x62c] ss:$16 sps:$4 sm:$0xff]   ;;  %v9767_v46 = vld [vmem:[#allocation12 + $0x620] ss:$16 sps:$4 sm:$0xff]  }
 0x492   : > { %4275 = vmatmul.mubr.bf16.vlgmr.msra.gmra.mxu0 %v4048_v52  ;;  %4316 = vmatmul.mubr.bf16.vlgmr.msra.gmra.mxu1 %v4048_v52  ;;  %v9776_v52 = vld [vmem:[#allocation12 + $0x608] ss:$16 sps:$4 sm:$0xff]  }
 0x493   : > { %4525 = vmatpush1.bf16.msra.mxu0 %v9683_v48  ;;  %4566 = vmatpush1.bf16.msra.mxu1 %v9686_v53  ;;  %v9778_v48 = vld [vmem:[#allocation12 + $0x60c] ss:$16 sps:$4 sm:$0xff]   ;;  %v9773_v53 = vld [vmem:[#allocation12 + $0x600] ss:$16 sps:$4 sm:$0xff]  }
 0x494   : > { %4526 = vmatprep.subr.bf16.mxu0 %v9691_v50  ;;  %4567 = vmatprep.subr.bf16.mxu1 %v9694_v24  ;;  %v9781_v50 = vld [vmem:[#allocation12 + $0x7e4] ss:$16 sps:$4 sm:$0xff]   ;;  %v9784_v24 = vld [vmem:[#allocation12 + $0x7ec] ss:$16 sps:$4 sm:$0xff]  }
 0x495   : > { %4556 = vmatprep.mubr.bf16.mxu0 %v10686_v9  ;;  %4597 = vmatprep.mubr.bf16.mxu1 %v10686_v9 }
 0x497   : > { %4527 = vmatpush1.bf16.msra.mxu0 %v9689_v58  ;;  %4568 = vmatpush1.bf16.msra.mxu1 %v9692_v49  ;;  %v4610_v58 = vld [vmem:[#allocation3 + $0x8] sm:$0xff] }
 0x498   : > { %4528 = vmatprep.subr.bf16.mxu0 %v9697_v59  ;;  %4569 = vmatprep.subr.bf16.mxu1 %v9700_v20  ;;  %v9779_v49 = vld [vmem:[#allocation12 + $0x7e0] ss:$16 sps:$4 sm:$0xff]   ;;  %v9782_v59 = vld [vmem:[#allocation12 + $0x7e8] ss:$16 sps:$4 sm:$0xff]  }
 0x499   : > { %v10294_v20 = vld [vmem:[#allocation3 + $0x10] sm:$0xff] }
 0x49b   : > { %4529 = vmatpush1.bf16.msra.mxu0 %v9695_v2  ;;  %4570 = vmatpush1.bf16.msra.mxu1 %v9698_v62  ;;  %v4612_v2 = vpack.c.bf16 %v10294_v20, %v4610_v58  ;;  %v9787_v62 = vld [vmem:[#allocation12 + $0x7c4] ss:$16 sps:$4 sm:$0xff]  }
 0x49c   : > { %4530 = vmatprep.subr.bf16.mxu0 %v9703_v12  ;;  %4571 = vmatprep.subr.bf16.mxu1 %v9706_v63  ;;  %v9790_v12 = vld [vmem:[#allocation12 + $0x7cc] ss:$16 sps:$4 sm:$0xff]  }
 0x49f   : > { %4531 = vmatpush1.bf16.msra.mxu0 %v9701_v1  ;;  %4572 = vmatpush1.bf16.msra.mxu1 %v9704_v15  ;;  %v9785_v15 = vld [vmem:[#allocation12 + $0x7c0] ss:$16 sps:$4 sm:$0xff]  }
 0x4a0   : > { %4532 = vmatprep.subr.bf16.mxu0 %v9709_v3  ;;  %4573 = vmatprep.subr.bf16.mxu1 %v9712_v8  ;;  %v9788_v3 = vld [vmem:[#allocation12 + $0x7c8] ss:$16 sps:$4 sm:$0xff]  }
 0x4a3   : > { %4533 = vmatpush1.bf16.msra.mxu0 %v9707_v61  ;;  %4574 = vmatpush1.bf16.msra.mxu1 %v9710_v37  ;;  %v9793_v37 = vld [vmem:[#allocation12 + $0x7a4] ss:$16 sps:$4 sm:$0xff]  }
 0x4a4   : > { %4534 = vmatprep.subr.bf16.mxu0 %v9715_v17  ;;  %4575 = vmatprep.subr.bf16.mxu1 %v9718_v6  ;;  %v9796_v17 = vld [vmem:[#allocation12 + $0x7ac] ss:$16 sps:$4 sm:$0xff]  }
 0x4a7   : > { %4535 = vmatpush1.bf16.msra.mxu0 %v9713_v44  ;;  %4576 = vmatpush1.bf16.msra.mxu1 %v9716_v23  ;;  %v9791_v23 = vld [vmem:[#allocation12 + $0x7a0] ss:$16 sps:$4 sm:$0xff]  }
 0x4a8   : > { %4536 = vmatprep.subr.bf16.mxu0 %v9721_v25  ;;  %4577 = vmatprep.subr.bf16.mxu1 %v9724_v13  ;;  %v9794_v25 = vld [vmem:[#allocation12 + $0x7a8] ss:$16 sps:$4 sm:$0xff]  }
 0x4ab   : > { %4537 = vmatpush1.bf16.msra.mxu0 %v9719_v10  ;;  %4578 = vmatpush1.bf16.msra.mxu1 %v9722_v31  ;;  %v9799_v31 = vld [vmem:[#allocation12 + $0x784] ss:$16 sps:$4 sm:$0xff]  }
 0x4ac   : > { %4538 = vmatprep.subr.bf16.mxu0 %v9727_v5  ;;  %4579 = vmatprep.subr.bf16.mxu1 %v9730_v30  ;;  %v9802_v5 = vld [vmem:[#allocation12 + $0x78c] ss:$16 sps:$4 sm:$0xff]   ;;  %v9797_v30 = vld [vmem:[#allocation12 + $0x780] ss:$16 sps:$4 sm:$0xff]  }
 0x4af   : > { %4539 = vmatpush1.bf16.msra.mxu0 %v9725_v18  ;;  %4580 = vmatpush1.bf16.msra.mxu1 %v9728_v19  ;;  %v9800_v18 = vld [vmem:[#allocation12 + $0x788] ss:$16 sps:$4 sm:$0xff]   ;;  %v9805_v19 = vld [vmem:[#allocation12 + $0x764] ss:$16 sps:$4 sm:$0xff]  }
 0x4b0   : > { %4806 = vmatprep.subr.bf16.mxu0 %v9733_v51  ;;  %4847 = vmatprep.subr.bf16.mxu1 %v9736_v35  ;;  %v9808_v51 = vld [vmem:[#allocation12 + $0x76c] ss:$16 sps:$4 sm:$0xff]   ;;  %v9803_v35 = vld [vmem:[#allocation12 + $0x760] ss:$16 sps:$4 sm:$0xff]  }
 0x4b2   : > { %4557 = vmatmul.mubr.bf16.vlgmr.msra.gmra.mxu0 %v4330_v14  ;;  %4598 = vmatmul.mubr.bf16.vlgmr.msra.gmra.mxu1 %v4330_v14  ;;  %v9812_v14 = vld [vmem:[#allocation12 + $0x748] ss:$16 sps:$4 sm:$0xff]  }
 0x4b3   : > { %4807 = vmatpush1.bf16.msra.mxu0 %v9731_v16  ;;  %4848 = vmatpush1.bf16.msra.mxu1 %v9734_v54  ;;  %v9814_v16 = vld [vmem:[#allocation12 + $0x74c] ss:$16 sps:$4 sm:$0xff]   ;;  %v9809_v54 = vld [vmem:[#allocation12 + $0x740] ss:$16 sps:$4 sm:$0xff]  }
 0x4b4   : > { %4808 = vmatprep.subr.bf16.mxu0 %v9739_v47  ;;  %4849 = vmatprep.subr.bf16.mxu1 %v9742_v27  ;;  %v9817_v47 = vld [vmem:[#allocation12 + $0x724] ss:$16 sps:$4 sm:$0xff]   ;;  %v9820_v27 = vld [vmem:[#allocation12 + $0x72c] ss:$16 sps:$4 sm:$0xff]  }
 0x4b5   : > { %4838 = vmatprep.mubr.bf16.mxu0 %v10686_v9  ;;  %4879 = vmatprep.mubr.bf16.mxu1 %v10686_v9 }
 0x4b7   : > { %4809 = vmatpush1.bf16.msra.mxu0 %v9737_v28  ;;  %4850 = vmatpush1.bf16.msra.mxu1 %v9740_v26  ;;  %v9815_v28 = vld [vmem:[#allocation12 + $0x720] ss:$16 sps:$4 sm:$0xff]   ;;  %v9818_v26 = vld [vmem:[#allocation12 + $0x728] ss:$16 sps:$4 sm:$0xff]  }
 0x4b8   : > { %4810 = vmatprep.subr.bf16.mxu0 %v9745_v60  ;;  %4851 = vmatprep.subr.bf16.mxu1 %v9748_v55  ;;  %v9823_v60 = vld [vmem:[#allocation12 + $0x704] ss:$16 sps:$4 sm:$0xff]   ;;  %v9826_v55 = vld [vmem:[#allocation12 + $0x70c] ss:$16 sps:$4 sm:$0xff]  }
 0x4bb   : > { %4811 = vmatpush1.bf16.msra.mxu0 %v9743_v32  ;;  %4852 = vmatpush1.bf16.msra.mxu1 %v9746_v7  ;;  %v9821_v32 = vld [vmem:[#allocation12 + $0x700] ss:$16 sps:$4 sm:$0xff]   ;;  %v9824_v7 = vld [vmem:[#allocation12 + $0x708] ss:$16 sps:$4 sm:$0xff]  }
 0x4bc   : > { %4812 = vmatprep.subr.bf16.mxu0 %v9751_v33  ;;  %4853 = vmatprep.subr.bf16.mxu1 %v9754_v34  ;;  %v9829_v33 = vld [vmem:[#allocation12 + $0x8e4] ss:$16 sps:$4 sm:$0xff]   ;;  %v9832_v34 = vld [vmem:[#allocation12 + $0x8ec] ss:$16 sps:$4 sm:$0xff]  }
 0x4bf   : > { %4813 = vmatpush1.bf16.msra.mxu0 %v9749_v4  ;;  %4854 = vmatpush1.bf16.msra.mxu1 %v9752_v45  ;;  %v4892_v4 = vld [vmem:[#allocation3 + $0x9] sm:$0xff]  ;;  %v4893_v45 = vld [vmem:[#allocation3 + $0x11] sm:$0xff] }
 0x4c0   : > { %4814 = vmatprep.subr.bf16.mxu0 %v9757_v36  ;;  %4855 = vmatprep.subr.bf16.mxu1 %v9760_v38  ;;  %v9827_v36 = vld [vmem:[#allocation12 + $0x8e0] ss:$16 sps:$4 sm:$0xff]   ;;  %v9830_v38 = vld [vmem:[#allocation12 + $0x8e8] ss:$16 sps:$4 sm:$0xff]  }
 0x4c3   : > { %4815 = vmatpush1.bf16.msra.mxu0 %v9755_v11  ;;  %4856 = vmatpush1.bf16.msra.mxu1 %v9758_v56  ;;  %v4894_v11 = vpack.c.bf16 %v4893_v45, %v4892_v4  ;;  %v9835_v56 = vld [vmem:[#allocation12 + $0x8c4] ss:$16 sps:$4 sm:$0xff]  }
 0x4c4   : > { %4816 = vmatprep.subr.bf16.mxu0 %v9763_v39  ;;  %4857 = vmatprep.subr.bf16.mxu1 %v9766_v21  ;;  %v9838_v39 = vld [vmem:[#allocation12 + $0x8cc] ss:$16 sps:$4 sm:$0xff]  }
 0x4c7   : > { %4817 = vmatpush1.bf16.msra.mxu0 %v9761_v22  ;;  %4858 = vmatpush1.bf16.msra.mxu1 %v9764_v41 }
 0x4c8   : > { %4818 = vmatprep.subr.bf16.mxu0 %v9769_v43  ;;  %4859 = vmatprep.subr.bf16.mxu1 %v9772_v42  ;;  %v9833_v42 = vld [vmem:[#allocation12 + $0x8c0] ss:$16 sps:$4 sm:$0xff]  }
 0x4cb   : > { %4819 = vmatpush1.bf16.msra.mxu0 %v9767_v46  ;;  %4860 = vmatpush1.bf16.msra.mxu1 %v9770_v0  ;;  %v9836_v46 = vld [vmem:[#allocation12 + $0x8c8] ss:$16 sps:$4 sm:$0xff]  }
 0x4cc   : > { %4820 = vmatprep.subr.bf16.mxu0 %v9775_v57  ;;  %4861 = vmatprep.subr.bf16.mxu1 %v9778_v48  ;;  %v9841_v48 = vld [vmem:[#allocation12 + $0x8a4] ss:$16 sps:$4 sm:$0xff]  }
 0x4cf   : > { %4821 = vmatpush1.bf16.msra.mxu0 %v9773_v53  ;;  %4862 = vmatpush1.bf16.msra.mxu1 %v9776_v52  ;;  %v9844_v53 = vld [vmem:[#allocation12 + $0x8ac] ss:$16 sps:$4 sm:$0xff]  }
 0x4d0   : > { %5088 = vmatprep.subr.bf16.mxu0 %v9781_v50  ;;  %5129 = vmatprep.subr.bf16.mxu1 %v9784_v24 }
 0x4d2   : > { %4839 = vmatmul.mubr.bf16.vlgmr.msra.gmra.mxu0 %v4612_v2  ;;  %4880 = vmatmul.mubr.bf16.vlgmr.msra.gmra.mxu1 %v4612_v2  ;;  %v11651_v63 = vpop.f32.mrf.mxu0  ;;  %v11653_v1 = vpop.f32.mrf.mxu1 }
 0x4d3   : > { %5089 = vmatpush1.bf16.msra.mxu0 %v9779_v49  ;;  %5130 = vmatpush1.bf16.msra.mxu1 %v9782_v59  ;;  %v9839_v49 = vld [vmem:[#allocation12 + $0x8a0] ss:$16 sps:$4 sm:$0xff]   ;;  %v9842_v59 = vld [vmem:[#allocation12 + $0x8a8] ss:$16 sps:$4 sm:$0xff]  }
 0x4d4   : > { %v11655_v8 = vpop.f32.mrf.mxu0  ;;  %v11657_v61 = vpop.f32.mrf.mxu1  ;;  %5090 = vmatprep.subr.bf16.mxu0 %v9787_v62  ;;  %5131 = vmatprep.subr.bf16.mxu1 %v9790_v12  ;;  %v9847_v62 = vld [vmem:[#allocation12 + $0x884] ss:$16 sps:$4 sm:$0xff]   ;;  %v9850_v12 = vld [vmem:[#allocation12 + $0x88c] ss:$16 sps:$4 sm:$0xff]  }
 0x4d5   : > { %5120 = vmatprep.mubr.bf16.mxu0 %v10686_v9  ;;  %5161 = vmatprep.mubr.bf16.mxu1 %v10686_v9 }
 0x4d6   : > { %v3196_v6 = vpop.f32.mrf.mxu0  ;;  %v3237_v44 = vpop.f32.mrf.mxu1 }
 0x4d7   : > { %5091 = vmatpush1.bf16.msra.mxu0 %v9785_v15  ;;  %5132 = vmatpush1.bf16.msra.mxu1 %v9788_v3  ;;  %v9853_v15 = vld [vmem:[#allocation12 + $0x864] ss:$16 sps:$4 sm:$0xff]   ;;  %v9851_v3 = vld [vmem:[#allocation12 + $0x860] ss:$16 sps:$4 sm:$0xff]   ;;  %v9860_v6 = vld [vmem:[#allocation12 + $0x848] ss:$16 sps:$4 sm:$0xff]  }
 0x4d8   : > { %v3197_v13 = vpop.f32.mrf.mxu0  ;;  %v3238_v10 = vpop.f32.mrf.mxu1  ;;  %5092 = vmatprep.subr.bf16.mxu0 %v9793_v37  ;;  %5133 = vmatprep.subr.bf16.mxu1 %v9796_v17  ;;  %v9862_v37 = vld [vmem:[#allocation12 + $0x84c] ss:$16 sps:$4 sm:$0xff]   ;;  %v9857_v17 = vld [vmem:[#allocation12 + $0x840] ss:$16 sps:$4 sm:$0xff]   ;;  %v9865_v44 = vld [vmem:[#allocation12 + $0x824] ss:$16 sps:$4 sm:$0xff]  }
 0x4d9   : > { %v9866_v13 = vld [vmem:[#allocation12 + $0x828] ss:$16 sps:$4 sm:$0xff]   ;;  %v9871_v10 = vld [vmem:[#allocation12 + $0x804] ss:$16 sps:$4 sm:$0xff]  }
 0x4db   : > { %5093 = vmatpush1.bf16.msra.mxu0 %v9791_v23  ;;  %5134 = vmatpush1.bf16.msra.mxu1 %v9794_v25  ;;  %v9868_v23 = vld [vmem:[#allocation12 + $0x82c] ss:$16 sps:$4 sm:$0xff]   ;;  %v9863_v25 = vld [vmem:[#allocation12 + $0x820] ss:$16 sps:$4 sm:$0xff]  }
 0x4dc   : > { %5094 = vmatprep.subr.bf16.mxu0 %v9799_v31  ;;  %5135 = vmatprep.subr.bf16.mxu1 %v9802_v5  ;;  %v9874_v31 = vld [vmem:[#allocation12 + $0x80c] ss:$16 sps:$4 sm:$0xff]   ;;  %v9869_v5 = vld [vmem:[#allocation12 + $0x800] ss:$16 sps:$4 sm:$0xff]  }
 0x4df   : > { %5095 = vmatpush1.bf16.msra.mxu0 %v9797_v30  ;;  %5136 = vmatpush1.bf16.msra.mxu1 %v9800_v18  ;;  %v9872_v30 = vld [vmem:[#allocation12 + $0x808] ss:$16 sps:$4 sm:$0xff]  }
 0x4e0   : > { %5096 = vmatprep.subr.bf16.mxu0 %v9805_v19  ;;  %5137 = vmatprep.subr.bf16.mxu1 %v9808_v51  ;;  %v5174_v18 = vld [vmem:[#allocation3 + $0xa] sm:$0xff]  ;;  %v5175_v19 = vld [vmem:[#allocation3 + $0x12] sm:$0xff] }
 0x4e1   : > { %v5176_v51 = vpack.c.bf16 %v5175_v19, %v5174_v18 }
 0x4e3   : > { %5097 = vmatpush1.bf16.msra.mxu0 %v9803_v35  ;;  %5138 = vmatpush1.bf16.msra.mxu1 %v9806_v40 }
 0x4e4   : > { %5098 = vmatprep.subr.bf16.mxu0 %v9811_v29  ;;  %5139 = vmatprep.subr.bf16.mxu1 %v9814_v16 }
 0x4e7   : > { %5099 = vmatpush1.bf16.msra.mxu0 %v9809_v54  ;;  %5140 = vmatpush1.bf16.msra.mxu1 %v9812_v14 }
 0x4e8   : > { %5100 = vmatprep.subr.bf16.mxu0 %v9817_v47  ;;  %5141 = vmatprep.subr.bf16.mxu1 %v9820_v27 }
 0x4eb   : > { %5101 = vmatpush1.bf16.msra.mxu0 %v9815_v28  ;;  %5142 = vmatpush1.bf16.msra.mxu1 %v9818_v26 }
 0x4ec   : > { %5102 = vmatprep.subr.bf16.mxu0 %v9823_v60  ;;  %5143 = vmatprep.subr.bf16.mxu1 %v9826_v55 }
 0x4ef   : > { %5103 = vmatpush1.bf16.msra.mxu0 %v9821_v32  ;;  %5144 = vmatpush1.bf16.msra.mxu1 %v9824_v7  ;;  %v9875_v32 = vld [vmem:[%s12180_s7 + $0xe0] ss:$16 sps:$4 sm:$0xff]   ;;  %v9877_v7 = vld [vmem:[%s12180_s7 + $0xe4] ss:$16 sps:$4 sm:$0xff]  }
 0x4f0   : > { %5370 = vmatprep.subr.bf16.mxu0 %v9829_v33  ;;  %5411 = vmatprep.subr.bf16.mxu1 %v9832_v34  ;;  %v9878_v33 = vld [vmem:[%s12180_s7 + $0x2e0] ss:$16 sps:$4 sm:$0xff]   ;;  %v9880_v34 = vld [vmem:[%s12180_s7 + $0x2e4] ss:$16 sps:$4 sm:$0xff]  }
 0x4f2   : > { %v3434_v21 = vpop.f32.mrf.mxu0  ;;  %v3475_v22 = vpop.f32.mrf.mxu1  ;;  %5121 = vmatmul.mubr.bf16.vlgmr.msra.gmra.mxu0 %v4894_v11  ;;  %5162 = vmatmul.mubr.bf16.vlgmr.msra.gmra.mxu1 %v4894_v11  ;;  %v9881_v11 = vld [vmem:[%s12180_s7 + $0xc0] ss:$16 sps:$4 sm:$0xff]  }
 0x4f3   : > { %v11662_v41 = vadd.f32 %v3434_v21, %v11651_v63  ;;  %v11665_v43 = vadd.f32 %v3475_v22, %v11653_v1  ;;  %5371 = vmatpush1.bf16.msra.mxu0 %v9827_v36  ;;  %5412 = vmatpush1.bf16.msra.mxu1 %v9830_v38  ;;  %v9845_v63 = vld [vmem:[#allocation12 + $0x880] ss:$16 sps:$4 sm:$0xff]   ;;  %v9848_v1 = vld [vmem:[#allocation12 + $0x888] ss:$16 sps:$4 sm:$0xff]  }
 0x4f4   : > { %v3436_v0 = vpop.f32.mrf.mxu0  ;;  %v3477_v57 = vpop.f32.mrf.mxu1  ;;  %5372 = vmatprep.subr.bf16.mxu0 %v9835_v56  ;;  %5413 = vmatprep.subr.bf16.mxu1 %v9838_v39  ;;  %v9883_v56 = vld [vmem:[%s12180_s7 + $0xc4] ss:$16 sps:$4 sm:$0xff]   ;;  %v9884_v39 = vld [vmem:[%s12180_s7 + $0x2c0] ss:$16 sps:$4 sm:$0xff]  }
 0x4f5   : > { %v11668_v52 = vadd.f32 %v3436_v0, %v11655_v8  ;;  %v11671_v50 = vadd.f32 %v3477_v57, %v11657_v61  ;;  %5402 = vmatprep.mubr.bf16.mxu0 %v10686_v9  ;;  %5443 = vmatprep.mubr.bf16.mxu1 %v10686_v9  ;;  %v9856_v9 = vld [vmem:[#allocation12 + $0x86c] ss:$16 sps:$4 sm:$0xff]   ;;  %v9854_v8 = vld [vmem:[#allocation12 + $0x868] ss:$16 sps:$4 sm:$0xff]   ;;  %v9859_v61 = vld [vmem:[#allocation12 + $0x844] ss:$16 sps:$4 sm:$0xff]  }
 0x4f6   : > { %v3438_v24 = vpop.f32.mrf.mxu0  ;;  %v3479_v58 = vpop.f32.mrf.mxu1  ;;  %v9887_v57 = vld [vmem:[%s12180_s7 + $0xa0] ss:$16 sps:$4 sm:$0xff]  }
 0x4f7   : > { %5373 = vmatpush1.bf16.msra.mxu0 %v9833_v42  ;;  %5414 = vmatpush1.bf16.msra.mxu1 %v9836_v46  ;;  %v9895_v58 = vld [vmem:[%s12180_s7 + $0x84] ss:$16 sps:$4 sm:$0xff]  }
 0x4f8   : > { %v3439_v20 = vpop.f32.mrf.mxu0  ;;  %v3480_v2 = vpop.f32.mrf.mxu1  ;;  %5374 = vmatprep.subr.bf16.mxu0 %v9841_v48  ;;  %5415 = vmatprep.subr.bf16.mxu1 %v9844_v53  ;;  %v9889_v48 = vld [vmem:[%s12180_s7 + $0xa4] ss:$16 sps:$4 sm:$0xff]   ;;  %v9890_v53 = vld [vmem:[%s12180_s7 + $0x2a0] ss:$16 sps:$4 sm:$0xff]  }
 0x4f9   : > { %v9896_v20 = vld [vmem:[%s12180_s7 + $0x280] ss:$16 sps:$4 sm:$0xff]   ;;  %v9901_v2 = vld [vmem:[%s12180_s7 + $0x64] ss:$16 sps:$4 sm:$0xff]  }
 0x4fb   : > { %5375 = vmatpush1.bf16.msra.mxu0 %v9839_v49  ;;  %5416 = vmatpush1.bf16.msra.mxu1 %v9842_v59  ;;  %v9898_v49 = vld [vmem:[%s12180_s7 + $0x284] ss:$16 sps:$4 sm:$0xff]   ;;  %v9893_v59 = vld [vmem:[%s12180_s7 + $0x80] ss:$16 sps:$4 sm:$0xff]  }
 0x4fc   : > { %5376 = vmatprep.subr.bf16.mxu0 %v9847_v62  ;;  %5417 = vmatprep.subr.bf16.mxu1 %v9850_v12  ;;  %v9904_v62 = vld [vmem:[%s12180_s7 + $0x264] ss:$16 sps:$4 sm:$0xff]   ;;  %v9899_v12 = vld [vmem:[%s12180_s7 + $0x60] ss:$16 sps:$4 sm:$0xff]  }
 0x4ff   : > { %5377 = vmatpush1.bf16.msra.mxu0 %v9845_v63  ;;  %5418 = vmatpush1.bf16.msra.mxu1 %v9848_v1  ;;  %v9902_v63 = vld [vmem:[%s12180_s7 + $0x260] ss:$16 sps:$4 sm:$0xff]   ;;  %v9907_v1 = vld [vmem:[%s12180_s7 + $0x44] ss:$16 sps:$4 sm:$0xff]  }
 0x500   : > { %5378 = vmatprep.subr.bf16.mxu0 %v9853_v15  ;;  %5419 = vmatprep.subr.bf16.mxu1 %v9856_v9  ;;  %v9910_v15 = vld [vmem:[%s12180_s7 + $0x244] ss:$16 sps:$4 sm:$0xff]   ;;  %v9905_v9 = vld [vmem:[%s12180_s7 + $0x40] ss:$16 sps:$4 sm:$0xff]  }
 0x503   : > { %5379 = vmatpush1.bf16.msra.mxu0 %v9851_v3  ;;  %5420 = vmatpush1.bf16.msra.mxu1 %v9854_v8  ;;  %v9908_v3 = vld [vmem:[%s12180_s7 + $0x240] ss:$16 sps:$4 sm:$0xff]   ;;  %v9913_v8 = vld [vmem:[%s12180_s7 + $0x24] ss:$16 sps:$4 sm:$0xff]  }
 0x504   : > { %5380 = vmatprep.subr.bf16.mxu0 %v9859_v61  ;;  %5421 = vmatprep.subr.bf16.mxu1 %v9862_v37  ;;  %v9916_v61 = vld [vmem:[%s12180_s7 + $0x224] ss:$16 sps:$4 sm:$0xff]   ;;  %v9911_v37 = vld [vmem:[%s12180_s7 + $0x20] ss:$16 sps:$4 sm:$0xff]  }
 0x507   : > { %5381 = vmatpush1.bf16.msra.mxu0 %v9857_v17  ;;  %5422 = vmatpush1.bf16.msra.mxu1 %v9860_v6  ;;  %v9914_v17 = vld [vmem:[%s12180_s7 + $0x220] ss:$16 sps:$4 sm:$0xff]   ;;  %v9919_v6 = vld [vmem:[%s12180_s7 + $0x4] ss:$16 sps:$4 sm:$0xff]  }
 0x508   : > { %5382 = vmatprep.subr.bf16.mxu0 %v9865_v44  ;;  %5423 = vmatprep.subr.bf16.mxu1 %v9868_v23  ;;  %v9922_v44 = vld [vmem:[%s12180_s7 + $0x204] ss:$16 sps:$4 sm:$0xff]   ;;  %v9917_v23 = vld [vmem:[%s12180_s7] ss:$16 sps:$4 sm:$0xff]  }
 0x50b   : > { %5383 = vmatpush1.bf16.msra.mxu0 %v9863_v25  ;;  %5424 = vmatpush1.bf16.msra.mxu1 %v9866_v13  ;;  %v9920_v25 = vld [vmem:[%s12180_s7 + $0x200] ss:$16 sps:$4 sm:$0xff]   ;;  %v9925_v13 = vld [vmem:[%s12180_s7 + $0x1e4] ss:$16 sps:$4 sm:$0xff]  }
 0x50c   : > { %5384 = vmatprep.subr.bf16.mxu0 %v9871_v10  ;;  %5425 = vmatprep.subr.bf16.mxu1 %v9874_v31  ;;  %v9928_v10 = vld [vmem:[%s12180_s7 + $0x3e4] ss:$16 sps:$4 sm:$0xff]   ;;  %v9923_v31 = vld [vmem:[%s12180_s7 + $0x1e0] ss:$16 sps:$4 sm:$0xff]  }
 0x50f   : > { %5385 = vmatpush1.bf16.msra.mxu0 %v9869_v5  ;;  %5426 = vmatpush1.bf16.msra.mxu1 %v9872_v30  ;;  %v9926_v5 = vld [vmem:[%s12180_s7 + $0x3e0] ss:$16 sps:$4 sm:$0xff]  }
 0x510   : > { %6324 = vmatprep.subr.bf16.mxu0 %v9877_v7  ;;  %6365 = vmatprep.subr.bf16.mxu1 %v9880_v34  ;;  %v9940_v7 = vld [vmem:[%s12180_s7 + $0x3a4] ss:$16 sps:$4 sm:$0xff]   ;;  %v9938_v34 = vld [vmem:[%s12180_s7 + $0x3a0] ss:$16 sps:$4 sm:$0xff]  }
 0x512   : > { %v3712_v35 = vpop.f32.mrf.mxu0  ;;  %v3753_v40 = vpop.f32.mrf.mxu1  ;;  %5403 = vmatmul.mubr.bf16.vlgmr.msra.gmra.mxu0 %v5176_v51  ;;  %5444 = vmatmul.mubr.bf16.vlgmr.msra.gmra.mxu1 %v5176_v51 }
 0x513   : > { %v3760_v29 = vadd.f32 %v3712_v35, %v11662_v41  ;;  %v3762_v16 = vadd.f32 %v3753_v40, %v11665_v43  ;;  %6325 = vmatpush1.bf16.msra.mxu0 %v9875_v32  ;;  %6366 = vmatpush1.bf16.msra.mxu1 %v9878_v33  ;;  %v9886_v41 = vld [vmem:[%s12180_s7 + $0x2c4] ss:$16 sps:$4 sm:$0xff]   ;;  %v9935_v33 = vld [vmem:[%s12180_s7 + $0x1a0] ss:$16 sps:$4 sm:$0xff]  }
 0x514   : > { %v3714_v54 = vpop.f32.mrf.mxu0  ;;  %v3755_v14 = vpop.f32.mrf.mxu1  ;;  %6326 = vmatprep.subr.bf16.mxu0 %v9883_v56  ;;  %6367 = vmatprep.subr.bf16.mxu1 %v9886_v41  ;;  %v9937_v32 = vld [vmem:[%s12180_s7 + $0x1a4] ss:$16 sps:$4 sm:$0xff]  }
 0x515   : > { %v3761_v47 = vadd.f32 %v3714_v54, %v11668_v52  ;;  %v3763_v27 = vadd.f32 %v3755_v14, %v11671_v50  ;;  %v9892_v52 = vld [vmem:[%s12180_s7 + $0x2a4] ss:$16 sps:$4 sm:$0xff]  }
 0x516   : > { %v3716_v28 = vpop.f32.mrf.mxu0  ;;  %v3757_v26 = vpop.f32.mrf.mxu1  ;;  %v9931_v54 = vld [vmem:[%s12180_s7 + $0x1c4] ss:$16 sps:$4 sm:$0xff]  }
 0x517   : > { %6327 = vmatpush1.bf16.msra.mxu0 %v9881_v11  ;;  %6368 = vmatpush1.bf16.msra.mxu1 %v9884_v39  ;;  %v9934_v14 = vld [vmem:[%s12180_s7 + $0x3c4] ss:$16 sps:$4 sm:$0xff]   ;;  %v9929_v28 = vld [vmem:[%s12180_s7 + $0x1c0] ss:$16 sps:$4 sm:$0xff]  }
 0x518   : > { %v3717_v60 = vpop.f32.mrf.mxu0  ;;  %v3758_v55 = vpop.f32.mrf.mxu1  ;;  %6328 = vmatprep.subr.bf16.mxu0 %v9889_v48  ;;  %6369 = vmatprep.subr.bf16.mxu1 %v9892_v52  ;;  %v9932_v26 = vld [vmem:[%s12180_s7 + $0x3c0] ss:$16 sps:$4 sm:$0xff]   ;;  %v9949_v11 = vld [vmem:[%s12180_s7 + $0x164] ss:$16 sps:$4 sm:$0xff]  }
 0x519   : > { %v9952_v56 = vld [vmem:[%s12180_s7 + $0x364] ss:$16 sps:$4 sm:$0xff]   ;;  %v9947_v39 = vld [vmem:[%s12180_s7 + $0x160] ss:$16 sps:$4 sm:$0xff]  }
 0x51a   : > { %v9958_v41 = vld [vmem:[%s12180_s7 + $0x344] ss:$16 sps:$4 sm:$0xff]  }
 0x51b   : > { %6329 = vmatpush1.bf16.msra.mxu0 %v9887_v57  ;;  %6370 = vmatpush1.bf16.msra.mxu1 %v9890_v53  ;;  %v9962_v57 = vld [vmem:[%s12180_s7 + $0x320] ss:$16 sps:$4 sm:$0xff]   ;;  %v9964_v48 = vld [vmem:[%s12180_s7 + $0x324] ss:$16 sps:$4 sm:$0xff]  }
 0x51c   : > { %6330 = vmatprep.subr.bf16.mxu0 %v9895_v58  ;;  %6371 = vmatprep.subr.bf16.mxu1 %v9898_v49  ;;  %v9967_v53 = vld [vmem:[%s12180_s7 + $0x104] ss:$16 sps:$4 sm:$0xff]   ;;  %v9973_v58 = vld [vmem:[%s12180_s7 + $0xec] ss:$16 sps:$4 sm:$0xff]  }
 0x51d   : > { %v9970_v52 = vld [vmem:[%s12180_s7 + $0x304] ss:$16 sps:$4 sm:$0xff]   ;;  %v9976_v49 = vld [vmem:[%s12180_s7 + $0x2ec] ss:$16 sps:$4 sm:$0xff]  }
 0x51f   : > { %6331 = vmatpush1.bf16.msra.mxu0 %v9893_v59  ;;  %6372 = vmatpush1.bf16.msra.mxu1 %v9896_v20 }
 0x520   : > { %6332 = vmatprep.subr.bf16.mxu0 %v9901_v2  ;;  %6373 = vmatprep.subr.bf16.mxu1 %v9904_v62 }
 0x523   : > { %6333 = vmatpush1.bf16.msra.mxu0 %v9899_v12  ;;  %6374 = vmatpush1.bf16.msra.mxu1 %v9902_v63 }
 0x524   : > { %6334 = vmatprep.subr.bf16.mxu0 %v9907_v1  ;;  %6375 = vmatprep.subr.bf16.mxu1 %v9910_v15 }
 0x527   : > { %6335 = vmatpush1.bf16.msra.mxu0 %v9905_v9  ;;  %6376 = vmatpush1.bf16.msra.mxu1 %v9908_v3 }
 0x528   : > { %6336 = vmatprep.subr.bf16.mxu0 %v9913_v8  ;;  %6377 = vmatprep.subr.bf16.mxu1 %v9916_v61 }
 0x52b   : > { %6337 = vmatpush1.bf16.msra.mxu0 %v9911_v37  ;;  %6378 = vmatpush1.bf16.msra.mxu1 %v9914_v17 }
 0x52c   : > { %6338 = vmatprep.subr.bf16.mxu0 %v9919_v6  ;;  %6379 = vmatprep.subr.bf16.mxu1 %v9922_v44 }
 0x52f   : > { %6339 = vmatpush1.bf16.msra.mxu0 %v9917_v23  ;;  %6380 = vmatpush1.bf16.msra.mxu1 %v9920_v25 }
 0x530   : > { %6340 = vmatprep.subr.bf16.mxu0 %v9925_v13  ;;  %6381 = vmatprep.subr.bf16.mxu1 %v9928_v10 }
 0x532   : > { %v3994_v4 = vpop.f32.mrf.mxu0  ;;  %v4035_v45 = vpop.f32.mrf.mxu1 }
 0x533   : > { %v11691_v36 = vadd.f32 %v3994_v4, %v3760_v29  ;;  %v11693_v38 = vadd.f32 %v4035_v45, %v3762_v16  ;;  %6341 = vmatpush2.bf16.msra.mxu0 %v9923_v31  ;;  %6382 = vmatpush2.bf16.msra.mxu1 %v9926_v5  ;;  %v9943_v4 = vld [vmem:[%s12180_s7 + $0x184] ss:$16 sps:$4 sm:$0xff]  }
 0x534   : > { %v3996_v21 = vpop.f32.mrf.mxu0  ;;  %v4037_v22 = vpop.f32.mrf.mxu1  ;;  %6342 = vmatprep.subr.bf16.mxu0 %v9931_v54  ;;  %6383 = vmatprep.subr.bf16.mxu1 %v9934_v14  ;;  %v9946_v45 = vld [vmem:[%s12180_s7 + $0x384] ss:$16 sps:$4 sm:$0xff]  }
 0x535   : > { %v11707_v43 = vadd.f32 %v3996_v21, %v3761_v47  ;;  %v11709_v42 = vadd.f32 %v4037_v22, %v3763_v27  ;;  %v9950_v21 = vld [vmem:[%s12180_s7 + $0x360] ss:$16 sps:$4 sm:$0xff]   ;;  %v9955_v22 = vld [vmem:[%s12180_s7 + $0x144] ss:$16 sps:$4 sm:$0xff]  }
 0x536   : > { %v3998_v46 = vpop.f32.mrf.mxu0  ;;  %v4039_v0 = vpop.f32.mrf.mxu1 }
 0x537   : > { %6343 = vmatpush2.bf16.msra.mxu0 %v9929_v28  ;;  %6384 = vmatpush2.bf16.msra.mxu1 %v9932_v26  ;;  %v9959_v46 = vld [vmem:[%s12180_s7 + $0x120] ss:$16 sps:$4 sm:$0xff]   ;;  %v9961_v0 = vld [vmem:[%s12180_s7 + $0x124] ss:$16 sps:$4 sm:$0xff]  }
 0x538   : > { %v3999_v50 = vpop.f32.mrf.mxu0  ;;  %v4040_v24 = vpop.f32.mrf.mxu1  ;;  %6344 = vmatprep.subr.bf16.mxu0 %v9937_v32  ;;  %6385 = vmatprep.subr.bf16.mxu1 %v9940_v7 }
 0x539   : > { %v9965_v50 = vld [vmem:[%s12180_s7 + $0x100] ss:$16 sps:$4 sm:$0xff]  }
 0x53a   : > { %v9968_v24 = vld [vmem:[%s12180_s7 + $0x300] ss:$16 sps:$4 sm:$0xff]  }
 0x53b   : > { %6345 = vmatpush2.bf16.msra.mxu0 %v9935_v33  ;;  %6386 = vmatpush2.bf16.msra.mxu1 %v9938_v34 }
 0x53c   : > { %6346 = vmatprep.subr.bf16.mxu0 %v9943_v4  ;;  %6387 = vmatprep.subr.bf16.mxu1 %v9946_v45 }
 0x552   : > { %v4276_v30 = vpop.f32.mrf.mxu0  ;;  %v4317_v18 = vpop.f32.mrf.mxu1 }
 0x553   : > { %v11796_v19 = vadd.f32 %v4276_v30, %v11691_v36  ;;  %v11799_v51 = vadd.f32 %v4317_v18, %v11693_v38  ;;  %v9941_v36 = vld [vmem:[%s12180_s7 + $0x180] ss:$16 sps:$4 sm:$0xff]  }
 0x554   : > { %v4278_v35 = vpop.f32.mrf.mxu0  ;;  %v4319_v40 = vpop.f32.mrf.mxu1  ;;  %v9944_v38 = vld [vmem:[%s12180_s7 + $0x380] ss:$16 sps:$4 sm:$0xff]   ;;  %6347 = vmatpush2.bf16.msra.mxu0 %v9941_v36 }
 0x555   : > { %v11802_v29 = vadd.f32 %v4278_v35, %v11707_v43  ;;  %v11805_v16 = vadd.f32 %v4319_v40, %v11709_v42  ;;  %6388 = vmatpush2.bf16.msra.mxu1 %v9944_v38  ;;  %6348 = vmatprep.subr.bf16.mxu0 %v9949_v11  ;;  %v9953_v43 = vld [vmem:[%s12180_s7 + $0x140] ss:$16 sps:$4 sm:$0xff]  }
 0x556   : > { %v4280_v47 = vpop.f32.mrf.mxu0  ;;  %v4321_v27 = vpop.f32.mrf.mxu1  ;;  %6389 = vmatprep.subr.bf16.mxu1 %v9952_v56  ;;  %v9956_v42 = vld [vmem:[%s12180_s7 + $0x340] ss:$16 sps:$4 sm:$0xff]  }
 0x557   : > { %v5456_v47 = vld [vmem:[#allocation13] sm:$0xf] }
 0x558   : > { %v4281_v60 = vpop.f32.mrf.mxu0  ;;  %v4322_v55 = vpop.f32.mrf.mxu1  ;;  %6349 = vmatpush2.bf16.msra.mxu0 %v9947_v39 }
 0x559   : > { %6390 = vmatpush2.bf16.msra.mxu1 %v9950_v21  ;;  %6350 = vmatprep.subr.bf16.mxu0 %v9955_v22 }
 0x55a   : > { %6391 = vmatprep.subr.bf16.mxu1 %v9958_v41 }
 0x55c   : > { %6351 = vmatpush2.bf16.msra.mxu0 %v9953_v43 }
 0x55d   : > { %6392 = vmatpush2.bf16.msra.mxu1 %v9956_v42  ;;  %6352 = vmatprep.subr.bf16.mxu0 %v9961_v0 }
 0x55e   : > { %6393 = vmatprep.subr.bf16.mxu1 %v9964_v48 }
 0x560   : > { %6353 = vmatpush2.bf16.msra.mxu0 %v9959_v46 }
 0x561   : > { %6394 = vmatpush2.bf16.msra.mxu1 %v9962_v57  ;;  %6354 = vmatprep.subr.bf16.mxu0 %v9967_v53 }
 0x562   : > { %6395 = vmatprep.subr.bf16.mxu1 %v9970_v52 }
 0x564   : > { %6355 = vmatpush2.bf16.msra.mxu0 %v9965_v50 }
 0x565   : > { %6396 = vmatpush2.bf16.msra.mxu1 %v9968_v24  ;;  %6406 = vmatprep.subr.bf16.mxu0 %v9973_v58 }
 0x566   : > { %6447 = vmatprep.subr.bf16.mxu1 %v9976_v49 }
 0x572   : > { %v4558_v59 = vpop.f32.mrf.mxu0  ;;  %v4599_v20 = vpop.f32.mrf.mxu1 }
 0x573   : > { %v4606_v2 = vadd.f32 %v4558_v59, %v11796_v19  ;;  %v4608_v62 = vadd.f32 %v4599_v20, %v11799_v51 }
 0x574   : > { %v4560_v12 = vpop.f32.mrf.mxu0  ;;  %v4601_v63 = vpop.f32.mrf.mxu1 }
 0x575   : > { %v4607_v1 = vadd.f32 %v4560_v12, %v11802_v29  ;;  %v4609_v15 = vadd.f32 %v4601_v63, %v11805_v16  ;;  %v5458_v29 = vlaneseq }
 0x576   : > { %v4562_v9 = vpop.f32.mrf.mxu0  ;;  %v4603_v3 = vpop.f32.mrf.mxu1 }
 0x577   : > { %v5459_v16 = vshrl.u32 %v5458_v29, 7 }
 0x578   : > { %v4563_v8 = vpop.f32.mrf.mxu0  ;;  %v4604_v61 = vpop.f32.mrf.mxu1 }
 0x579   : > { %v11901_v54 = vsub.s32 0, %v5459_v16  ;;  %v11903_v14 = vsub.s32 2, %v5459_v16  ;;  %v11905_v27 = vsub.s32 1, %v5459_v16  ;;  %v11907_v28 = vsub.s32 3, %v5459_v16 }
 0x57b   : > { %v5461_v55 = vrot.slane %v5456_v47, %v11901_v54  ;;  %v5469_v32 = vrot.slane %v5456_v47, %v11903_v14  ;;  %v5465_v38 = vrot.slane %v5456_v47, %v11905_v27  ;;  %v5473_v11 = vrot.slane %v5456_v47, %v11907_v28 }
 0x592   : > { %v4840_v37 = vpop.f32.mrf.mxu0  ;;  %v4881_v17 = vpop.f32.mrf.mxu1 }
 0x593   : > { %v4888_v26 = vadd.f32 %v4840_v37, %v4606_v2  ;;  %v4890_v60 = vadd.f32 %v4881_v17, %v4608_v62 }
 0x594   : > { %v4842_v6 = vpop.f32.mrf.mxu0  ;;  %v4883_v44 = vpop.f32.mrf.mxu1 }
 0x595   : > { %v4889_v7 = vadd.f32 %v4842_v6, %v4607_v1  ;;  %v4891_v33 = vadd.f32 %v4883_v44, %v4609_v15 }
 0x596   : > { %v4844_v23 = vpop.f32.mrf.mxu0  ;;  %v4885_v25 = vpop.f32.mrf.mxu1 }
 0x598   : > { %v4845_v13 = vpop.f32.mrf.mxu0  ;;  %v4886_v10 = vpop.f32.mrf.mxu1 }
 0x5b2   : > { %v5122_v31 = vpop.f32.mrf.mxu0  ;;  %v5163_v5 = vpop.f32.mrf.mxu1 }
 0x5b3   : > { %v5170_v34 = vadd.f32 %v5122_v31, %v4888_v26  ;;  %v5172_v4 = vadd.f32 %v5163_v5, %v4890_v60 }
 0x5b4   : > { %v5124_v30 = vpop.f32.mrf.mxu0  ;;  %v5165_v18 = vpop.f32.mrf.mxu1 }
 0x5b5   : > { %v5171_v56 = vadd.f32 %v5124_v30, %v4889_v7  ;;  %v5173_v39 = vadd.f32 %v5165_v18, %v4891_v33 }
 0x5b6   : > { %v5126_v19 = vpop.f32.mrf.mxu0  ;;  %v5167_v51 = vpop.f32.mrf.mxu1 }
 0x5b8   : > { %v5127_v35 = vpop.f32.mrf.mxu0  ;;  %v5168_v40 = vpop.f32.mrf.mxu1 }
 0x5d2   : > { %v5404_v45 = vpop.f32.mrf.mxu0  ;;  %v5445_v36 = vpop.f32.mrf.mxu1 }
 0x5d3   : > { %v5452_v21 = vadd.f32 %v5404_v45, %v5170_v34  ;;  %v5454_v22 = vadd.f32 %v5445_v36, %v5172_v4 }
 0x5d4   : > { %v5406_v41 = vpop.f32.mrf.mxu0  ;;  %v5447_v43 = vpop.f32.mrf.mxu1 }
 0x5d5   : > { %v5478_v42 = vadd.f32 %v5461_v55, %v5452_v21  ;;  %v5480_v46 = vadd.f32 %v5469_v32, %v5454_v22  ;;  %v5453_v0 = vadd.f32 %v5406_v41, %v5171_v56  ;;  %v5455_v57 = vadd.f32 %v5447_v43, %v5173_v39  ;;  %v9979_v21 = vld [vmem:[%s12180_s7 + $0xcc] ss:$16 sps:$4 sm:$0xff]   ;;  %v9977_v41 = vld [vmem:[%s12180_s7 + $0xc8] ss:$16 sps:$4 sm:$0xff]  }
 0x5d6   : > { %v5408_v48 = vpop.f32.mrf.mxu0  ;;  %v5449_v53 = vpop.f32.mrf.mxu1  ;;  %v9982_v22 = vld [vmem:[%s12180_s7 + $0x2cc] ss:$16 sps:$4 sm:$0xff]   ;;  %v9980_v43 = vld [vmem:[%s12180_s7 + $0x2c8] ss:$16 sps:$4 sm:$0xff]  }
 0x5d7   : > { %v5482_v52 = vmax.f32 %v5478_v42, 0.0  ;;  %v5484_v50 = vmax.f32 %v5480_v46, 0.0  ;;  %v5479_v24 = vadd.f32 %v5465_v38, %v5453_v0  ;;  %v5481_v58 = vadd.f32 %v5473_v11, %v5455_v57  ;;  %v9971_v38 = vld [vmem:[%s12180_s7 + $0xe8] ss:$16 sps:$4 sm:$0xff]   ;;  %v9985_v42 = vld [vmem:[%s12180_s7 + $0xac] ss:$16 sps:$4 sm:$0xff]  }
 0x5d8   : > { %v5409_v49 = vpop.f32.mrf.mxu0  ;;  %v5450_v59 = vpop.f32.mrf.mxu1  ;;  %v9974_v11 = vld [vmem:[%s12180_s7 + $0x2e8] ss:$16 sps:$4 sm:$0xff]   ;;  %v9988_v46 = vld [vmem:[%s12180_s7 + $0x2ac] ss:$16 sps:$4 sm:$0xff]  }
 0x5d9   : > { %v5490_v20 = vrot.slane %v5482_v52, 4  ;;  %v5492_v2 = vrot.slane %v5484_v50, 4  ;;  %v5483_v62 = vmax.f32 %v5479_v24, 0.0  ;;  %v5485_v12 = vmax.f32 %v5481_v58, 0.0  ;;  %v9983_v0 = vld [vmem:[%s12180_s7 + $0xa8] ss:$16 sps:$4 sm:$0xff]  }
 0x5da   : > { %v9986_v57 = vld [vmem:[%s12180_s7 + $0x2a8] ss:$16 sps:$4 sm:$0xff]   ;;  %v9991_v48 = vld [vmem:[%s12180_s7 + $0x8c] ss:$16 sps:$4 sm:$0xff]  }
 0x5db   : > { %v5498_v63 = vmax.f32 %v5482_v52, %v5490_v20  ;;  %v5500_v1 = vmax.f32 %v5484_v50, %v5492_v2  ;;  %v5491_v15 = vrot.slane %v5483_v62, 4  ;;  %v5493_v9 = vrot.slane %v5485_v12, 4  ;;  %v9994_v53 = vld [vmem:[%s12180_s7 + $0x28c] ss:$16 sps:$4 sm:$0xff]   ;;  %v9989_v52 = vld [vmem:[%s12180_s7 + $0x88] ss:$16 sps:$4 sm:$0xff]  }
 0x5dc   : > { %v9992_v50 = vld [vmem:[%s12180_s7 + $0x288] ss:$16 sps:$4 sm:$0xff]   ;;  %v9997_v24 = vld [vmem:[%s12180_s7 + $0x6c] ss:$16 sps:$4 sm:$0xff]  }
 0x5dd   : > { %v5502_v3 = vsel %vm664_vm1, %v5498_v63, -inf  ;;  %v5516_v8 = vsel %vm664_vm1, %v5500_v1, -inf  ;;  %v5499_v61 = vmax.f32 %v5483_v62, %v5491_v15  ;;  %v5501_v37 = vmax.f32 %v5485_v12, %v5493_v9  ;;  %v10000_v58 = vld [vmem:[%s12180_s7 + $0x26c] ss:$16 sps:$4 sm:$0xff]   ;;  %v9995_v49 = vld [vmem:[%s12180_s7 + $0x68] ss:$16 sps:$4 sm:$0xff]  }
 0x5de   : > { %v5503_v17 = vrot.slane %v5502_v3, 4  ;;  %v5517_v6 = vrot.slane %v5516_v8, 4  ;;  %v9998_v59 = vld [vmem:[%s12180_s7 + $0x268] ss:$16 sps:$4 sm:$0xff]   ;;  %v10003_v20 = vld [vmem:[%s12180_s7 + $0x4c] ss:$16 sps:$4 sm:$0xff]  }
 0x5df   : > { %v5509_v44 = vsel %vm664_vm1, %v5499_v61, -inf  ;;  %v5523_v23 = vsel %vm664_vm1, %v5501_v37, -inf  ;;  %v10006_v2 = vld [vmem:[%s12180_s7 + $0x24c] ss:$16 sps:$4 sm:$0xff]   ;;  %v10001_v62 = vld [vmem:[%s12180_s7 + $0x48] ss:$16 sps:$4 sm:$0xff]  }
 0x5e0   : > { %v5504_v25 = vmax.f32 %v5502_v3, %v5503_v17  ;;  %v5518_v13 = vmax.f32 %v5516_v8, %v5517_v6  ;;  %v5510_v10 = vrot.slane %v5509_v44, 4  ;;  %v5524_v31 = vrot.slane %v5523_v23, 4  ;;  %v10004_v12 = vld [vmem:[%s12180_s7 + $0x248] ss:$16 sps:$4 sm:$0xff]   ;;  %v10009_v63 = vld [vmem:[%s12180_s7 + $0x2c] ss:$16 sps:$4 sm:$0xff]  }
 0x5e1   : > { %v10012_v1 = vld [vmem:[%s12180_s7 + $0x22c] ss:$16 sps:$4 sm:$0xff]   ;;  %v10007_v15 = vld [vmem:[%s12180_s7 + $0x28] ss:$16 sps:$4 sm:$0xff]  }
 0x5e2   : > { %v5505_v5 = vrot.slane %v5504_v25, 2  ;;  %v5519_v30 = vrot.slane %v5518_v13, 2  ;;  %v5511_v18 = vmax.f32 %v5509_v44, %v5510_v10  ;;  %v5525_v19 = vmax.f32 %v5523_v23, %v5524_v31  ;;  %v10010_v9 = vld [vmem:[%s12180_s7 + $0x228] ss:$16 sps:$4 sm:$0xff]   ;;  %v10015_v3 = vld [vmem:[%s12180_s7 + $0xc] ss:$16 sps:$4 sm:$0xff]  }
 0x5e3   : > { %v10018_v8 = vld [vmem:[%s12180_s7 + $0x20c] ss:$16 sps:$4 sm:$0xff]   ;;  %v10013_v61 = vld [vmem:[%s12180_s7 + $0x8] ss:$16 sps:$4 sm:$0xff]  }
 0x5e4   : > { %v5506_v51 = vmax.f32 %v5504_v25, %v5505_v5  ;;  %v5520_v35 = vmax.f32 %v5518_v13, %v5519_v30  ;;  %v5512_v40 = vrot.slane %v5511_v18, 2  ;;  %v5526_v29 = vrot.slane %v5525_v19, 2  ;;  %v10016_v37 = vld [vmem:[%s12180_s7 + $0x208] ss:$16 sps:$4 sm:$0xff]   ;;  %v10021_v17 = vld [vmem:[%s12180_s7 + $0x1ec] ss:$16 sps:$4 sm:$0xff]  }
 0x5e5   : > { %v10024_v6 = vld [vmem:[%s12180_s7 + $0x3ec] ss:$16 sps:$4 sm:$0xff]   ;;  %v10019_v44 = vld [vmem:[%s12180_s7 + $0x1e8] ss:$16 sps:$4 sm:$0xff]  }
 0x5e6   : > { %v5507_v16 = vrot.slane %v5506_v51, 1  ;;  %v5521_v47 = vrot.slane %v5520_v35, 1  ;;  %v5513_v26 = vmax.f32 %v5511_v18, %v5512_v40  ;;  %v5527_v60 = vmax.f32 %v5525_v19, %v5526_v29  ;;  %v10022_v23 = vld [vmem:[%s12180_s7 + $0x3e8] ss:$16 sps:$4 sm:$0xff]   ;;  %v10027_v25 = vld [vmem:[%s12180_s7 + $0x1cc] ss:$16 sps:$4 sm:$0xff]  }
 0x5e7   : > { %v10030_v13 = vld [vmem:[%s12180_s7 + $0x3cc] ss:$16 sps:$4 sm:$0xff]   ;;  %v10025_v10 = vld [vmem:[%s12180_s7 + $0x1c8] ss:$16 sps:$4 sm:$0xff]  }
 0x5e8   : > { %v5514_v55 = vrot.slane %v5513_v26, 1  ;;  %v5528_v32 = vrot.slane %v5527_v60, 1  ;;  %v5508_v7 = vmax.f32 %v5506_v51, %v5507_v16  ;;  %v5522_v33 = vmax.f32 %v5520_v35, %v5521_v47  ;;  %v10028_v31 = vld [vmem:[%s12180_s7 + $0x3c8] ss:$16 sps:$4 sm:$0xff]   ;;  %v10033_v5 = vld [vmem:[%s12180_s7 + $0x1ac] ss:$16 sps:$4 sm:$0xff]  }
 0x5e9   : > { %v10036_v30 = vld [vmem:[%s12180_s7 + $0x3ac] ss:$16 sps:$4 sm:$0xff]   ;;  %v10031_v18 = vld [vmem:[%s12180_s7 + $0x1a8] ss:$16 sps:$4 sm:$0xff]  }
 0x5ea   : > { %v5515_v34 = vmax.f32 %v5513_v26, %v5514_v55  ;;  %v5529_v4 = vmax.f32 %v5527_v60, %v5528_v32  ;;  %v11923_v56 = vpack.c.bf16 %v5508_v7, %v5508_v7  ;;  %v11925_v39 = vpack.c.bf16 %v5522_v33, %v5522_v33  ;;  %v10034_v19 = vld [vmem:[%s12180_s7 + $0x3a8] ss:$16 sps:$4 sm:$0xff]   ;;  %v10039_v51 = vld [vmem:[%s12180_s7 + $0x18c] ss:$16 sps:$4 sm:$0xff]  }
 0x5eb   : > { %v10042_v35 = vld [vmem:[%s12180_s7 + $0x38c] ss:$16 sps:$4 sm:$0xff]   ;;  %v10037_v40 = vld [vmem:[%s12180_s7 + $0x188] ss:$16 sps:$4 sm:$0xff]  }
 0x5ec   : > { %v5531_v45 = vpack.c.bf16 %v5515_v34, %v5515_v34  ;;  %v5533_v36 = vpack.c.bf16 %v5529_v4, %v5529_v4  ;;  %v10040_v29 = vld [vmem:[%s12180_s7 + $0x388] ss:$16 sps:$4 sm:$0xff]   ;;  %v10045_v16 = vld [vmem:[%s12180_s7 + $0x16c] ss:$16 sps:$4 sm:$0xff]  }
 0x5ed   : > { %v10048_v47 = vld [vmem:[%s12180_s7 + $0x36c] ss:$16 sps:$4 sm:$0xff]   ;;  %v10043_v26 = vld [vmem:[%s12180_s7 + $0x168] ss:$16 sps:$4 sm:$0xff]  }
 0x5ee   : > { %6356 = vmatprep.mubr.bf16.mxu0 %v5531_v45  ;;  %6397 = vmatprep.mubr.bf16.mxu1 %v5533_v36  ;;  %v10046_v60 = vld [vmem:[%s12180_s7 + $0x368] ss:$16 sps:$4 sm:$0xff]   ;;  %v10051_v55 = vld [vmem:[%s12180_s7 + $0x14c] ss:$16 sps:$4 sm:$0xff]  }
 0x5ef   : > { %6357 = vmatmul.mubr.bf16.vlgmr.msra.gmra.mxu0 %v11923_v56  ;;  %6398 = vmatmul.mubr.bf16.vlgmr.msra.gmra.mxu1 %v11925_v39  ;;  %v10054_v32 = vld [vmem:[%s12180_s7 + $0x34c] ss:$16 sps:$4 sm:$0xff]   ;;  %v10049_v7 = vld [vmem:[%s12180_s7 + $0x148] ss:$16 sps:$4 sm:$0xff]  }
 0x5f0   : > { %6407 = vmatpush1.bf16.msra.mxu0 %v9971_v38  ;;  %6448 = vmatpush1.bf16.msra.mxu1 %v9974_v11  ;;  %v10052_v33 = vld [vmem:[%s12180_s7 + $0x348] ss:$16 sps:$4 sm:$0xff]   ;;  %v10057_v34 = vld [vmem:[%s12180_s7 + $0x12c] ss:$16 sps:$4 sm:$0xff]  }
 0x5f1   : > { %6438 = vmatprep.mubr.bf16.mxu0 %v5531_v45  ;;  %6479 = vmatprep.mubr.bf16.mxu1 %v5533_v36  ;;  %v10060_v4 = vld [vmem:[%s12180_s7 + $0x32c] ss:$16 sps:$4 sm:$0xff]   ;;  %v10055_v45 = vld [vmem:[%s12180_s7 + $0x128] ss:$16 sps:$4 sm:$0xff]  }
 0x5f2   : > { %6408 = vmatprep.subr.bf16.mxu0 %v9979_v21  ;;  %6449 = vmatprep.subr.bf16.mxu1 %v9982_v22  ;;  %v10058_v36 = vld [vmem:[%s12180_s7 + $0x328] ss:$16 sps:$4 sm:$0xff]   ;;  %v10063_v38 = vld [vmem:[%s12180_s7 + $0x10c] ss:$16 sps:$4 sm:$0xff]  }
 0x5f3   : > { %v10066_v11 = vld [vmem:[%s12180_s7 + $0x30c] ss:$16 sps:$4 sm:$0xff]   ;;  %v10061_v21 = vld [vmem:[%s12180_s7 + $0x108] ss:$16 sps:$4 sm:$0xff]  }
 0x5f4   : > { %6409 = vmatpush1.bf16.msra.mxu0 %v9977_v41  ;;  %6450 = vmatpush1.bf16.msra.mxu1 %v9980_v43  ;;  %v10064_v22 = vld [vmem:[%s12180_s7 + $0x308] ss:$16 sps:$4 sm:$0xff]  }
 0x5f5   : > { %6410 = vmatprep.subr.bf16.mxu0 %v9985_v42  ;;  %6451 = vmatprep.subr.bf16.mxu1 %v9988_v46  ;;  %v10069_v41 = vld [vmem:[#allocation16 + $0xe4] ss:$16 sps:$4 sm:$0xff]   ;;  %v10067_v43 = vld [vmem:[#allocation16 + $0xe0] ss:$16 sps:$4 sm:$0xff]  }
 0x5f6   : > { %v10072_v42 = vld [vmem:[#allocation16 + $0xc4] ss:$16 sps:$4 sm:$0xff]   ;;  %v10070_v46 = vld [vmem:[#allocation16 + $0xc0] ss:$16 sps:$4 sm:$0xff]  }
 0x5f8   : > { %6411 = vmatpush1.bf16.msra.mxu0 %v9983_v0  ;;  %6452 = vmatpush1.bf16.msra.mxu1 %v9986_v57  ;;  %v10075_v0 = vld [vmem:[#allocation16 + $0xa4] ss:$16 sps:$4 sm:$0xff]   ;;  %v10073_v57 = vld [vmem:[#allocation16 + $0xa0] ss:$16 sps:$4 sm:$0xff]  }
 0x5f9   : > { %6412 = vmatprep.subr.bf16.mxu0 %v9991_v48  ;;  %6453 = vmatprep.subr.bf16.mxu1 %v9994_v53  ;;  %v10078_v48 = vld [vmem:[#allocation16 + $0x84] ss:$16 sps:$4 sm:$0xff]   ;;  %v10076_v53 = vld [vmem:[#allocation16 + $0x80] ss:$16 sps:$4 sm:$0xff]  }
 0x5fc   : > { %6413 = vmatpush1.bf16.msra.mxu0 %v9989_v52  ;;  %6454 = vmatpush1.bf16.msra.mxu1 %v9992_v50  ;;  %v10115_v52 = vld [vmem:[#allocation16 + $0x2e0] ss:$16 sps:$4 sm:$0xff]   ;;  %v10081_v50 = vld [vmem:[#allocation16 + $0x64] ss:$16 sps:$4 sm:$0xff]  }
 0x5fd   : > { %6414 = vmatprep.subr.bf16.mxu0 %v9997_v24  ;;  %6455 = vmatprep.subr.bf16.mxu1 %v10000_v58  ;;  %v10117_v24 = vld [vmem:[#allocation16 + $0x2e4] ss:$16 sps:$4 sm:$0xff]   ;;  %v10079_v58 = vld [vmem:[#allocation16 + $0x60] ss:$16 sps:$4 sm:$0xff]  }
 0x600   : > { %6415 = vmatpush1.bf16.msra.mxu0 %v9995_v49  ;;  %6456 = vmatpush1.bf16.msra.mxu1 %v9998_v59  ;;  %v10084_v49 = vld [vmem:[#allocation16 + $0x44] ss:$16 sps:$4 sm:$0xff]   ;;  %v10082_v59 = vld [vmem:[#allocation16 + $0x40] ss:$16 sps:$4 sm:$0xff]  }
 0x601   : > { %6416 = vmatprep.subr.bf16.mxu0 %v10003_v20  ;;  %6457 = vmatprep.subr.bf16.mxu1 %v10006_v2  ;;  %v10127_v20 = vld [vmem:[#allocation16 + $0x2a0] ss:$16 sps:$4 sm:$0xff]   ;;  %v10129_v2 = vld [vmem:[#allocation16 + $0x2a4] ss:$16 sps:$4 sm:$0xff]  }
 0x604   : > { %6417 = vmatpush1.bf16.msra.mxu0 %v10001_v62  ;;  %6458 = vmatpush1.bf16.msra.mxu1 %v10004_v12  ;;  %v10087_v62 = vld [vmem:[#allocation16 + $0x24] ss:$16 sps:$4 sm:$0xff]   ;;  %v10085_v12 = vld [vmem:[#allocation16 + $0x20] ss:$16 sps:$4 sm:$0xff]  }
 0x605   : > { %6418 = vmatprep.subr.bf16.mxu0 %v10009_v63  ;;  %6459 = vmatprep.subr.bf16.mxu1 %v10012_v1  ;;  %v10133_v63 = vld [vmem:[#allocation16 + $0x280] ss:$16 sps:$4 sm:$0xff]   ;;  %v10135_v1 = vld [vmem:[#allocation16 + $0x284] ss:$16 sps:$4 sm:$0xff]  }
 0x608   : > { %6419 = vmatpush1.bf16.msra.mxu0 %v10007_v15  ;;  %6460 = vmatpush1.bf16.msra.mxu1 %v10010_v9  ;;  %v10090_v15 = vld [vmem:[#allocation16 + $0x4] ss:$16 sps:$4 sm:$0xff]   ;;  %v10088_v9 = vld [vmem:[#allocation16] ss:$16 sps:$4 sm:$0xff]  }
 0x609   : > { %6420 = vmatprep.subr.bf16.mxu0 %v10015_v3  ;;  %6461 = vmatprep.subr.bf16.mxu1 %v10018_v8  ;;  %v10139_v3 = vld [vmem:[#allocation16 + $0x260] ss:$16 sps:$4 sm:$0xff]   ;;  %v10141_v8 = vld [vmem:[#allocation16 + $0x264] ss:$16 sps:$4 sm:$0xff]  }
 0x60c   : > { %6421 = vmatpush1.bf16.msra.mxu0 %v10013_v61  ;;  %6462 = vmatpush1.bf16.msra.mxu1 %v10016_v37  ;;  %v10093_v61 = vld [vmem:[#allocation16 + $0x1e4] ss:$16 sps:$4 sm:$0xff]   ;;  %v10091_v37 = vld [vmem:[#allocation16 + $0x1e0] ss:$16 sps:$4 sm:$0xff]  }
 0x60d   : > { %6422 = vmatprep.subr.bf16.mxu0 %v10021_v17  ;;  %6463 = vmatprep.subr.bf16.mxu1 %v10024_v6  ;;  %v10145_v17 = vld [vmem:[#allocation16 + $0x240] ss:$16 sps:$4 sm:$0xff]   ;;  %v10147_v6 = vld [vmem:[#allocation16 + $0x244] ss:$16 sps:$4 sm:$0xff]  }
 0x610   : > { %6423 = vmatpush2.bf16.msra.mxu0 %v10019_v44  ;;  %6464 = vmatpush2.bf16.msra.mxu1 %v10022_v23  ;;  %v10096_v44 = vld [vmem:[#allocation16 + $0x1c4] ss:$16 sps:$4 sm:$0xff]   ;;  %v10094_v23 = vld [vmem:[#allocation16 + $0x1c0] ss:$16 sps:$4 sm:$0xff]  }
 0x611   : > { %6424 = vmatprep.subr.bf16.mxu0 %v10027_v25  ;;  %6465 = vmatprep.subr.bf16.mxu1 %v10030_v13  ;;  %v10151_v25 = vld [vmem:[#allocation16 + $0x220] ss:$16 sps:$4 sm:$0xff]   ;;  %v10153_v13 = vld [vmem:[#allocation16 + $0x224] ss:$16 sps:$4 sm:$0xff]  }
 0x614   : > { %6425 = vmatpush2.bf16.msra.mxu0 %v10025_v10  ;;  %6466 = vmatpush2.bf16.msra.mxu1 %v10028_v31  ;;  %v10099_v10 = vld [vmem:[#allocation16 + $0x1a4] ss:$16 sps:$4 sm:$0xff]   ;;  %v10097_v31 = vld [vmem:[#allocation16 + $0x1a0] ss:$16 sps:$4 sm:$0xff]  }
 0x615   : > { %6426 = vmatprep.subr.bf16.mxu0 %v10033_v5  ;;  %6467 = vmatprep.subr.bf16.mxu1 %v10036_v30  ;;  %v10157_v5 = vld [vmem:[#allocation16 + $0x200] ss:$16 sps:$4 sm:$0xff]   ;;  %v10159_v30 = vld [vmem:[#allocation16 + $0x204] ss:$16 sps:$4 sm:$0xff]  }
 0x618   : > { %6427 = vmatpush2.bf16.msra.mxu0 %v10031_v18  ;;  %6468 = vmatpush2.bf16.msra.mxu1 %v10034_v19  ;;  %v10102_v18 = vld [vmem:[#allocation16 + $0x184] ss:$16 sps:$4 sm:$0xff]   ;;  %v10100_v19 = vld [vmem:[#allocation16 + $0x180] ss:$16 sps:$4 sm:$0xff]  }
 0x619   : > { %6428 = vmatprep.subr.bf16.mxu0 %v10039_v51  ;;  %6469 = vmatprep.subr.bf16.mxu1 %v10042_v35  ;;  %v10163_v51 = vld [vmem:[#allocation16 + $0x3e0] ss:$16 sps:$4 sm:$0xff]   ;;  %v10165_v35 = vld [vmem:[#allocation16 + $0x3e4] ss:$16 sps:$4 sm:$0xff]  }
 0x61c   : > { %6429 = vmatpush2.bf16.msra.mxu0 %v10037_v40  ;;  %6470 = vmatpush2.bf16.msra.mxu1 %v10040_v29  ;;  %v10105_v40 = vld [vmem:[#allocation16 + $0x164] ss:$16 sps:$4 sm:$0xff]   ;;  %v10103_v29 = vld [vmem:[#allocation16 + $0x160] ss:$16 sps:$4 sm:$0xff]  }
 0x61d   : > { %6430 = vmatprep.subr.bf16.mxu0 %v10045_v16  ;;  %6471 = vmatprep.subr.bf16.mxu1 %v10048_v47  ;;  %v10169_v16 = vld [vmem:[#allocation16 + $0x3c0] ss:$16 sps:$4 sm:$0xff]   ;;  %v10171_v47 = vld [vmem:[#allocation16 + $0x3c4] ss:$16 sps:$4 sm:$0xff]  }
 0x620   : > { %6431 = vmatpush2.bf16.msra.mxu0 %v10043_v26  ;;  %6472 = vmatpush2.bf16.msra.mxu1 %v10046_v60  ;;  %v10108_v26 = vld [vmem:[#allocation16 + $0x144] ss:$16 sps:$4 sm:$0xff]   ;;  %v10106_v60 = vld [vmem:[#allocation16 + $0x140] ss:$16 sps:$4 sm:$0xff]  }
 0x621   : > { %6432 = vmatprep.subr.bf16.mxu0 %v10051_v55  ;;  %6473 = vmatprep.subr.bf16.mxu1 %v10054_v32  ;;  %v10175_v55 = vld [vmem:[#allocation16 + $0x3a0] ss:$16 sps:$4 sm:$0xff]   ;;  %v10177_v32 = vld [vmem:[#allocation16 + $0x3a4] ss:$16 sps:$4 sm:$0xff]  }
 0x624   : > { %6433 = vmatpush2.bf16.msra.mxu0 %v10049_v7  ;;  %6474 = vmatpush2.bf16.msra.mxu1 %v10052_v33  ;;  %v10111_v7 = vld [vmem:[#allocation16 + $0x124] ss:$16 sps:$4 sm:$0xff]   ;;  %v10109_v33 = vld [vmem:[#allocation16 + $0x120] ss:$16 sps:$4 sm:$0xff]  }
 0x625   : > { %6434 = vmatprep.subr.bf16.mxu0 %v10057_v34  ;;  %6475 = vmatprep.subr.bf16.mxu1 %v10060_v4  ;;  %v10181_v34 = vld [vmem:[#allocation16 + $0x380] ss:$16 sps:$4 sm:$0xff]   ;;  %v10183_v4 = vld [vmem:[#allocation16 + $0x384] ss:$16 sps:$4 sm:$0xff]  }
 0x628   : > { %6435 = vmatpush2.bf16.msra.mxu0 %v10055_v45  ;;  %6476 = vmatpush2.bf16.msra.mxu1 %v10058_v36  ;;  %v10114_v45 = vld [vmem:[#allocation16 + $0x104] ss:$16 sps:$4 sm:$0xff]   ;;  %v10112_v36 = vld [vmem:[#allocation16 + $0x100] ss:$16 sps:$4 sm:$0xff]  }
 0x629   : > { %6436 = vmatprep.subr.bf16.mxu0 %v10063_v38  ;;  %6477 = vmatprep.subr.bf16.mxu1 %v10066_v11  ;;  %v10187_v38 = vld [vmem:[#allocation16 + $0x360] ss:$16 sps:$4 sm:$0xff]   ;;  %v10189_v11 = vld [vmem:[#allocation16 + $0x364] ss:$16 sps:$4 sm:$0xff]  }
 0x62c   : > { %6437 = vmatpush2.bf16.msra.mxu0 %v10061_v21  ;;  %6478 = vmatpush2.bf16.msra.mxu1 %v10064_v22  ;;  %v10120_v21 = vld [vmem:[#allocation16 + $0xec] ss:$16 sps:$4 sm:$0xff]   ;;  %v10193_v22 = vld [vmem:[#allocation16 + $0x340] ss:$16 sps:$4 sm:$0xff]  }
 0x62d   : > { %7286 = vmatprep.subr.bf16.mxu0 %v10069_v41  ;;  %7327 = vmatprep.subr.bf16.mxu1 %v10117_v24  ;;  %v10195_v41 = vld [vmem:[#allocation16 + $0x344] ss:$16 sps:$4 sm:$0xff]  }
 0x62f   : > { %6439 = vmatmul.mubr.bf16.vlgmr.msra.gmra.mxu0 %v11923_v56  ;;  %6480 = vmatmul.mubr.bf16.vlgmr.msra.gmra.mxu1 %v11925_v39  ;;  %v10121_v56 = vld [vmem:[#allocation16 + $0x2c0] ss:$16 sps:$4 sm:$0xff]   ;;  %v10123_v39 = vld [vmem:[#allocation16 + $0x2c4] ss:$16 sps:$4 sm:$0xff]  }
 0x630   : > { %7287 = vmatpush1.bf16.msra.mxu0 %v10067_v43  ;;  %7328 = vmatpush1.bf16.msra.mxu1 %v10115_v52  ;;  %v10201_v43 = vld [vmem:[#allocation16 + $0x324] ss:$16 sps:$4 sm:$0xff]  }
 0x631   : > { %7288 = vmatprep.subr.bf16.mxu0 %v10072_v42  ;;  %7329 = vmatprep.subr.bf16.mxu1 %v10123_v39  ;;  %v10199_v42 = vld [vmem:[#allocation16 + $0x320] ss:$16 sps:$4 sm:$0xff]  }
 0x634   : > { %7289 = vmatpush1.bf16.msra.mxu0 %v10070_v46  ;;  %7330 = vmatpush1.bf16.msra.mxu1 %v10121_v56  ;;  %v10205_v46 = vld [vmem:[#allocation16 + $0x300] ss:$16 sps:$4 sm:$0xff]  }
 0x635   : > { %7290 = vmatprep.subr.bf16.mxu0 %v10075_v0  ;;  %7331 = vmatprep.subr.bf16.mxu1 %v10129_v2  ;;  %v10207_v0 = vld [vmem:[#allocation16 + $0x304] ss:$16 sps:$4 sm:$0xff]  }
 0x638   : > { %7291 = vmatpush1.bf16.msra.mxu0 %v10073_v57  ;;  %7332 = vmatpush1.bf16.msra.mxu1 %v10127_v20  ;;  %v10213_v57 = vld [vmem:[#allocation16 + $0x2ec] ss:$16 sps:$4 sm:$0xff]  }
 0x639   : > { %7292 = vmatprep.subr.bf16.mxu0 %v10078_v48  ;;  %7333 = vmatprep.subr.bf16.mxu1 %v10135_v1  ;;  %v12111_v48 = vld [vmem:[#allocation15] sm:$0xf] }
 0x63a   : > { %v6311_v52 = vrot.slane %v12111_v48, %v11905_v27 }
 0x63c   : > { %7293 = vmatpush1.bf16.msra.mxu0 %v10076_v53  ;;  %7334 = vmatpush1.bf16.msra.mxu1 %v10133_v63  ;;  %v6307_v53 = vrot.slane %v12111_v48, %v11901_v54 }
 0x63d   : > { %7294 = vmatprep.subr.bf16.mxu0 %v10081_v50  ;;  %7335 = vmatprep.subr.bf16.mxu1 %v10141_v8 }
 0x640   : > { %7295 = vmatpush1.bf16.msra.mxu0 %v10079_v58  ;;  %7336 = vmatpush1.bf16.msra.mxu1 %v10139_v3  ;;  %v10118_v3 = vld [vmem:[#allocation16 + $0xe8] ss:$16 sps:$4 sm:$0xff]  }
 0x641   : > { %7296 = vmatprep.subr.bf16.mxu0 %v10084_v49  ;;  %7337 = vmatprep.subr.bf16.mxu1 %v10147_v6  ;;  %v10130_v6 = vld [vmem:[#allocation16 + $0xa8] ss:$16 sps:$4 sm:$0xff]  }
 0x644   : > { %7297 = vmatpush1.bf16.msra.mxu0 %v10082_v59  ;;  %7338 = vmatpush1.bf16.msra.mxu1 %v10145_v17  ;;  %v10132_v17 = vld [vmem:[#allocation16 + $0xac] ss:$16 sps:$4 sm:$0xff]  }
 0x645   : > { %7298 = vmatprep.subr.bf16.mxu0 %v10087_v62  ;;  %7339 = vmatprep.subr.bf16.mxu1 %v10153_v13  ;;  %v10142_v13 = vld [vmem:[#allocation16 + $0x68] ss:$16 sps:$4 sm:$0xff]  }
 0x648   : > { %7299 = vmatpush1.bf16.msra.mxu0 %v10085_v12  ;;  %7340 = vmatpush1.bf16.msra.mxu1 %v10151_v25  ;;  %v10144_v25 = vld [vmem:[#allocation16 + $0x6c] ss:$16 sps:$4 sm:$0xff]  }
 0x649   : > { %7300 = vmatprep.subr.bf16.mxu0 %v10090_v15  ;;  %7341 = vmatprep.subr.bf16.mxu1 %v10159_v30  ;;  %v10154_v30 = vld [vmem:[#allocation16 + $0x28] ss:$16 sps:$4 sm:$0xff]  }
 0x64c   : > { %7301 = vmatpush1.bf16.msra.mxu0 %v10088_v9  ;;  %7342 = vmatpush1.bf16.msra.mxu1 %v10157_v5  ;;  %v10156_v5 = vld [vmem:[#allocation16 + $0x2c] ss:$16 sps:$4 sm:$0xff]  }
 0x64d   : > { %7302 = vmatprep.subr.bf16.mxu0 %v10093_v61  ;;  %7343 = vmatprep.subr.bf16.mxu1 %v10165_v35  ;;  %v10126_v61 = vld [vmem:[#allocation16 + $0xcc] ss:$16 sps:$4 sm:$0xff]   ;;  %v10166_v35 = vld [vmem:[#allocation16 + $0x1e8] ss:$16 sps:$4 sm:$0xff]  }
 0x650   : > { %7303 = vmatpush2.bf16.msra.mxu0 %v10091_v37  ;;  %7344 = vmatpush2.bf16.msra.mxu1 %v10163_v51  ;;  %v10124_v37 = vld [vmem:[#allocation16 + $0xc8] ss:$16 sps:$4 sm:$0xff]   ;;  %v10168_v51 = vld [vmem:[#allocation16 + $0x1ec] ss:$16 sps:$4 sm:$0xff]  }
 0x651   : > { %7304 = vmatprep.subr.bf16.mxu0 %v10096_v44  ;;  %7345 = vmatprep.subr.bf16.mxu1 %v10171_v47  ;;  %v10138_v44 = vld [vmem:[#allocation16 + $0x8c] ss:$16 sps:$4 sm:$0xff]   ;;  %v10178_v47 = vld [vmem:[#allocation16 + $0x1a8] ss:$16 sps:$4 sm:$0xff]  }
 0x654   : > { %7305 = vmatpush2.bf16.msra.mxu0 %v10094_v23  ;;  %7346 = vmatpush2.bf16.msra.mxu1 %v10169_v16  ;;  %v10136_v23 = vld [vmem:[#allocation16 + $0x88] ss:$16 sps:$4 sm:$0xff]   ;;  %v10180_v16 = vld [vmem:[#allocation16 + $0x1ac] ss:$16 sps:$4 sm:$0xff]  }
 0x655   : > { %7306 = vmatprep.subr.bf16.mxu0 %v10099_v10  ;;  %7347 = vmatprep.subr.bf16.mxu1 %v10177_v32  ;;  %v10150_v10 = vld [vmem:[#allocation16 + $0x4c] ss:$16 sps:$4 sm:$0xff]   ;;  %v10190_v32 = vld [vmem:[#allocation16 + $0x168] ss:$16 sps:$4 sm:$0xff]  }
 0x658   : > { %7307 = vmatpush2.bf16.msra.mxu0 %v10097_v31  ;;  %7348 = vmatpush2.bf16.msra.mxu1 %v10175_v55  ;;  %v10148_v31 = vld [vmem:[#allocation16 + $0x48] ss:$16 sps:$4 sm:$0xff]   ;;  %v10192_v55 = vld [vmem:[#allocation16 + $0x16c] ss:$16 sps:$4 sm:$0xff]  }
 0x659   : > { %7308 = vmatprep.subr.bf16.mxu0 %v10102_v18  ;;  %7349 = vmatprep.subr.bf16.mxu1 %v10183_v4  ;;  %v10162_v18 = vld [vmem:[#allocation16 + $0xc] ss:$16 sps:$4 sm:$0xff]  }
 0x65a   : > { %v10204_v4 = vld [vmem:[#allocation16 + $0x12c] ss:$16 sps:$4 sm:$0xff]  }
 0x65c   : > { %7309 = vmatpush2.bf16.msra.mxu0 %v10100_v19  ;;  %7350 = vmatpush2.bf16.msra.mxu1 %v10181_v34  ;;  %v10160_v19 = vld [vmem:[#allocation16 + $0x8] ss:$16 sps:$4 sm:$0xff]  }
 0x65d   : > { %7310 = vmatprep.subr.bf16.mxu0 %v10105_v40  ;;  %7351 = vmatprep.subr.bf16.mxu1 %v10189_v11  ;;  %v10174_v40 = vld [vmem:[#allocation16 + $0x1cc] ss:$16 sps:$4 sm:$0xff]   ;;  %v10196_v34 = vld [vmem:[#allocation16 + $0x148] ss:$16 sps:$4 sm:$0xff]  }
 0x660   : > { %7311 = vmatpush2.bf16.msra.mxu0 %v10103_v29  ;;  %7352 = vmatpush2.bf16.msra.mxu1 %v10187_v38  ;;  %v10172_v29 = vld [vmem:[#allocation16 + $0x1c8] ss:$16 sps:$4 sm:$0xff]  }
 0x661   : > { %7312 = vmatprep.subr.bf16.mxu0 %v10108_v26  ;;  %7353 = vmatprep.subr.bf16.mxu1 %v10195_v41  ;;  %v10186_v26 = vld [vmem:[#allocation16 + $0x18c] ss:$16 sps:$4 sm:$0xff]  }
 0x664   : > { %7313 = vmatpush2.bf16.msra.mxu0 %v10106_v60  ;;  %7354 = vmatpush2.bf16.msra.mxu1 %v10193_v22  ;;  %v10184_v60 = vld [vmem:[#allocation16 + $0x188] ss:$16 sps:$4 sm:$0xff]  }
 0x665   : > { %7314 = vmatprep.subr.bf16.mxu0 %v10111_v7  ;;  %7355 = vmatprep.subr.bf16.mxu1 %v10201_v43  ;;  %v10198_v7 = vld [vmem:[#allocation16 + $0x14c] ss:$16 sps:$4 sm:$0xff]  }
 0x666   : > { %v10210_v43 = vld [vmem:[#allocation16 + $0x10c] ss:$16 sps:$4 sm:$0xff]  }
 0x668   : > { %7315 = vmatpush2.bf16.msra.mxu0 %v10109_v33  ;;  %7356 = vmatpush2.bf16.msra.mxu1 %v10199_v42  ;;  %v6315_v33 = vrot.slane %v12111_v48, %v11903_v14 }
 0x669   : > { %7316 = vmatprep.subr.bf16.mxu0 %v10114_v45  ;;  %7357 = vmatprep.subr.bf16.mxu1 %v10207_v0  ;;  %v6319_v45 = vrot.slane %v12111_v48, %v11907_v28 }
 0x66c   : > { %7317 = vmatpush2.bf16.msra.mxu0 %v10112_v36  ;;  %7358 = vmatpush2.bf16.msra.mxu1 %v10205_v46 }
 0x66d   : > { %7368 = vmatprep.subr.bf16.mxu0 %v10120_v21  ;;  %7409 = vmatprep.subr.bf16.mxu1 %v10213_v57  ;;  %v10202_v21 = vld [vmem:[#allocation16 + $0x128] ss:$16 sps:$4 sm:$0xff]  }
 0x6af   : > { %v6358_v50 = vpop.f32.mrf.mxu0  ;;  %v6399_v24 = vpop.f32.mrf.mxu1 }
 0x6b0   : > { %v6359_v58 = vadd.f32 %v6358_v50, %v6307_v53 }
 0x6b1   : > { %v6360_v56 = vpop.f32.mrf.mxu0  ;;  %v6401_v39 = vpop.f32.mrf.mxu1 }
 0x6b2   : > { %v6400_v49 = vadd.f32 %v6399_v24, %v6359_v58  ;;  %v6361_v59 = vadd.f32 %v6360_v56, %v6311_v52  ;;  %v10208_v52 = vld [vmem:[#allocation16 + $0x108] ss:$16 sps:$4 sm:$0xff]  }
 0x6b3   : > { %v6362_v20 = vpop.f32.mrf.mxu0  ;;  %v6403_v2 = vpop.f32.mrf.mxu1 }
 0x6b4   : > { %v6402_v62 = vadd.f32 %v6401_v39, %v6361_v59  ;;  %v6488_v12 = vmax.f32 %v6400_v49, 0.0  ;;  %v10211_v39 = vld [vmem:[#allocation16 + $0x2e8] ss:$16 sps:$4 sm:$0xff]   ;;  %v10216_v59 = vld [vmem:[#allocation16 + $0x2cc] ss:$16 sps:$4 sm:$0xff]  }
 0x6b5   : > { %v6363_v63 = vpop.f32.mrf.mxu0  ;;  %v6404_v1 = vpop.f32.mrf.mxu1  ;;  %v10214_v20 = vld [vmem:[#allocation16 + $0x2c8] ss:$16 sps:$4 sm:$0xff]   ;;  %v10219_v2 = vld [vmem:[#allocation16 + $0x2ac] ss:$16 sps:$4 sm:$0xff]  }
 0x6b6   : > { %v6489_v15 = vmax.f32 %v6402_v62, 0.0  ;;  %v12117_v8 = vpack.c.bf16 %v6488_v12, %v6488_v12  ;;  %v10217_v62 = vld [vmem:[#allocation16 + $0x2a8] ss:$16 sps:$4 sm:$0xff]   ;;  %v10222_v12 = vld [vmem:[#allocation16 + $0x28c] ss:$16 sps:$4 sm:$0xff]  }
 0x6b7   : > { %v10259_v63 = vld [vmem:[#allocation19 + $0x78] sm:$0xff]  }
 0x6b8   : > { %v6493_v9 = vpack.c.bf16 %v6489_v15, %v6489_v15  ;;  %v10260_v1 = vld [vmem:[#allocation19 + $0x38] sm:$0xff]   ;;  %v10261_v15 = vld [vmem:[#allocation19 + $0x70] sm:$0xff]  }
 0x6ba   : > { %7318 = vmatprep.mubr.bf16.mxu0 %v6493_v9 }
 0x6bb   : > { %7319 = vmatmul.mubr.bf16.vlgmr.msra.gmra.mxu0 %v12117_v8 }
 0x6bc   : > { %7369 = vmatpush1.bf16.msra.mxu0 %v10118_v3  ;;  %7400 = vmatprep.mubr.bf16.mxu0 %v6493_v9  ;;  %v10220_v9 = vld [vmem:[#allocation16 + $0x288] ss:$16 sps:$4 sm:$0xff]  }
 0x6bd   : > { %7370 = vmatprep.subr.bf16.mxu0 %v10126_v61  ;;  %v10262_v3 = vld [vmem:[#allocation19 + $0x30] sm:$0xff]   ;;  %v10225_v61 = vld [vmem:[#allocation16 + $0x26c] ss:$16 sps:$4 sm:$0xff]  }
 0x6c0   : > { %7371 = vmatpush1.bf16.msra.mxu0 %v10124_v37  ;;  %v10223_v37 = vld [vmem:[#allocation16 + $0x268] ss:$16 sps:$4 sm:$0xff]  }
 0x6c1   : > { %7372 = vmatprep.subr.bf16.mxu0 %v10132_v17  ;;  %v10264_v17 = vld [vmem:[#allocation19 + $0x28] sm:$0xff]  }
 0x6c4   : > { %7373 = vmatpush1.bf16.msra.mxu0 %v10130_v6  ;;  %v10228_v6 = vld [vmem:[#allocation16 + $0x24c] ss:$16 sps:$4 sm:$0xff]  }
 0x6c5   : > { %7374 = vmatprep.subr.bf16.mxu0 %v10138_v44  ;;  %v10265_v44 = vld [vmem:[#allocation19 + $0x60] sm:$0xff]  }
 0x6c8   : > { %7375 = vmatpush1.bf16.msra.mxu0 %v10136_v23  ;;  %v10226_v23 = vld [vmem:[#allocation16 + $0x248] ss:$16 sps:$4 sm:$0xff]  }
 0x6c9   : > { %7376 = vmatprep.subr.bf16.mxu0 %v10144_v25  ;;  %v10266_v25 = vld [vmem:[#allocation19 + $0x20] sm:$0xff]  }
 0x6cc   : > { %7377 = vmatpush1.bf16.msra.mxu0 %v10142_v13  ;;  %v10231_v13 = vld [vmem:[#allocation16 + $0x22c] ss:$16 sps:$4 sm:$0xff]  }
 0x6cd   : > { %7378 = vmatprep.subr.bf16.mxu0 %v10150_v10  ;;  %v10267_v10 = vld [vmem:[#allocation19 + $0x58] sm:$0xff]  }
 0x6d0   : > { %7379 = vmatpush1.bf16.msra.mxu0 %v10148_v31  ;;  %v10229_v31 = vld [vmem:[#allocation16 + $0x228] ss:$16 sps:$4 sm:$0xff]  }
 0x6d1   : > { %7380 = vmatprep.subr.bf16.mxu0 %v10156_v5  ;;  %v10268_v5 = vld [vmem:[#allocation19 + $0x18] sm:$0xff]  }
 0x6d4   : > { %7381 = vmatpush1.bf16.msra.mxu0 %v10154_v30  ;;  %v10234_v30 = vld [vmem:[#allocation16 + $0x20c] ss:$16 sps:$4 sm:$0xff]  }
 0x6d5   : > { %7382 = vmatprep.subr.bf16.mxu0 %v10162_v18  ;;  %v10269_v18 = vld [vmem:[#allocation19 + $0x50] sm:$0xff]  }
 0x6d8   : > { %7383 = vmatpush1.bf16.msra.mxu0 %v10160_v19  ;;  %v10232_v19 = vld [vmem:[#allocation16 + $0x208] ss:$16 sps:$4 sm:$0xff]  }
 0x6d9   : > { %7384 = vmatprep.subr.bf16.mxu0 %v10168_v51  ;;  %v10270_v51 = vld [vmem:[#allocation19 + $0x10] sm:$0xff]  }
 0x6dc   : > { %7385 = vmatpush2.bf16.msra.mxu0 %v10166_v35  ;;  %v10237_v35 = vld [vmem:[#allocation16 + $0x3ec] ss:$16 sps:$4 sm:$0xff]  }
 0x6dd   : > { %7386 = vmatprep.subr.bf16.mxu0 %v10174_v40  ;;  %v10235_v40 = vld [vmem:[#allocation16 + $0x3e8] ss:$16 sps:$4 sm:$0xff]  }
 0x6e0   : > { %7387 = vmatpush2.bf16.msra.mxu0 %v10172_v29  ;;  %v10240_v29 = vld [vmem:[#allocation16 + $0x3cc] ss:$16 sps:$4 sm:$0xff]  }
 0x6e1   : > { %7388 = vmatprep.subr.bf16.mxu0 %v10180_v16  ;;  %v10238_v16 = vld [vmem:[#allocation16 + $0x3c8] ss:$16 sps:$4 sm:$0xff]  }
 0x6e4   : > { %7389 = vmatpush2.bf16.msra.mxu0 %v10178_v47  ;;  %v10243_v47 = vld [vmem:[#allocation16 + $0x3ac] ss:$16 sps:$4 sm:$0xff]  }
 0x6e5   : > { %7390 = vmatprep.subr.bf16.mxu0 %v10186_v26  ;;  %v10241_v26 = vld [vmem:[#allocation16 + $0x3a8] ss:$16 sps:$4 sm:$0xff]  }
 0x6e8   : > { %7391 = vmatpush2.bf16.msra.mxu0 %v10184_v60  ;;  %v10246_v60 = vld [vmem:[#allocation16 + $0x38c] ss:$16 sps:$4 sm:$0xff]  }
 0x6e9   : > { %7392 = vmatprep.subr.bf16.mxu0 %v10192_v55  ;;  %v10244_v55 = vld [vmem:[#allocation16 + $0x388] ss:$16 sps:$4 sm:$0xff]  }
 0x6ec   : > { %7393 = vmatpush2.bf16.msra.mxu0 %v10190_v32  ;;  %v10249_v32 = vld [vmem:[#allocation16 + $0x36c] ss:$16 sps:$4 sm:$0xff]  }
 0x6ed   : > { %7394 = vmatprep.subr.bf16.mxu0 %v10198_v7  ;;  %v10247_v7 = vld [vmem:[#allocation16 + $0x368] ss:$16 sps:$4 sm:$0xff]  }
 0x6ef   : > { %v6440_v36 = vpop.f32.mrf.mxu0  ;;  %v6481_v38 = vpop.f32.mrf.mxu1 }
 0x6f0   : > { %v6441_v11 = vadd.f32 %v6440_v36, %v6315_v33  ;;  %7395 = vmatpush2.bf16.msra.mxu0 %v10196_v34  ;;  %v10252_v33 = vld [vmem:[#allocation16 + $0x34c] ss:$16 sps:$4 sm:$0xff]   ;;  %v10250_v34 = vld [vmem:[#allocation16 + $0x348] ss:$16 sps:$4 sm:$0xff]  }
 0x6f1   : > { %v6442_v22 = vpop.f32.mrf.mxu0  ;;  %v6483_v41 = vpop.f32.mrf.mxu1  ;;  %7396 = vmatprep.subr.bf16.mxu0 %v10204_v4  ;;  %v10255_v4 = vld [vmem:[#allocation16 + $0x32c] ss:$16 sps:$4 sm:$0xff]  }
 0x6f2   : > { %v6482_v42 = vadd.f32 %v6481_v38, %v6441_v11  ;;  %v6443_v46 = vadd.f32 %v6442_v22, %v6319_v45  ;;  %v10253_v45 = vld [vmem:[#allocation16 + $0x328] ss:$16 sps:$4 sm:$0xff]   ;;  %v10258_v36 = vld [vmem:[#allocation16 + $0x30c] ss:$16 sps:$4 sm:$0xff]  }
 0x6f3   : > { %v6444_v0 = vpop.f32.mrf.mxu0  ;;  %v6485_v57 = vpop.f32.mrf.mxu1  ;;  %v10256_v38 = vld [vmem:[#allocation16 + $0x308] ss:$16 sps:$4 sm:$0xff]   ;;  %v10271_v11 = vld [vmem:[#allocation19 + $0x48] sm:$0xff]  }
 0x6f4   : > { %v6484_v53 = vadd.f32 %v6483_v41, %v6443_v46  ;;  %7397 = vmatpush2.bf16.msra.mxu0 %v10202_v21  ;;  %v6490_v50 = vmax.f32 %v6482_v42, 0.0  ;;  %v10272_v21 = vld [vmem:[#allocation19 + $0x8] sm:$0xff]   ;;  %v10273_v22 = vld [vmem:[#allocation19 + $0x40] sm:$0xff]   ;;  %v10276_v42 = vld [vmem:[#allocation19 + $0xb8] sm:$0xff]  }
 0x6f5   : > { %v6445_v24 = vpop.f32.mrf.mxu0  ;;  %v6486_v58 = vpop.f32.mrf.mxu1  ;;  %7398 = vmatprep.subr.bf16.mxu0 %v10210_v43  ;;  %v10274_v41 = vld [vmem:[#allocation19] sm:$0xff]   ;;  %v10275_v43 = vld [vmem:[#allocation19 + $0xf8] sm:$0xff]   ;;  %v10277_v46 = vld [vmem:[#allocation19 + $0xf0] sm:$0xff]  }
 0x6f6   : > { %v6491_v48 = vmax.f32 %v6484_v53, 0.0  ;;  %v12124_v49 = vpack.c.bf16 %v6490_v50, %v6490_v50  ;;  %v10278_v0 = vld [vmem:[#allocation19 + $0xb0] sm:$0xff]   ;;  %v10279_v57 = vld [vmem:[#allocation19 + $0xe8] sm:$0xff]   ;;  %v10282_v50 = vld [vmem:[#allocation19 + $0xa0] sm:$0xff]  }
 0x6f7   : > { %v10280_v53 = vld [vmem:[#allocation19 + $0xa8] sm:$0xff]   ;;  %v10283_v24 = vld [vmem:[#allocation19 + $0xd8] sm:$0xff]  }
 0x6f8   : > { %v6495_v56 = vpack.c.bf16 %v6491_v48, %v6491_v48  ;;  %7399 = vmatpush2.bf16.msra.mxu0 %v10208_v52  ;;  %v10281_v52 = vld [vmem:[#allocation19 + $0xe0] sm:$0xff]   ;;  %v10284_v58 = vld [vmem:[#allocation19 + $0x98] sm:$0xff]   ;;  %v10285_v48 = vld [vmem:[#allocation19 + $0xd0] sm:$0xff]  }
 0x6f9   : > { %8806 = vmatprep.subr.bf16.mxu0 %v10259_v63  ;;  %v10290_v63 = vld [vmem:[#allocation19 + $0x80] sm:$0xff]  }
 0x6fa   : > { %7359 = vmatprep.mubr.bf16.mxu1 %v6495_v56 }
 0x6fb   : > { %7360 = vmatmul.mubr.bf16.vlgmr.msra.gmra.mxu1 %v12124_v49  ;;  %7401 = vmatmul.mubr.bf16.vlgmr.msra.gmra.mxu0 %v12117_v8  ;;  %v10263_v8 = vld [vmem:[#allocation19 + $0x68] sm:$0xff]  }
 0x6fc   : > { %7410 = vmatpush1.bf16.msra.mxu1 %v10211_v39  ;;  %7441 = vmatprep.mubr.bf16.mxu1 %v6495_v56  ;;  %v10286_v56 = vld [vmem:[#allocation19 + $0x90] sm:$0xff]  }
 0x6fd   : > { %7411 = vmatprep.subr.bf16.mxu1 %v10216_v59  ;;  %8807 = vmatpush3.bf16.msra.mxu0 %v10260_v1  ;;  %v10287_v59 = vld [vmem:[#allocation19 + $0xc8] sm:$0xff]   ;;  %v6624_v1 = vld [vmem:[#allocation18] sm:$0xf] }
 0x6fe   : > { %8808 = vmatprep.subr.bf16.mxu0 %v10261_v15  ;;  %v7269_v15 = vrot.slane %v6624_v1, %v11901_v54  ;;  %v7277_v54 = vrot.slane %v6624_v1, %v11903_v14 }
 0x700   : > { %7412 = vmatpush1.bf16.msra.mxu1 %v10214_v20 }
 0x701   : > { %7413 = vmatprep.subr.bf16.mxu1 %v10219_v2  ;;  %8809 = vmatpush3.bf16.msra.mxu0 %v10262_v3  ;;  %v10288_v2 = vld [vmem:[#allocation19 + $0x88] sm:$0xff]  }
 0x702   : > { %8810 = vmatprep.subr.bf16.mxu0 %v10263_v8 }
 0x704   : > { %7414 = vmatpush1.bf16.msra.mxu1 %v10217_v62 }
 0x705   : > { %7415 = vmatprep.subr.bf16.mxu1 %v10222_v12  ;;  %8811 = vmatpush3.bf16.msra.mxu0 %v10264_v17  ;;  %v10289_v12 = vld [vmem:[#allocation19 + $0xc0] sm:$0xff]  }
 0x706   : > { %8812 = vmatprep.subr.bf16.mxu0 %v10265_v44 }
 0x708   : > { %7416 = vmatpush1.bf16.msra.mxu1 %v10220_v9  ;;  %v7273_v9 = vrot.slane %v6624_v1, %v11905_v27  ;;  %v7281_v27 = vrot.slane %v6624_v1, %v11907_v28 }
 0x709   : > { %7417 = vmatprep.subr.bf16.mxu1 %v10225_v61  ;;  %8813 = vmatpush3.bf16.msra.mxu0 %v10266_v25 }
 0x70a   : > { %8814 = vmatprep.subr.bf16.mxu0 %v10267_v10 }
 0x70c   : > { %7418 = vmatpush1.bf16.msra.mxu1 %v10223_v37 }
 0x70d   : > { %7419 = vmatprep.subr.bf16.mxu1 %v10228_v6  ;;  %8815 = vmatpush3.bf16.msra.mxu0 %v10268_v5 }
 0x70e   : > { %8816 = vmatprep.subr.bf16.mxu0 %v10269_v18 }
 0x710   : > { %7420 = vmatpush1.bf16.msra.mxu1 %v10226_v23 }
 0x711   : > { %7421 = vmatprep.subr.bf16.mxu1 %v10231_v13  ;;  %8817 = vmatpush3.bf16.msra.mxu0 %v10270_v51 }
 0x712   : > { %8818 = vmatprep.subr.bf16.mxu0 %v10271_v11 }
 0x714   : > { %7422 = vmatpush1.bf16.msra.mxu1 %v10229_v31 }
 0x715   : > { %7423 = vmatprep.subr.bf16.mxu1 %v10234_v30  ;;  %8819 = vmatpush3.bf16.msra.mxu0 %v10272_v21 }
 0x716   : > { %8820 = vmatprep.subr.bf16.mxu0 %v10273_v22 }
 0x718   : > { %7424 = vmatpush1.bf16.msra.mxu1 %v10232_v19 }
 0x719   : > { %7425 = vmatprep.subr.bf16.mxu1 %v10237_v35  ;;  %8821 = vmatpush3.bf16.msra.mxu0 %v10274_v41 }
 0x71c   : > { %7426 = vmatpush2.bf16.msra.mxu1 %v10235_v40 }
 0x71d   : > { %7427 = vmatprep.subr.bf16.mxu1 %v10240_v29 }
 0x720   : > { %7428 = vmatpush2.bf16.msra.mxu1 %v10238_v16 }
 0x721   : > { %7429 = vmatprep.subr.bf16.mxu1 %v10243_v47 }
 0x724   : > { %7430 = vmatpush2.bf16.msra.mxu1 %v10241_v26 }
 0x725   : > { %7431 = vmatprep.subr.bf16.mxu1 %v10246_v60 }
 0x728   : > { %7432 = vmatpush2.bf16.msra.mxu1 %v10244_v55 }
 0x729   : > { %7433 = vmatprep.subr.bf16.mxu1 %v10249_v32 }
 0x72c   : > { %7434 = vmatpush2.bf16.msra.mxu1 %v10247_v7 }
 0x72d   : > { %7435 = vmatprep.subr.bf16.mxu1 %v10252_v33 }
 0x730   : > { %7436 = vmatpush2.bf16.msra.mxu1 %v10250_v34 }
 0x731   : > { %7437 = vmatprep.subr.bf16.mxu1 %v10255_v4 }
 0x734   : > { %7438 = vmatpush2.bf16.msra.mxu1 %v10253_v45 }
 0x735   : > { %7439 = vmatprep.subr.bf16.mxu1 %v10258_v36  ;;  %v7522_v36 = vld [vmem:[#allocation21] sm:$0x1] }
 0x738   : > { %7440 = vmatpush2.bf16.msra.mxu1 %v10256_v38 }
 0x739   : > { %8828 = vmatprep.subr.bf16.mxu1 %v10275_v43 }
 0x73b   : > { %7442 = vmatmul.mubr.bf16.vlgmr.msra.gmra.mxu1 %v12124_v49 }
 0x73c   : > { %8829 = vmatpush3.bf16.msra.mxu1 %v10276_v42 }
 0x73d   : > { %8830 = vmatprep.subr.bf16.mxu1 %v10277_v46 }
 0x740   : > { %8831 = vmatpush3.bf16.msra.mxu1 %v10278_v0 }
 0x741   : > { %8832 = vmatprep.subr.bf16.mxu1 %v10279_v57 }
 0x744   : > { %8833 = vmatpush3.bf16.msra.mxu1 %v10280_v53 }
 0x745   : > { %8834 = vmatprep.subr.bf16.mxu1 %v10281_v52 }
 0x748   : > { %8835 = vmatpush3.bf16.msra.mxu1 %v10282_v50 }
 0x749   : > { %8836 = vmatprep.subr.bf16.mxu1 %v10283_v24 }
 0x74c   : > { %8837 = vmatpush3.bf16.msra.mxu1 %v10284_v58 }
 0x74d   : > { %8838 = vmatprep.subr.bf16.mxu1 %v10285_v48 }
 0x750   : > { %8839 = vmatpush3.bf16.msra.mxu1 %v10286_v56 }
 0x751   : > { %8840 = vmatprep.subr.bf16.mxu1 %v10287_v59 }
 0x754   : > { %8841 = vmatpush3.bf16.msra.mxu1 %v10288_v2 }
 0x755   : > { %8842 = vmatprep.subr.bf16.mxu1 %v10289_v12 }
 0x758   : > { %8843 = vmatpush3.bf16.msra.mxu1 %v10290_v63 }
 0x77b   : > { %v7320_v39 = vpop.f32.mrf.mxu0 }
 0x77c   : > { %v7321_v3 = vadd.f32 %v7320_v39, %v7269_v15 }
 0x77d   : > { %v7322_v49 = vpop.f32.mrf.mxu0 }
 0x77e   : > { %v7323_v37 = vadd.f32 %v7322_v49, %v7273_v9 }
 0x77f   : > { %v7324_v20 = vpop.f32.mrf.mxu0 }
 0x781   : > { %v7325_v62 = vpop.f32.mrf.mxu0 }
 0x7bb   : > { %v7361_v61 = vpop.f32.mrf.mxu1  ;;  %v7402_v8 = vpop.f32.mrf.mxu0 }
 0x7bc   : > { %v7362_v17 = vadd.f32 %v7361_v61, %v7321_v3  ;;  %v7403_v51 = vadd.f32 %v7402_v8, %v7277_v54 }
 0x7bd   : > { %v7363_v6 = vpop.f32.mrf.mxu1  ;;  %v7404_v44 = vpop.f32.mrf.mxu0 }
 0x7be   : > { %v7364_v23 = vadd.f32 %v7363_v6, %v7323_v37  ;;  %v7450_v25 = vmax.f32 %v7362_v17, 0.0  ;;  %v7405_v40 = vadd.f32 %v7404_v44, %v7281_v27 }
 0x7bf   : > { %v7365_v13 = vpop.f32.mrf.mxu1  ;;  %v7406_v10 = vpop.f32.mrf.mxu0 }
 0x7c0   : > { %v7451_v31 = vmax.f32 %v7364_v23, 0.0  ;;  %v7454_v19 = vpack.c.bf16 %v7450_v25, %v7450_v25 }
 0x7c1   : > { %v7366_v5 = vpop.f32.mrf.mxu1  ;;  %v7407_v30 = vpop.f32.mrf.mxu0 }
 0x7c2   : > { %v7455_v18 = vpack.c.bf16 %v7451_v31, %v7451_v31 }
 0x7c4   : > { %7747 = vmatprep.mubr.bf16.mxu0 %v7455_v18 }
 0x7c5   : > { %7748 = vmatmul.mubr.bf16.vlgmr.msra.gmra.mxu0 %v7454_v19 }
 0x7fb   : > { %v7443_v35 = vpop.f32.mrf.mxu1 }
 0x7fc   : > { %v7444_v29 = vadd.f32 %v7443_v35, %v7403_v51 }
 0x7fd   : > { %v7445_v16 = vpop.f32.mrf.mxu1 }
 0x7fe   : > { %v7446_v47 = vadd.f32 %v7445_v16, %v7405_v40  ;;  %v7452_v26 = vmax.f32 %v7444_v29, 0.0 }
 0x7ff   : > { %v7447_v60 = vpop.f32.mrf.mxu1 }
 0x800   : > { %v7453_v55 = vmax.f32 %v7446_v47, 0.0  ;;  %v7456_v33 = vpack.c.bf16 %v7452_v26, %v7452_v26 }
 0x801   : > { %v7448_v32 = vpop.f32.mrf.mxu1 }
 0x802   : > { %v7457_v7 = vpack.c.bf16 %v7453_v55, %v7453_v55 }
 0x804   : > { %7787 = vmatprep.mubr.bf16.mxu1 %v7457_v7 }
 0x805   : > { %7788 = vmatmul.mubr.bf16.vlgmr.msra.gmra.mxu1 %v7456_v33 }
 0x885   : > { %v8822_v34 = vpop.f32.mrf.mxu0 }
 0x887   : > { %v8823_v14 = vpop.f32.mrf.mxu0 }
 0x888   : > { %v8824_v45 = vadd.f32 %v8823_v14, %v8822_v34 }
 0x889   : > { %v8825_v4 = vpop.f32.mrf.mxu0 }
 0x88a   : > { %v7750_v21 = vadd.f32 %v8824_v45, %v7522_v36 }
 0x88b   : > { %v8826_v28 = vpop.f32.mrf.mxu0 }
 0x8c5   : > { %v8844_v38 = vpop.f32.mrf.mxu1 }
 0x8c7   : > { %v8845_v11 = vpop.f32.mrf.mxu1 }
 0x8c8   : > { %v8846_v22 = vadd.f32 %v8845_v11, %v8844_v38 }
 0x8c9   : > { %v8847_v41 = vpop.f32.mrf.mxu1 }
 0x8ca   : > { %v7790_v43 = vadd.f32 %v8846_v22, %v7750_v21 }
 0x8cb   : > { %v8848_v42 = vpop.f32.mrf.mxu1 }
 0x8cc   : > { %7795 = vst [vmem:[%s580_s2] sm:$0x1] %v7790_v43 }
 0x8cd   : > { %10594 = shalt.err (!%p10591_p8)
}
 0x8ce   : > { %s10595_s15 = scalar_lea.hbm %s12138_s20, 16  ;;  %s10599_s16 = scalar_lea.hbm %s12186_s13, 32 }
 0x8cf   : > { %p10596_p11 = scmp.ne.s32.totalorder %s12138_s20, %s10595_s15  ;;  %p10600_p2 = scmp.lt.s32.totalorder %s12138_s20, %s12186_s13 }
 0x8d0   : > { %p10601_p9 = scmp.lt.s32.totalorder %s10599_s16, %s10595_s15 }
 0x8d1   : > { %p10597_p0 = pnand %p10596_p11, %p12228_p7 }
 0x8d2   : > { %p10602_p3 = por %p10601_p9, %p10600_p2 }
 0x8d3   : > { %p10598_p1 = pneg %p10597_p0 }
 0x8d5   : > { %p10603_p4 = pnand %p10602_p3, %p10598_p1 }
 0x8d7   : > { %10606 = shalt.err (!%p10603_p4)
}
 0x8d8   : > { %9310 = dma.vmem_to_hbm [thread:$0]  (%p12228_p7), %s7810_s14, 16, %s12138_s20, %s7797_s30  }
 0x8d9 PF: > { %s12229_s22 = sld [smem:[#allocation33_spill]]  ;;  %p9372_p13 = scmp.ge.s32.totalorder %s10665_s28, 2 }
 0x8da   : > { %s7821_s17 = sand.u32 1, %s10653_s25  }
 0x8db   : > { %s7822_s23 = scalar_lea.sflag [#allocation6], %s7821_s17 }
 0x8df   : > { %p12230_p5 = scmp.ne.s32.totalorder %s12229_s22, 0 }
 0x8e1   : > { %p9347_p6 = pnand %p9372_p13, %p12230_p5 }
 0x8e3   : > { %p9348_p10 = pneg %p9347_p6 }
 0x8e5   : > { %10648 = dma.done.wait (%p9348_p10), %s7822_s23, 16  }
 0x8e6   : > { %10650 = vsyncadd (%p9348_p10), %s7822_s23, 4294967280  ;;  %s12231_s28 = sld [smem:[#allocation31_spill]]  ;;  %s12234_s25 = smov %s10657_s26 }
 0x8e7   : > { %s12232_s29 = sld [smem:[#allocation30_spill]] }
 0x8e8   : > { %s12233_s27 = sld [smem:[#allocation32_spill]] }
 0x8ec   : > { %p29_p12 = scmp.ge.s32.totalorder %s12231_s28, 4  }
 0x8ed   : > { %s12235_s26 = smov %s12232_s29 }
 0x8ee   :  { %31 = sbr.rel (!%p29_p12) target bundleno = 12 (0xc), region = 176 }
 0x8f3   :  { %7826 = vsyncpa [#allocation5], 1 }
 0x8f4   :  { %7828 = vsyncpa [#allocation5 + $0x1], 1 }
 0x8f5   :  { %7829 = vsyncpa [#allocation8], 1 }
 0x8f6   :  { %7830 = vsyncpa [#allocation11], 1 }
 0x8f7   :  { %7831 = vsyncpa [#allocation14], 1 }
 0x8f8   :  { %7832 = vsyncpa [#allocation17], 1 }
 0x8f9   :  { %7833 = vsyncpa [#allocation20], 1 }
 0x8fa   :  { %7834 = vsyncpa [#allocation6], 1 }
 0x8fb   :  { %7836 = vsyncpa [#allocation6 + $0x1], 1 }

</bundles_post_ra>
